<compile_context>
chip_gen: v7x
topology: tpu7x:2x2x1
jax: 0.10.0
libtpu: 0.0.40
codegen_flags: <defaults>
</compile_context>

<pallas_src>
import functools

import jax
import jax.numpy as jnp
from jax import lax
from jax.experimental import pallas as pl
from jax.experimental.pallas import tpu as pltpu


def _round_up(x, m):
    return ((x + m - 1) // m) * m


def _sigmoid(x):
    # One transcendental (tanh on the EUP) instead of exp + divide.
    return 0.5 * jnp.tanh(0.5 * x) + 0.5


def _num_tensorcores():
    """>=2 only on multi-TensorCore chips (v7x); v5e/v6e have a single TC."""
    try:
        kind = jax.devices()[0].device_kind.lower()
    except Exception:
        return 1
    return 2 if ("v7" in kind or "7x" in kind) else 1


def _physical_vmem_bytes():
    try:
        return int(pltpu.get_tpu_info().vmem_capacity_bytes)
    except Exception:
        return 64 << 20          # conservative (v7x-sized) fallback


# ---------------------------------------------------------------------------
# Parameter repacking: run ONCE, outside the jitted per-call path.
#   weight_ih (4H, I), weight_hh (4H, H), bias_* (4H,)
#   -> wih (I, 4Hp) bf16, whh (Hp, 4Hp) bf16, bias (1, 4Hp) f32
# Gate layout is [i|f|g|o], each gate padded to Hp = round_up(H, 128) lanes.
# ---------------------------------------------------------------------------
def pack_lstm_params(weight_ih, weight_hh, bias_ih, bias_hh):
    f32, bf16 = jnp.float32, jnp.bfloat16
    four_h, _ = weight_ih.shape
    H = four_h // 4
    Hp = _round_up(H, 128)

    def gate_pad(w):                       # (4H, cols) -> (cols, 4*Hp)
        cols = w.shape[1]
        w4 = w.astype(f32).reshape(4, H, cols)
        w4 = jnp.pad(w4, ((0, 0), (0, Hp - H), (0, 0)))
        return jnp.transpose(w4, (2, 0, 1)).reshape(cols, 4 * Hp)

    wih = gate_pad(weight_ih).astype(bf16)                                   # (I, 4Hp)
    whh = jnp.pad(gate_pad(weight_hh), ((0, Hp - H), (0, 0))).astype(bf16)   # (Hp, 4Hp)
    b = (bias_ih + bias_hh).astype(f32).reshape(4, H)
    b = jnp.pad(b, ((0, 0), (0, Hp - H))).reshape(1, 4 * Hp)                 # (1, 4Hp)
    return {"wih": wih, "whh": whh, "bias": b}


# ---------------------------------------------------------------------------
# Kernel 1: hoisted input projection   xw = x @ W_ih^T + (b_ih + b_hh)
#   grid = (M // tm, 4Hp // tn), both "parallel".  Output stored in bf16.
# ---------------------------------------------------------------------------
def _input_proj_kernel(x_ref, w_ref, b_ref, out_ref):
    out_ref[...] = (
        jnp.dot(x_ref[...], w_ref[...], preferred_element_type=jnp.float32)
        + b_ref[...]
    ).astype(out_ref.dtype)


# ---------------------------------------------------------------------------
# Kernel 2: the recurrence.  Processes T_blk timesteps per grid step.
#   grid = (num_batch_blocks, num_time_blocks), semantics ("parallel","arbitrary")
#   xw_ref : (T_blk, Bb, 4Hp) bf16   precomputed projection (+ folded bias)
#   h0/c0  : (Bb, Hp) f32            initial state
#   whh    : (Hp, 4Hp) bf16          recurrent weights (gate-padded, Buffered(1))
#   out    : (T_blk, Bb, Hp) f32     hidden outputs for this time chunk
#   hN/cN  : (Bb, Hp) f32            final state (written on last time block)
#   h_scr/c_scr : (Bb, Hp) f32       VMEM-resident recurrent state
# NOTE: the h/c scratch carries state across the *time* grid axis.  This is only
# correct because time (axis 1) is the fastest-varying grid axis and the scratch
# is re-initialized at t == 0 for every batch block; do not reorder the grid.
# ---------------------------------------------------------------------------
def _lstm_recurrent_kernel(xw_ref, h0_ref, c0_ref, whh_ref,
                           out_ref, hN_ref, cN_ref,
                           h_scr, c_scr, *, T_blk, Hp, seq):
    t = pl.program_id(1)

    @pl.when(t == 0)
    def _():
        h_scr[...] = h0_ref[...]
        c_scr[...] = c0_ref[...]

    # Per-gate weight slabs, loaded once per time chunk (lane-tile aligned).
    w_gates = [whh_ref[:, k * Hp:(k + 1) * Hp] for k in range(4)]
    need_mask = (seq % T_blk) != 0          # static Python decision

    def step(lt, h, c):
        xw_t = xw_ref[lt]                   # (Bb, 4Hp) bf16
        h_bf = h.astype(jnp.bfloat16)
        # Per-gate MXU pushes so the EUP activation of gate k overlaps the
        # matmul push of gate k+1 (single full-width dot serializes MXU->EUP).
        pre = [
            xw_t[:, k * Hp:(k + 1) * Hp].astype(jnp.float32)
            + jnp.dot(h_bf, w_gates[k], preferred_element_type=jnp.float32)
            for k in range(4)
        ]
        i_g = _sigmoid(pre[0])
        f_g = _sigmoid(pre[1])
        g_g = jnp.tanh(pre[2])
        o_g = _sigmoid(pre[3])
        cy = f_g * c + i_g * g_g
        hy = o_g * jnp.tanh(cy)
        if need_mask:                       # only emitted when seq % T_blk != 0
            valid = (t * T_blk + lt) < seq
            hy = jnp.where(valid, hy, h)
            cy = jnp.where(valid, cy, c)
        out_ref[lt] = hy
        return hy, cy

    h = h_scr[...]
    c = c_scr[...]
    if T_blk <= 16:
        # Short chunk: fully unrolled static loop (max LLO scheduling visibility).
        for lt in range(T_blk):
            h, c = step(lt, h, c)
    else:
        # Long chunk: fori_loop bounds vreg live ranges / compile time.
        def body(lt, carry):
            return step(lt, *carry)
        h, c = lax.fori_loop(0, T_blk, body, (h, c), unroll=4)

    h_scr[...] = h
    c_scr[...] = c

    @pl.when(t == pl.num_programs(1) - 1)
    def _():
        hN_ref[...] = h
        cN_ref[...] = c


# ---------------------------------------------------------------------------
# Wrapper: mirrors LSTMLayer.forward
#   x:     (seq, batch, input_size)
#   state: ((1, batch, hidden), (1, batch, hidden))
#   params: output of pack_lstm_params (precomputed once)
#   returns (outputs (seq, batch, hidden), (h_n (1,B,H), c_n (1,B,H)))
# ---------------------------------------------------------------------------
def lstm_layer_pallas(x, state, params, *, hidden_size, t_blk=None, whh_buffers=1):
    f32, bf16 = jnp.float32, jnp.bfloat16
    seq, B, I = x.shape
    H = hidden_size
    wih, whh, bias = params["wih"], params["whh"], params["bias"]
    Hp = whh.shape[0]

    Bp = _round_up(B, 8)
    ncores = _num_tensorcores()
    phys_vmem = _physical_vmem_bytes()

    # Batch split across TensorCores only on multi-TC chips (v7x).  On 1-TC
    # v5e/v6e it would just serialize the recurrence twice at worse MXU fill.
    nb = 2 if (ncores >= 2 and Bp % 32 == 0) else 1
    Bb = Bp // nb

    # ---- VMEM-budgeted time-chunk size (prefer divisors of seq -> no mask) --
    whh_bytes = Hp * (4 * Hp) * 2 * max(whh_buffers, 1)
    fixed = whh_bytes + 10 * Bb * Hp * 4 + (2 << 20)   # h0/c0/hN/cN + scratch + slack
    budget = int(phys_vmem * 0.6)

    def _fits(tb):
        xw_blk = 2 * tb * Bb * (4 * Hp) * 2            # bf16 xw, double-buffered
        out_blk = 2 * tb * Bb * Hp * 4                 # f32 outputs, double-buffered
        return fixed + xw_blk + out_blk <= budget

    if t_blk is None:
        cap = min(seq, 64)
        divs = [d for d in range(cap, 0, -1) if seq % d == 0 and _fits(d)]
        if divs:
            t_blk = divs[0]
        else:
            t_blk = 1
            while t_blk * 2 <= cap and _fits(t_blk * 2):
                t_blk *= 2
    seq_p = _round_up(seq, t_blk)
    nt = seq_p // t_blk

    # ---- pad activations (single lax.pad each) -------------------------------
    x_p = jnp.pad(x.astype(bf16), ((0, seq_p - seq), (0, Bp - B), (0, 0)))
    h0 = jnp.pad(state[0].reshape(B, H).astype(f32), ((0, Bp - B), (0, Hp - H)))
    c0 = jnp.pad(state[1].reshape(B, H).astype(f32), ((0, Bp - B), (0, Hp - H)))

    # ---- 1) hoisted input projection: tiled (rows x 4Hp) parallel matmul -----
    M = seq_p * Bp
    tm_cap = min(M, 512)
    tm_cands = [d for d in range(16, tm_cap + 1, 16) if M % d == 0]
    tm = tm_cands[-1] if tm_cands else M               # fall back to full-M block
    tn = 512                                           # 4*Hp is always a multiple of 512
    x2d = x_p.reshape(M, I)

    proj_est = 2 * (tm * I * 2 + I * tn * 2 + tn * 4 + tm * tn * 2) + (2 << 20)
    proj_vmem = int(max(min(2 * proj_est, phys_vmem - (8 << 20)), 32 << 20))

    xw2d = pl.pallas_call(
        _input_proj_kernel,
        out_shape=jax.ShapeDtypeStruct((M, 4 * Hp), bf16),
        grid_spec=pltpu.PrefetchScalarGridSpec(
            num_scalar_prefetch=0,
            grid=(M // tm, (4 * Hp) // tn),
            in_specs=[
                pl.BlockSpec((tm, I), lambda i, j: (i, 0)),
                pl.BlockSpec((I, tn), lambda i, j: (0, j)),
                pl.BlockSpec((1, tn), lambda i, j: (0, j)),
            ],
            out_specs=pl.BlockSpec((tm, tn), lambda i, j: (i, j)),
        ),
        compiler_params=pltpu.CompilerParams(
            dimension_semantics=("parallel", "parallel"),
            vmem_limit_bytes=proj_vmem),
    )(x2d, wih, bias)
    xw = xw2d.reshape(seq_p, Bp, 4 * Hp)

    # ---- 2) sequential recurrence, t_blk timesteps per grid step -------------
    rec_est = fixed + 2 * t_blk * Bb * (4 * Hp) * 2 + 2 * t_blk * Bb * Hp * 4
    rec_vmem = int(max(min(int(rec_est * 1.5) + (8 << 20), phys_vmem - (8 << 20)),
                       32 << 20))

    whh_kwargs = {}
    if whh_buffers == 1 and hasattr(pl, "Buffered"):
        # Constant index_map: a single (non-double-buffered) VMEM copy halves
        # the largest resident tensor (critical on v7x's 64 MiB VMEM).
        whh_kwargs["pipeline_mode"] = pl.Buffered(1)
    whh_spec = pl.BlockSpec((Hp, 4 * Hp), lambda b, t: (0, 0), **whh_kwargs)

    kernel = functools.partial(_lstm_recurrent_kernel, T_blk=t_blk, Hp=Hp, seq=seq)
    outs_p, hN, cN = pl.pallas_call(
        kernel,
        out_shape=(
            jax.ShapeDtypeStruct((seq_p, Bp, Hp), f32),
            jax.ShapeDtypeStruct((Bp, Hp), f32),
            jax.ShapeDtypeStruct((Bp, Hp), f32),
        ),
        grid_spec=pltpu.PrefetchScalarGridSpec(
            num_scalar_prefetch=0,
            grid=(nb, nt),                       # time MUST be the fastest axis
            in_specs=[
                pl.BlockSpec((t_blk, Bb, 4 * Hp), lambda b, t: (t, b, 0)),  # xw (bf16)
                pl.BlockSpec((Bb, Hp), lambda b, t: (b, 0)),                # h0
                pl.BlockSpec((Bb, Hp), lambda b, t: (b, 0)),                # c0
                whh_spec,                                                   # W_hh^T
            ],
            out_specs=[
                pl.BlockSpec((t_blk, Bb, Hp), lambda b, t: (t, b, 0)),      # outputs
                pl.BlockSpec((Bb, Hp), lambda b, t: (b, 0)),                # h_n
                pl.BlockSpec((Bb, Hp), lambda b, t: (b, 0)),                # c_n
            ],
            scratch_shapes=[
                pltpu.VMEM((Bb, Hp), f32),   # h carry
                pltpu.VMEM((Bb, Hp), f32),   # c carry
            ],
        ),
        compiler_params=pltpu.CompilerParams(
            dimension_semantics=("parallel", "arbitrary"),
            vmem_limit_bytes=rec_vmem),
    )(xw, h0, c0, whh)

    outs = outs_p[:seq, :B, :H]
    h_n = hN[:B, :H].reshape(1, B, H)
    c_n = cN[:B, :H].reshape(1, B, H)
    return outs, (h_n, c_n)


# ---------------------------------------------------------------------------
# Pure-JAX reference mirroring the PyTorch module, with the kernel's precision
# choices (bf16 MXU operands, f32 accumulation, xw intermediate rounded to bf16)
# so only accumulation-order differences remain.
# ---------------------------------------------------------------------------
def lstm_layer_ref(x, state, weight_ih, weight_hh, bias_ih, bias_hh):
    bf16, f32 = jnp.bfloat16, jnp.float32
    h = state[0][0].astype(f32)
    c = state[1][0].astype(f32)
    H = weight_hh.shape[1]
    wih_bf = weight_ih.T.astype(bf16)
    whh_bf = weight_hh.T.astype(bf16)
    bias = (bias_ih + bias_hh).astype(f32)
    outs = []
    for t in range(x.shape[0]):
        xw = jnp.dot(x[t].astype(bf16), wih_bf, preferred_element_type=f32) + bias
        xw = xw.astype(bf16).astype(f32)          # matches kernel's bf16 xw storage
        gates = xw + jnp.dot(h.astype(bf16), whh_bf, preferred_element_type=f32)
        i_g = _sigmoid(gates[:, 0 * H:1 * H])
        f_g = _sigmoid(gates[:, 1 * H:2 * H])
        g_g = jnp.tanh(gates[:, 2 * H:3 * H])
        o_g = _sigmoid(gates[:, 3 * H:4 * H])
        c = f_g * c + i_g * g_g
        h = o_g * jnp.tanh(c)
        outs.append(h)
    return jnp.stack(outs), (h[None], c[None])


if __name__ == "__main__":
    # Small shapes consistent with the module's forward contract.
    seq, B, I, H = 8, 8, 16, 32
    key = jax.random.PRNGKey(0)
    k_x, k_h, k_c, k_wih, k_whh, k_bih, k_bhh = jax.random.split(key, 7)

    x = jax.random.normal(k_x, (seq, B, I), dtype=jnp.float32)
    h0 = jax.random.normal(k_h, (1, B, H), dtype=jnp.float32)
    c0 = jax.random.normal(k_c, (1, B, H), dtype=jnp.float32)

    # Parameters as in LSTMCell.__init__ (randn, with bias[H:2H] forced to 0 / 1).
    weight_ih = jax.random.normal(k_wih, (4 * H, I), dtype=jnp.float32)
    weight_hh = jax.random.normal(k_whh, (4 * H, H), dtype=jnp.float32)
    bias_ih = jax.random.normal(k_bih, (4 * H,), dtype=jnp.float32)
    bias_hh = jax.random.normal(k_bhh, (4 * H,), dtype=jnp.float32)
    bias_ih = bias_ih.at[H:2 * H].set(0.0)
    bias_hh = bias_hh.at[H:2 * H].set(1.0)

    # Repack / pad the parameters ONCE, outside the jitted per-call path.
    packed = pack_lstm_params(weight_ih, weight_hh, bias_ih, bias_hh)

    def _run(whh_buffers):
        fwd = jax.jit(functools.partial(
            lstm_layer_pallas, hidden_size=H, whh_buffers=whh_buffers))
        res = fwd(x, (h0, c0), packed)
        jax.block_until_ready(res)
        return res

    try:
        outs, (h_n, c_n) = _run(1)       # single-buffered W_hh (pl.Buffered(1))
    except Exception:
        outs, (h_n, c_n) = _run(2)       # fallback: default double-buffering

    # Correctness check against the pure-JAX reference.
    outs_ref, (h_ref, c_ref) = lstm_layer_ref(
        x, (h0, c0), weight_ih, weight_hh, bias_ih, bias_hh)
    assert outs.shape == (seq, B, H) and h_n.shape == (1, B, H) and c_n.shape == (1, B, H)
    assert jnp.allclose(outs, outs_ref, atol=2e-2, rtol=2e-2)
    assert jnp.allclose(h_n, h_ref, atol=2e-2, rtol=2e-2)
    assert jnp.allclose(c_n, c_ref, atol=2e-2, rtol=2e-2)

    print("KERNEL_OK")
</pallas_src>

<mosaic_0001>
module attributes {stable_mosaic.version = 11 : i64} {
  func.func @_input_proj_kernel(%arg0: i32, %arg1: i32, %arg2: memref<64x16xbf16, #tpu.memory_space<vmem>>, %arg3: memref<16x512xbf16, #tpu.memory_space<vmem>>, %arg4: memref<1x512xf32, #tpu.memory_space<vmem>>, %arg5: memref<64x512xbf16, #tpu.memory_space<vmem>>) attributes {dimension_semantics = [#tpu.dimension_semantics<parallel>, #tpu.dimension_semantics<parallel>], iteration_bounds = array<i64: 1, 1>, scalar_prefetch = 0 : i64, scratch_operands = 0 : i64, tpu.core_type = #tpu.core_type<tc>, window_params = [{transform_indices = @transform_0, window_bounds = array<i64: 64, 16>}, {transform_indices = @transform_1, window_bounds = array<i64: 16, 512>}, {transform_indices = @transform_2, window_bounds = array<i64: 1, 512>}, {transform_indices = @transform_3, window_bounds = array<i64: 64, 512>}]} {
    %c0 = arith.constant 0 : index
    %c0_0 = arith.constant 0 : index
    %0 = vector.load %arg2[%c0, %c0_0] : memref<64x16xbf16, #tpu.memory_space<vmem>>, vector<64x16xbf16>
    %c0_1 = arith.constant 0 : index
    %c0_2 = arith.constant 0 : index
    %1 = vector.load %arg3[%c0_1, %c0_2] : memref<16x512xbf16, #tpu.memory_space<vmem>>, vector<16x512xbf16>
    %cst = arith.constant dense<0.000000e+00> : vector<64x512xf32>
    %2 = tpu.matmul %0, %1, %cst {dimension_numbers = #tpu.dot_dimension_numbers<[1], [0], [0], [1], [0, 0, 1, 1], [], []>} : vector<64x16xbf16>, vector<16x512xbf16>, vector<64x512xf32> -> vector<64x512xf32>
    %c0_3 = arith.constant 0 : index
    %c0_4 = arith.constant 0 : index
    %3 = vector.load %arg4[%c0_3, %c0_4] : memref<1x512xf32, #tpu.memory_space<vmem>>, vector<1x512xf32>
    %4 = vector.broadcast %3 : vector<1x512xf32> to vector<64x512xf32>
    %5 = arith.addf %2, %4 : vector<64x512xf32>
    %6 = arith.truncf %5 : vector<64x512xf32> to vector<64x512xbf16>
    %c0_5 = arith.constant 0 : index
    %c0_6 = arith.constant 0 : index
    %7 = vector.load %arg5[%c0_5, %c0_6] : memref<64x512xbf16, #tpu.memory_space<vmem>>, vector<64x512xbf16>
    tpu.vector_store %arg5[%c0_5, %c0_6], %6 {strides = array<i32>} : memref<64x512xbf16, #tpu.memory_space<vmem>>, vector<64x512xbf16>,
    return
  }
  func.func @transform_0(%arg0: i32, %arg1: i32) -> (i32, i32) {
    %c0_i32 = arith.constant 0 : i32
    %c0_i32_0 = arith.constant 0 : i32
    return %arg0, %c0_i32 : i32, i32
  }
  func.func @transform_1(%arg0: i32, %arg1: i32) -> (i32, i32) {
    %c0_i32 = arith.constant 0 : i32
    %c0_i32_0 = arith.constant 0 : i32
    return %c0_i32, %arg1 : i32, i32
  }
  func.func @transform_2(%arg0: i32, %arg1: i32) -> (i32, i32) {
    %c0_i32 = arith.constant 0 : i32
    %c0_i32_0 = arith.constant 0 : i32
    return %c0_i32, %arg1 : i32, i32
  }
  func.func @transform_3(%arg0: i32, %arg1: i32) -> (i32, i32) {
    %c0_i32 = arith.constant 0 : i32
    return %arg0, %arg1 : i32, i32
  }
}

module attributes {stable_mosaic.version = 11 : i64} {
  func.func @_lstm_recurrent_kernel(%arg0: i32, %arg1: i32, %arg2: memref<8x8x512xbf16, #tpu.memory_space<vmem>>, %arg3: memref<8x128xf32, #tpu.memory_space<vmem>>, %arg4: memref<8x128xf32, #tpu.memory_space<vmem>>, %arg5: memref<128x512xbf16, #tpu.memory_space<vmem>>, %arg6: memref<8x8x128xf32, #tpu.memory_space<vmem>>, %arg7: memref<8x128xf32, #tpu.memory_space<vmem>>, %arg8: memref<8x128xf32, #tpu.memory_space<vmem>>, %arg9: memref<8x128xf32, #tpu.memory_space<vmem>>, %arg10: memref<8x128xf32, #tpu.memory_space<vmem>>) attributes {dimension_semantics = [#tpu.dimension_semantics<parallel>, #tpu.dimension_semantics<arbitrary>], iteration_bounds = array<i64: 1, 1>, scalar_prefetch = 0 : i64, scratch_operands = 2 : i64, tpu.core_type = #tpu.core_type<tc>, window_params = [{transform_indices = @transform_0, window_bounds = array<i64: 8, 8, 512>}, {transform_indices = @transform_1, window_bounds = array<i64: 8, 128>}, {transform_indices = @transform_2, window_bounds = array<i64: 8, 128>}, {pipeline_mode = #tpu.pipeline_mode<synchronous>, transform_indices = @transform_3, window_bounds = array<i64: 128, 512>}, {transform_indices = @transform_4, window_bounds = array<i64: 8, 8, 128>}, {transform_indices = @transform_5, window_bounds = array<i64: 8, 128>}, {transform_indices = @transform_6, window_bounds = array<i64: 8, 128>}]} {
    %c0_i32 = arith.constant 0 : i32
    %0 = arith.cmpi eq, %arg1, %c0_i32 : i32
    %1 = arith.extui %0 : i1 to i32
    %c0_i32_0 = arith.constant 0 : i32
    %2 = arith.cmpi ne, %1, %c0_i32_0 : i32
    scf.if %2 {
      %c0_159 = arith.constant 0 : index
      %c0_160 = arith.constant 0 : index
      %406 = vector.load %arg3[%c0_159, %c0_160] : memref<8x128xf32, #tpu.memory_space<vmem>>, vector<8x128xf32>
      %c0_161 = arith.constant 0 : index
      %c0_162 = arith.constant 0 : index
      %407 = vector.load %arg9[%c0_161, %c0_162] : memref<8x128xf32, #tpu.memory_space<vmem>>, vector<8x128xf32>
      tpu.vector_store %arg9[%c0_161, %c0_162], %406 {strides = array<i32>} : memref<8x128xf32, #tpu.memory_space<vmem>>, vector<8x128xf32>,
      %c0_163 = arith.constant 0 : index
      %c0_164 = arith.constant 0 : index
      %408 = vector.load %arg4[%c0_163, %c0_164] : memref<8x128xf32, #tpu.memory_space<vmem>>, vector<8x128xf32>
      %c0_165 = arith.constant 0 : index
      %c0_166 = arith.constant 0 : index
      %409 = vector.load %arg10[%c0_165, %c0_166] : memref<8x128xf32, #tpu.memory_space<vmem>>, vector<8x128xf32>
      tpu.vector_store %arg10[%c0_165, %c0_166], %408 {strides = array<i32>} : memref<8x128xf32, #tpu.memory_space<vmem>>, vector<8x128xf32>,
    } else {
    }
    %c0 = arith.constant 0 : index
    %c0_1 = arith.constant 0 : index
    %3 = vector.load %arg5[%c0, %c0_1] : memref<128x512xbf16, #tpu.memory_space<vmem>>, vector<128x128xbf16>
    %c0_2 = arith.constant 0 : index
    %c128 = arith.constant 128 : index
    %4 = vector.load %arg5[%c0_2, %c128] : memref<128x512xbf16, #tpu.memory_space<vmem>>, vector<128x128xbf16>
    %c0_3 = arith.constant 0 : index
    %c256 = arith.constant 256 : index
    %5 = vector.load %arg5[%c0_3, %c256] : memref<128x512xbf16, #tpu.memory_space<vmem>>, vector<128x128xbf16>
    %c0_4 = arith.constant 0 : index
    %c384 = arith.constant 384 : index
    %6 = vector.load %arg5[%c0_4, %c384] : memref<128x512xbf16, #tpu.memory_space<vmem>>, vector<128x128xbf16>
    %c0_5 = arith.constant 0 : index
    %c0_6 = arith.constant 0 : index
    %7 = vector.load %arg9[%c0_5, %c0_6] : memref<8x128xf32, #tpu.memory_space<vmem>>, vector<8x128xf32>
    %c0_7 = arith.constant 0 : index
    %c0_8 = arith.constant 0 : index
    %8 = vector.load %arg10[%c0_7, %c0_8] : memref<8x128xf32, #tpu.memory_space<vmem>>, vector<8x128xf32>
    %c0_9 = arith.constant 0 : index
    %c0_10 = arith.constant 0 : index
    %c0_11 = arith.constant 0 : index
    %9 = vector.load %arg2[%c0_9, %c0_10, %c0_11] : memref<8x8x512xbf16, #tpu.memory_space<vmem>>, vector<1x8x512xbf16>
    %10 = vector.shape_cast %9 : vector<1x8x512xbf16> to vector<8x512xbf16>
    %11 = arith.truncf %7 : vector<8x128xf32> to vector<8x128xbf16>
    %12 = vector.extract_strided_slice %10 {offsets = [0, 0], sizes = [8, 128], strides = [1, 1]} : vector<8x512xbf16> to vector<8x128xbf16>
    %13 = arith.extf %12 : vector<8x128xbf16> to vector<8x128xf32>
    %cst = arith.constant dense<0.000000e+00> : vector<8x128xf32>
    %14 = tpu.matmul %11, %3, %cst {dimension_numbers = #tpu.dot_dimension_numbers<[1], [0], [0], [1], [0, 0, 1, 1], [], []>} : vector<8x128xbf16>, vector<128x128xbf16>, vector<8x128xf32> -> vector<8x128xf32>
    %15 = arith.addf %13, %14 : vector<8x128xf32>
    %16 = vector.extract_strided_slice %10 {offsets = [0, 128], sizes = [8, 128], strides = [1, 1]} : vector<8x512xbf16> to vector<8x128xbf16>
    %17 = arith.extf %16 : vector<8x128xbf16> to vector<8x128xf32>
    %cst_12 = arith.constant dense<0.000000e+00> : vector<8x128xf32>
    %18 = tpu.matmul %11, %4, %cst_12 {dimension_numbers = #tpu.dot_dimension_numbers<[1], [0], [0], [1], [0, 0, 1, 1], [], []>} : vector<8x128xbf16>, vector<128x128xbf16>, vector<8x128xf32> -> vector<8x128xf32>
    %19 = arith.addf %17, %18 : vector<8x128xf32>
    %20 = vector.extract_strided_slice %10 {offsets = [0, 256], sizes = [8, 128], strides = [1, 1]} : vector<8x512xbf16> to vector<8x128xbf16>
    %21 = arith.extf %20 : vector<8x128xbf16> to vector<8x128xf32>
    %cst_13 = arith.constant dense<0.000000e+00> : vector<8x128xf32>
    %22 = tpu.matmul %11, %5, %cst_13 {dimension_numbers = #tpu.dot_dimension_numbers<[1], [0], [0], [1], [0, 0, 1, 1], [], []>} : vector<8x128xbf16>, vector<128x128xbf16>, vector<8x128xf32> -> vector<8x128xf32>
    %23 = arith.addf %21, %22 : vector<8x128xf32>
    %24 = vector.extract_strided_slice %10 {offsets = [0, 384], sizes = [8, 128], strides = [1, 1]} : vector<8x512xbf16> to vector<8x128xbf16>
    %25 = arith.extf %24 : vector<8x128xbf16> to vector<8x128xf32>
    %cst_14 = arith.constant dense<0.000000e+00> : vector<8x128xf32>
    %26 = tpu.matmul %11, %6, %cst_14 {dimension_numbers = #tpu.dot_dimension_numbers<[1], [0], [0], [1], [0, 0, 1, 1], [], []>} : vector<8x128xbf16>, vector<128x128xbf16>, vector<8x128xf32> -> vector<8x128xf32>
    %27 = arith.addf %25, %26 : vector<8x128xf32>
    %cst_15 = arith.constant 5.000000e-01 : f32
    %28 = vector.broadcast %cst_15 : f32 to vector<8x128xf32>
    %29 = arith.mulf %28, %15 : vector<8x128xf32>
    %30 = math.tanh %29 : vector<8x128xf32>
    %cst_16 = arith.constant 5.000000e-01 : f32
    %31 = vector.broadcast %cst_16 : f32 to vector<8x128xf32>
    %32 = arith.mulf %31, %30 : vector<8x128xf32>
    %cst_17 = arith.constant 5.000000e-01 : f32
    %33 = vector.broadcast %cst_17 : f32 to vector<8x128xf32>
    %34 = arith.addf %32, %33 : vector<8x128xf32>
    %cst_18 = arith.constant 5.000000e-01 : f32
    %35 = vector.broadcast %cst_18 : f32 to vector<8x128xf32>
    %36 = arith.mulf %35, %19 : vector<8x128xf32>
    %37 = math.tanh %36 : vector<8x128xf32>
    %cst_19 = arith.constant 5.000000e-01 : f32
    %38 = vector.broadcast %cst_19 : f32 to vector<8x128xf32>
    %39 = arith.mulf %38, %37 : vector<8x128xf32>
    %cst_20 = arith.constant 5.000000e-01 : f32
    %40 = vector.broadcast %cst_20 : f32 to vector<8x128xf32>
    %41 = arith.addf %39, %40 : vector<8x128xf32>
    %42 = math.tanh %23 : vector<8x128xf32>
    %cst_21 = arith.constant 5.000000e-01 : f32
    %43 = vector.broadcast %cst_21 : f32 to vector<8x128xf32>
    %44 = arith.mulf %43, %27 : vector<8x128xf32>
    %45 = math.tanh %44 : vector<8x128xf32>
    %cst_22 = arith.constant 5.000000e-01 : f32
    %46 = vector.broadcast %cst_22 : f32 to vector<8x128xf32>
    %47 = arith.mulf %46, %45 : vector<8x128xf32>
    %cst_23 = arith.constant 5.000000e-01 : f32
    %48 = vector.broadcast %cst_23 : f32 to vector<8x128xf32>
    %49 = arith.addf %47, %48 : vector<8x128xf32>
    %50 = arith.mulf %41, %8 : vector<8x128xf32>
    %51 = arith.mulf %34, %42 : vector<8x128xf32>
    %52 = arith.addf %50, %51 : vector<8x128xf32>
    %53 = math.tanh %52 : vector<8x128xf32>
    %54 = arith.mulf %49, %53 : vector<8x128xf32>
    %c0_24 = arith.constant 0 : index
    %c0_25 = arith.constant 0 : index
    %c0_26 = arith.constant 0 : index
    %55 = vector.load %arg6[%c0_24, %c0_25, %c0_26] : memref<8x8x128xf32, #tpu.memory_space<vmem>>, vector<1x8x128xf32>
    %56 = vector.shape_cast %55 : vector<1x8x128xf32> to vector<8x128xf32>
    %57 = vector.shape_cast %54 : vector<8x128xf32> to vector<1x8x128xf32>
    tpu.vector_store %arg6[%c0_24, %c0_25, %c0_26], %57 {strides = array<i32>} : memref<8x8x128xf32, #tpu.memory_space<vmem>>, vector<1x8x128xf32>,
    %c1 = arith.constant 1 : index
    %c0_27 = arith.constant 0 : index
    %c0_28 = arith.constant 0 : index
    %58 = vector.load %arg2[%c1, %c0_27, %c0_28] : memref<8x8x512xbf16, #tpu.memory_space<vmem>>, vector<1x8x512xbf16>
    %59 = vector.shape_cast %58 : vector<1x8x512xbf16> to vector<8x512xbf16>
    %60 = arith.truncf %54 : vector<8x128xf32> to vector<8x128xbf16>
    %61 = vector.extract_strided_slice %59 {offsets = [0, 0], sizes = [8, 128], strides = [1, 1]} : vector<8x512xbf16> to vector<8x128xbf16>
    %62 = arith.extf %61 : vector<8x128xbf16> to vector<8x128xf32>
    %cst_29 = arith.constant dense<0.000000e+00> : vector<8x128xf32>
    %63 = tpu.matmul %60, %3, %cst_29 {dimension_numbers = #tpu.dot_dimension_numbers<[1], [0], [0], [1], [0, 0, 1, 1], [], []>} : vector<8x128xbf16>, vector<128x128xbf16>, vector<8x128xf32> -> vector<8x128xf32>
    %64 = arith.addf %62, %63 : vector<8x128xf32>
    %65 = vector.extract_strided_slice %59 {offsets = [0, 128], sizes = [8, 128], strides = [1, 1]} : vector<8x512xbf16> to vector<8x128xbf16>
    %66 = arith.extf %65 : vector<8x128xbf16> to vector<8x128xf32>
    %cst_30 = arith.constant dense<0.000000e+00> : vector<8x128xf32>
    %67 = tpu.matmul %60, %4, %cst_30 {dimension_numbers = #tpu.dot_dimension_numbers<[1], [0], [0], [1], [0, 0, 1, 1], [], []>} : vector<8x128xbf16>, vector<128x128xbf16>, vector<8x128xf32> -> vector<8x128xf32>
    %68 = arith.addf %66, %67 : vector<8x128xf32>
    %69 = vector.extract_strided_slice %59 {offsets = [0, 256], sizes = [8, 128], strides = [1, 1]} : vector<8x512xbf16> to vector<8x128xbf16>
    %70 = arith.extf %69 : vector<8x128xbf16> to vector<8x128xf32>
    %cst_31 = arith.constant dense<0.000000e+00> : vector<8x128xf32>
    %71 = tpu.matmul %60, %5, %cst_31 {dimension_numbers = #tpu.dot_dimension_numbers<[1], [0], [0], [1], [0, 0, 1, 1], [], []>} : vector<8x128xbf16>, vector<128x128xbf16>, vector<8x128xf32> -> vector<8x128xf32>
    %72 = arith.addf %70, %71 : vector<8x128xf32>
    %73 = vector.extract_strided_slice %59 {offsets = [0, 384], sizes = [8, 128], strides = [1, 1]} : vector<8x512xbf16> to vector<8x128xbf16>
    %74 = arith.extf %73 : vector<8x128xbf16> to vector<8x128xf32>
    %cst_32 = arith.constant dense<0.000000e+00> : vector<8x128xf32>
    %75 = tpu.matmul %60, %6, %cst_32 {dimension_numbers = #tpu.dot_dimension_numbers<[1], [0], [0], [1], [0, 0, 1, 1], [], []>} : vector<8x128xbf16>, vector<128x128xbf16>, vector<8x128xf32> -> vector<8x128xf32>
    %76 = arith.addf %74, %75 : vector<8x128xf32>
    %cst_33 = arith.constant 5.000000e-01 : f32
    %77 = vector.broadcast %cst_33 : f32 to vector<8x128xf32>
    %78 = arith.mulf %77, %64 : vector<8x128xf32>
    %79 = math.tanh %78 : vector<8x128xf32>
    %cst_34 = arith.constant 5.000000e-01 : f32
    %80 = vector.broadcast %cst_34 : f32 to vector<8x128xf32>
    %81 = arith.mulf %80, %79 : vector<8x128xf32>
    %cst_35 = arith.constant 5.000000e-01 : f32
    %82 = vector.broadcast %cst_35 : f32 to vector<8x128xf32>
    %83 = arith.addf %81, %82 : vector<8x128xf32>
    %cst_36 = arith.constant 5.000000e-01 : f32
    %84 = vector.broadcast %cst_36 : f32 to vector<8x128xf32>
    %85 = arith.mulf %84, %68 : vector<8x128xf32>
    %86 = math.tanh %85 : vector<8x128xf32>
    %cst_37 = arith.constant 5.000000e-01 : f32
    %87 = vector.broadcast %cst_37 : f32 to vector<8x128xf32>
    %88 = arith.mulf %87, %86 : vector<8x128xf32>
    %cst_38 = arith.constant 5.000000e-01 : f32
    %89 = vector.broadcast %cst_38 : f32 to vector<8x128xf32>
    %90 = arith.addf %88, %89 : vector<8x128xf32>
    %91 = math.tanh %72 : vector<8x128xf32>
    %cst_39 = arith.constant 5.000000e-01 : f32
    %92 = vector.broadcast %cst_39 : f32 to vector<8x128xf32>
    %93 = arith.mulf %92, %76 : vector<8x128xf32>
    %94 = math.tanh %93 : vector<8x128xf32>
    %cst_40 = arith.constant 5.000000e-01 : f32
    %95 = vector.broadcast %cst_40 : f32 to vector<8x128xf32>
    %96 = arith.mulf %95, %94 : vector<8x128xf32>
    %cst_41 = arith.constant 5.000000e-01 : f32
    %97 = vector.broadcast %cst_41 : f32 to vector<8x128xf32>
    %98 = arith.addf %96, %97 : vector<8x128xf32>
    %99 = arith.mulf %90, %52 : vector<8x128xf32>
    %100 = arith.mulf %83, %91 : vector<8x128xf32>
    %101 = arith.addf %99, %100 : vector<8x128xf32>
    %102 = math.tanh %101 : vector<8x128xf32>
    %103 = arith.mulf %98, %102 : vector<8x128xf32>
    %c1_42 = arith.constant 1 : index
    %c0_43 = arith.constant 0 : index
    %c0_44 = arith.constant 0 : index
    %104 = vector.load %arg6[%c1_42, %c0_43, %c0_44] : memref<8x8x128xf32, #tpu.memory_space<vmem>>, vector<1x8x128xf32>
    %105 = vector.shape_cast %104 : vector<1x8x128xf32> to vector<8x128xf32>
    %106 = vector.shape_cast %103 : vector<8x128xf32> to vector<1x8x128xf32>
    tpu.vector_store %arg6[%c1_42, %c0_43, %c0_44], %106 {strides = array<i32>} : memref<8x8x128xf32, #tpu.memory_space<vmem>>, vector<1x8x128xf32>,
    %c2 = arith.constant 2 : index
    %c0_45 = arith.constant 0 : index
    %c0_46 = arith.constant 0 : index
    %107 = vector.load %arg2[%c2, %c0_45, %c0_46] : memref<8x8x512xbf16, #tpu.memory_space<vmem>>, vector<1x8x512xbf16>
    %108 = vector.shape_cast %107 : vector<1x8x512xbf16> to vector<8x512xbf16>
    %109 = arith.truncf %103 : vector<8x128xf32> to vector<8x128xbf16>
    %110 = vector.extract_strided_slice %108 {offsets = [0, 0], sizes = [8, 128], strides = [1, 1]} : vector<8x512xbf16> to vector<8x128xbf16>
    %111 = arith.extf %110 : vector<8x128xbf16> to vector<8x128xf32>
    %cst_47 = arith.constant dense<0.000000e+00> : vector<8x128xf32>
    %112 = tpu.matmul %109, %3, %cst_47 {dimension_numbers = #tpu.dot_dimension_numbers<[1], [0], [0], [1], [0, 0, 1, 1], [], []>} : vector<8x128xbf16>, vector<128x128xbf16>, vector<8x128xf32> -> vector<8x128xf32>
    %113 = arith.addf %111, %112 : vector<8x128xf32>
    %114 = vector.extract_strided_slice %108 {offsets = [0, 128], sizes = [8, 128], strides = [1, 1]} : vector<8x512xbf16> to vector<8x128xbf16>
    %115 = arith.extf %114 : vector<8x128xbf16> to vector<8x128xf32>
    %cst_48 = arith.constant dense<0.000000e+00> : vector<8x128xf32>
    %116 = tpu.matmul %109, %4, %cst_48 {dimension_numbers = #tpu.dot_dimension_numbers<[1], [0], [0], [1], [0, 0, 1, 1], [], []>} : vector<8x128xbf16>, vector<128x128xbf16>, vector<8x128xf32> -> vector<8x128xf32>
    %117 = arith.addf %115, %116 : vector<8x128xf32>
    %118 = vector.extract_strided_slice %108 {offsets = [0, 256], sizes = [8, 128], strides = [1, 1]} : vector<8x512xbf16> to vector<8x128xbf16>
    %119 = arith.extf %118 : vector<8x128xbf16> to vector<8x128xf32>
    %cst_49 = arith.constant dense<0.000000e+00> : vector<8x128xf32>
    %120 = tpu.matmul %109, %5, %cst_49 {dimension_numbers = #tpu.dot_dimension_numbers<[1], [0], [0], [1], [0, 0, 1, 1], [], []>} : vector<8x128xbf16>, vector<128x128xbf16>, vector<8x128xf32> -> vector<8x128xf32>
    %121 = arith.addf %119, %120 : vector<8x128xf32>
    %122 = vector.extract_strided_slice %108 {offsets = [0, 384], sizes = [8, 128], strides = [1, 1]} : vector<8x512xbf16> to vector<8x128xbf16>
    %123 = arith.extf %122 : vector<8x128xbf16> to vector<8x128xf32>
    %cst_50 = arith.constant dense<0.000000e+00> : vector<8x128xf32>
    %124 = tpu.matmul %109, %6, %cst_50 {dimension_numbers = #tpu.dot_dimension_numbers<[1], [0], [0], [1], [0, 0, 1, 1], [], []>} : vector<8x128xbf16>, vector<128x128xbf16>, vector<8x128xf32> -> vector<8x128xf32>
    %125 = arith.addf %123, %124 : vector<8x128xf32>
    %cst_51 = arith.constant 5.000000e-01 : f32
    %126 = vector.broadcast %cst_51 : f32 to vector<8x128xf32>
    %127 = arith.mulf %126, %113 : vector<8x128xf32>
    %128 = math.tanh %127 : vector<8x128xf32>
    %cst_52 = arith.constant 5.000000e-01 : f32
    %129 = vector.broadcast %cst_52 : f32 to vector<8x128xf32>
    %130 = arith.mulf %129, %128 : vector<8x128xf32>
    %cst_53 = arith.constant 5.000000e-01 : f32
    %131 = vector.broadcast %cst_53 : f32 to vector<8x128xf32>
    %132 = arith.addf %130, %131 : vector<8x128xf32>
    %cst_54 = arith.constant 5.000000e-01 : f32
    %133 = vector.broadcast %cst_54 : f32 to vector<8x128xf32>
    %134 = arith.mulf %133, %117 : vector<8x128xf32>
    %135 = math.tanh %134 : vector<8x128xf32>
    %cst_55 = arith.constant 5.000000e-01 : f32
    %136 = vector.broadcast %cst_55 : f32 to vector<8x128xf32>
    %137 = arith.mulf %136, %135 : vector<8x128xf32>
    %cst_56 = arith.constant 5.000000e-01 : f32
    %138 = vector.broadcast %cst_56 : f32 to vector<8x128xf32>
    %139 = arith.addf %137, %138 : vector<8x128xf32>
    %140 = math.tanh %121 : vector<8x128xf32>
    %cst_57 = arith.constant 5.000000e-01 : f32
    %141 = vector.broadcast %cst_57 : f32 to vector<8x128xf32>
    %142 = arith.mulf %141, %125 : vector<8x128xf32>
    %143 = math.tanh %142 : vector<8x128xf32>
    %cst_58 = arith.constant 5.000000e-01 : f32
    %144 = vector.broadcast %cst_58 : f32 to vector<8x128xf32>
    %145 = arith.mulf %144, %143 : vector<8x128xf32>
    %cst_59 = arith.constant 5.000000e-01 : f32
    %146 = vector.broadcast %cst_59 : f32 to vector<8x128xf32>
    %147 = arith.addf %145, %146 : vector<8x128xf32>
    %148 = arith.mulf %139, %101 : vector<8x128xf32>
    %149 = arith.mulf %132, %140 : vector<8x128xf32>
    %150 = arith.addf %148, %149 : vector<8x128xf32>
    %151 = math.tanh %150 : vector<8x128xf32>
    %152 = arith.mulf %147, %151 : vector<8x128xf32>
    %c2_60 = arith.constant 2 : index
    %c0_61 = arith.constant 0 : index
    %c0_62 = arith.constant 0 : index
    %153 = vector.load %arg6[%c2_60, %c0_61, %c0_62] : memref<8x8x128xf32, #tpu.memory_space<vmem>>, vector<1x8x128xf32>
    %154 = vector.shape_cast %153 : vector<1x8x128xf32> to vector<8x128xf32>
    %155 = vector.shape_cast %152 : vector<8x128xf32> to vector<1x8x128xf32>
    tpu.vector_store %arg6[%c2_60, %c0_61, %c0_62], %155 {strides = array<i32>} : memref<8x8x128xf32, #tpu.memory_space<vmem>>, vector<1x8x128xf32>,
    %c3 = arith.constant 3 : index
    %c0_63 = arith.constant 0 : index
    %c0_64 = arith.constant 0 : index
    %156 = vector.load %arg2[%c3, %c0_63, %c0_64] : memref<8x8x512xbf16, #tpu.memory_space<vmem>>, vector<1x8x512xbf16>
    %157 = vector.shape_cast %156 : vector<1x8x512xbf16> to vector<8x512xbf16>
    %158 = arith.truncf %152 : vector<8x128xf32> to vector<8x128xbf16>
    %159 = vector.extract_strided_slice %157 {offsets = [0, 0], sizes = [8, 128], strides = [1, 1]} : vector<8x512xbf16> to vector<8x128xbf16>
    %160 = arith.extf %159 : vector<8x128xbf16> to vector<8x128xf32>
    %cst_65 = arith.constant dense<0.000000e+00> : vector<8x128xf32>
    %161 = tpu.matmul %158, %3, %cst_65 {dimension_numbers = #tpu.dot_dimension_numbers<[1], [0], [0], [1], [0, 0, 1, 1], [], []>} : vector<8x128xbf16>, vector<128x128xbf16>, vector<8x128xf32> -> vector<8x128xf32>
    %162 = arith.addf %160, %161 : vector<8x128xf32>
    %163 = vector.extract_strided_slice %157 {offsets = [0, 128], sizes = [8, 128], strides = [1, 1]} : vector<8x512xbf16> to vector<8x128xbf16>
    %164 = arith.extf %163 : vector<8x128xbf16> to vector<8x128xf32>
    %cst_66 = arith.constant dense<0.000000e+00> : vector<8x128xf32>
    %165 = tpu.matmul %158, %4, %cst_66 {dimension_numbers = #tpu.dot_dimension_numbers<[1], [0], [0], [1], [0, 0, 1, 1], [], []>} : vector<8x128xbf16>, vector<128x128xbf16>, vector<8x128xf32> -> vector<8x128xf32>
    %166 = arith.addf %164, %165 : vector<8x128xf32>
    %167 = vector.extract_strided_slice %157 {offsets = [0, 256], sizes = [8, 128], strides = [1, 1]} : vector<8x512xbf16> to vector<8x128xbf16>
    %168 = arith.extf %167 : vector<8x128xbf16> to vector<8x128xf32>
    %cst_67 = arith.constant dense<0.000000e+00> : vector<8x128xf32>
    %169 = tpu.matmul %158, %5, %cst_67 {dimension_numbers = #tpu.dot_dimension_numbers<[1], [0], [0], [1], [0, 0, 1, 1], [], []>} : vector<8x128xbf16>, vector<128x128xbf16>, vector<8x128xf32> -> vector<8x128xf32>
    %170 = arith.addf %168, %169 : vector<8x128xf32>
    %171 = vector.extract_strided_slice %157 {offsets = [0, 384], sizes = [8, 128], strides = [1, 1]} : vector<8x512xbf16> to vector<8x128xbf16>
    %172 = arith.extf %171 : vector<8x128xbf16> to vector<8x128xf32>
    %cst_68 = arith.constant dense<0.000000e+00> : vector<8x128xf32>
    %173 = tpu.matmul %158, %6, %cst_68 {dimension_numbers = #tpu.dot_dimension_numbers<[1], [0], [0], [1], [0, 0, 1, 1], [], []>} : vector<8x128xbf16>, vector<128x128xbf16>, vector<8x128xf32> -> vector<8x128xf32>
    %174 = arith.addf %172, %173 : vector<8x128xf32>
    %cst_69 = arith.constant 5.000000e-01 : f32
    %175 = vector.broadcast %cst_69 : f32 to vector<8x128xf32>
    %176 = arith.mulf %175, %162 : vector<8x128xf32>
    %177 = math.tanh %176 : vector<8x128xf32>
    %cst_70 = arith.constant 5.000000e-01 : f32
    %178 = vector.broadcast %cst_70 : f32 to vector<8x128xf32>
    %179 = arith.mulf %178, %177 : vector<8x128xf32>
    %cst_71 = arith.constant 5.000000e-01 : f32
    %180 = vector.broadcast %cst_71 : f32 to vector<8x128xf32>
    %181 = arith.addf %179, %180 : vector<8x128xf32>
    %cst_72 = arith.constant 5.000000e-01 : f32
    %182 = vector.broadcast %cst_72 : f32 to vector<8x128xf32>
    %183 = arith.mulf %182, %166 : vector<8x128xf32>
    %184 = math.tanh %183 : vector<8x128xf32>
    %cst_73 = arith.constant 5.000000e-01 : f32
    %185 = vector.broadcast %cst_73 : f32 to vector<8x128xf32>
    %186 = arith.mulf %185, %184 : vector<8x128xf32>
    %cst_74 = arith.constant 5.000000e-01 : f32
    %187 = vector.broadcast %cst_74 : f32 to vector<8x128xf32>
    %188 = arith.addf %186, %187 : vector<8x128xf32>
    %189 = math.tanh %170 : vector<8x128xf32>
    %cst_75 = arith.constant 5.000000e-01 : f32
    %190 = vector.broadcast %cst_75 : f32 to vector<8x128xf32>
    %191 = arith.mulf %190, %174 : vector<8x128xf32>
    %192 = math.tanh %191 : vector<8x128xf32>
    %cst_76 = arith.constant 5.000000e-01 : f32
    %193 = vector.broadcast %cst_76 : f32 to vector<8x128xf32>
    %194 = arith.mulf %193, %192 : vector<8x128xf32>
    %cst_77 = arith.constant 5.000000e-01 : f32
    %195 = vector.broadcast %cst_77 : f32 to vector<8x128xf32>
    %196 = arith.addf %194, %195 : vector<8x128xf32>
    %197 = arith.mulf %188, %150 : vector<8x128xf32>
    %198 = arith.mulf %181, %189 : vector<8x128xf32>
    %199 = arith.addf %197, %198 : vector<8x128xf32>
    %200 = math.tanh %199 : vector<8x128xf32>
    %201 = arith.mulf %196, %200 : vector<8x128xf32>
    %c3_78 = arith.constant 3 : index
    %c0_79 = arith.constant 0 : index
    %c0_80 = arith.constant 0 : index
    %202 = vector.load %arg6[%c3_78, %c0_79, %c0_80] : memref<8x8x128xf32, #tpu.memory_space<vmem>>, vector<1x8x128xf32>
    %203 = vector.shape_cast %202 : vector<1x8x128xf32> to vector<8x128xf32>
    %204 = vector.shape_cast %201 : vector<8x128xf32> to vector<1x8x128xf32>
    tpu.vector_store %arg6[%c3_78, %c0_79, %c0_80], %204 {strides = array<i32>} : memref<8x8x128xf32, #tpu.memory_space<vmem>>, vector<1x8x128xf32>,
    %c4 = arith.constant 4 : index
    %c0_81 = arith.constant 0 : index
    %c0_82 = arith.constant 0 : index
    %205 = vector.load %arg2[%c4, %c0_81, %c0_82] : memref<8x8x512xbf16, #tpu.memory_space<vmem>>, vector<1x8x512xbf16>
    %206 = vector.shape_cast %205 : vector<1x8x512xbf16> to vector<8x512xbf16>
    %207 = arith.truncf %201 : vector<8x128xf32> to vector<8x128xbf16>
    %208 = vector.extract_strided_slice %206 {offsets = [0, 0], sizes = [8, 128], strides = [1, 1]} : vector<8x512xbf16> to vector<8x128xbf16>
    %209 = arith.extf %208 : vector<8x128xbf16> to vector<8x128xf32>
    %cst_83 = arith.constant dense<0.000000e+00> : vector<8x128xf32>
    %210 = tpu.matmul %207, %3, %cst_83 {dimension_numbers = #tpu.dot_dimension_numbers<[1], [0], [0], [1], [0, 0, 1, 1], [], []>} : vector<8x128xbf16>, vector<128x128xbf16>, vector<8x128xf32> -> vector<8x128xf32>
    %211 = arith.addf %209, %210 : vector<8x128xf32>
    %212 = vector.extract_strided_slice %206 {offsets = [0, 128], sizes = [8, 128], strides = [1, 1]} : vector<8x512xbf16> to vector<8x128xbf16>
    %213 = arith.extf %212 : vector<8x128xbf16> to vector<8x128xf32>
    %cst_84 = arith.constant dense<0.000000e+00> : vector<8x128xf32>
    %214 = tpu.matmul %207, %4, %cst_84 {dimension_numbers = #tpu.dot_dimension_numbers<[1], [0], [0], [1], [0, 0, 1, 1], [], []>} : vector<8x128xbf16>, vector<128x128xbf16>, vector<8x128xf32> -> vector<8x128xf32>
    %215 = arith.addf %213, %214 : vector<8x128xf32>
    %216 = vector.extract_strided_slice %206 {offsets = [0, 256], sizes = [8, 128], strides = [1, 1]} : vector<8x512xbf16> to vector<8x128xbf16>
    %217 = arith.extf %216 : vector<8x128xbf16> to vector<8x128xf32>
    %cst_85 = arith.constant dense<0.000000e+00> : vector<8x128xf32>
    %218 = tpu.matmul %207, %5, %cst_85 {dimension_numbers = #tpu.dot_dimension_numbers<[1], [0], [0], [1], [0, 0, 1, 1], [], []>} : vector<8x128xbf16>, vector<128x128xbf16>, vector<8x128xf32> -> vector<8x128xf32>
    %219 = arith.addf %217, %218 : vector<8x128xf32>
    %220 = vector.extract_strided_slice %206 {offsets = [0, 384], sizes = [8, 128], strides = [1, 1]} : vector<8x512xbf16> to vector<8x128xbf16>
    %221 = arith.extf %220 : vector<8x128xbf16> to vector<8x128xf32>
    %cst_86 = arith.constant dense<0.000000e+00> : vector<8x128xf32>
    %222 = tpu.matmul %207, %6, %cst_86 {dimension_numbers = #tpu.dot_dimension_numbers<[1], [0], [0], [1], [0, 0, 1, 1], [], []>} : vector<8x128xbf16>, vector<128x128xbf16>, vector<8x128xf32> -> vector<8x128xf32>
    %223 = arith.addf %221, %222 : vector<8x128xf32>
    %cst_87 = arith.constant 5.000000e-01 : f32
    %224 = vector.broadcast %cst_87 : f32 to vector<8x128xf32>
    %225 = arith.mulf %224, %211 : vector<8x128xf32>
    %226 = math.tanh %225 : vector<8x128xf32>
    %cst_88 = arith.constant 5.000000e-01 : f32
    %227 = vector.broadcast %cst_88 : f32 to vector<8x128xf32>
    %228 = arith.mulf %227, %226 : vector<8x128xf32>
    %cst_89 = arith.constant 5.000000e-01 : f32
    %229 = vector.broadcast %cst_89 : f32 to vector<8x128xf32>
    %230 = arith.addf %228, %229 : vector<8x128xf32>
    %cst_90 = arith.constant 5.000000e-01 : f32
    %231 = vector.broadcast %cst_90 : f32 to vector<8x128xf32>
    %232 = arith.mulf %231, %215 : vector<8x128xf32>
    %233 = math.tanh %232 : vector<8x128xf32>
    %cst_91 = arith.constant 5.000000e-01 : f32
    %234 = vector.broadcast %cst_91 : f32 to vector<8x128xf32>
    %235 = arith.mulf %234, %233 : vector<8x128xf32>
    %cst_92 = arith.constant 5.000000e-01 : f32
    %236 = vector.broadcast %cst_92 : f32 to vector<8x128xf32>
    %237 = arith.addf %235, %236 : vector<8x128xf32>
    %238 = math.tanh %219 : vector<8x128xf32>
    %cst_93 = arith.constant 5.000000e-01 : f32
    %239 = vector.broadcast %cst_93 : f32 to vector<8x128xf32>
    %240 = arith.mulf %239, %223 : vector<8x128xf32>
    %241 = math.tanh %240 : vector<8x128xf32>
    %cst_94 = arith.constant 5.000000e-01 : f32
    %242 = vector.broadcast %cst_94 : f32 to vector<8x128xf32>
    %243 = arith.mulf %242, %241 : vector<8x128xf32>
    %cst_95 = arith.constant 5.000000e-01 : f32
    %244 = vector.broadcast %cst_95 : f32 to vector<8x128xf32>
    %245 = arith.addf %243, %244 : vector<8x128xf32>
    %246 = arith.mulf %237, %199 : vector<8x128xf32>
    %247 = arith.mulf %230, %238 : vector<8x128xf32>
    %248 = arith.addf %246, %247 : vector<8x128xf32>
    %249 = math.tanh %248 : vector<8x128xf32>
    %250 = arith.mulf %245, %249 : vector<8x128xf32>
    %c4_96 = arith.constant 4 : index
    %c0_97 = arith.constant 0 : index
    %c0_98 = arith.constant 0 : index
    %251 = vector.load %arg6[%c4_96, %c0_97, %c0_98] : memref<8x8x128xf32, #tpu.memory_space<vmem>>, vector<1x8x128xf32>
    %252 = vector.shape_cast %251 : vector<1x8x128xf32> to vector<8x128xf32>
    %253 = vector.shape_cast %250 : vector<8x128xf32> to vector<1x8x128xf32>
    tpu.vector_store %arg6[%c4_96, %c0_97, %c0_98], %253 {strides = array<i32>} : memref<8x8x128xf32, #tpu.memory_space<vmem>>, vector<1x8x128xf32>,
    %c5 = arith.constant 5 : index
    %c0_99 = arith.constant 0 : index
    %c0_100 = arith.constant 0 : index
    %254 = vector.load %arg2[%c5, %c0_99, %c0_100] : memref<8x8x512xbf16, #tpu.memory_space<vmem>>, vector<1x8x512xbf16>
    %255 = vector.shape_cast %254 : vector<1x8x512xbf16> to vector<8x512xbf16>
    %256 = arith.truncf %250 : vector<8x128xf32> to vector<8x128xbf16>
    %257 = vector.extract_strided_slice %255 {offsets = [0, 0], sizes = [8, 128], strides = [1, 1]} : vector<8x512xbf16> to vector<8x128xbf16>
    %258 = arith.extf %257 : vector<8x128xbf16> to vector<8x128xf32>
    %cst_101 = arith.constant dense<0.000000e+00> : vector<8x128xf32>
    %259 = tpu.matmul %256, %3, %cst_101 {dimension_numbers = #tpu.dot_dimension_numbers<[1], [0], [0], [1], [0, 0, 1, 1], [], []>} : vector<8x128xbf16>, vector<128x128xbf16>, vector<8x128xf32> -> vector<8x128xf32>
    %260 = arith.addf %258, %259 : vector<8x128xf32>
    %261 = vector.extract_strided_slice %255 {offsets = [0, 128], sizes = [8, 128], strides = [1, 1]} : vector<8x512xbf16> to vector<8x128xbf16>
    %262 = arith.extf %261 : vector<8x128xbf16> to vector<8x128xf32>
    %cst_102 = arith.constant dense<0.000000e+00> : vector<8x128xf32>
    %263 = tpu.matmul %256, %4, %cst_102 {dimension_numbers = #tpu.dot_dimension_numbers<[1], [0], [0], [1], [0, 0, 1, 1], [], []>} : vector<8x128xbf16>, vector<128x128xbf16>, vector<8x128xf32> -> vector<8x128xf32>
    %264 = arith.addf %262, %263 : vector<8x128xf32>
    %265 = vector.extract_strided_slice %255 {offsets = [0, 256], sizes = [8, 128], strides = [1, 1]} : vector<8x512xbf16> to vector<8x128xbf16>
    %266 = arith.extf %265 : vector<8x128xbf16> to vector<8x128xf32>
    %cst_103 = arith.constant dense<0.000000e+00> : vector<8x128xf32>
    %267 = tpu.matmul %256, %5, %cst_103 {dimension_numbers = #tpu.dot_dimension_numbers<[1], [0], [0], [1], [0, 0, 1, 1], [], []>} : vector<8x128xbf16>, vector<128x128xbf16>, vector<8x128xf32> -> vector<8x128xf32>
    %268 = arith.addf %266, %267 : vector<8x128xf32>
    %269 = vector.extract_strided_slice %255 {offsets = [0, 384], sizes = [8, 128], strides = [1, 1]} : vector<8x512xbf16> to vector<8x128xbf16>
    %270 = arith.extf %269 : vector<8x128xbf16> to vector<8x128xf32>
    %cst_104 = arith.constant dense<0.000000e+00> : vector<8x128xf32>
    %271 = tpu.matmul %256, %6, %cst_104 {dimension_numbers = #tpu.dot_dimension_numbers<[1], [0], [0], [1], [0, 0, 1, 1], [], []>} : vector<8x128xbf16>, vector<128x128xbf16>, vector<8x128xf32> -> vector<8x128xf32>
    %272 = arith.addf %270, %271 : vector<8x128xf32>
    %cst_105 = arith.constant 5.000000e-01 : f32
    %273 = vector.broadcast %cst_105 : f32 to vector<8x128xf32>
    %274 = arith.mulf %273, %260 : vector<8x128xf32>
    %275 = math.tanh %274 : vector<8x128xf32>
    %cst_106 = arith.constant 5.000000e-01 : f32
    %276 = vector.broadcast %cst_106 : f32 to vector<8x128xf32>
    %277 = arith.mulf %276, %275 : vector<8x128xf32>
    %cst_107 = arith.constant 5.000000e-01 : f32
    %278 = vector.broadcast %cst_107 : f32 to vector<8x128xf32>
    %279 = arith.addf %277, %278 : vector<8x128xf32>
    %cst_108 = arith.constant 5.000000e-01 : f32
    %280 = vector.broadcast %cst_108 : f32 to vector<8x128xf32>
    %281 = arith.mulf %280, %264 : vector<8x128xf32>
    %282 = math.tanh %281 : vector<8x128xf32>
    %cst_109 = arith.constant 5.000000e-01 : f32
    %283 = vector.broadcast %cst_109 : f32 to vector<8x128xf32>
    %284 = arith.mulf %283, %282 : vector<8x128xf32>
    %cst_110 = arith.constant 5.000000e-01 : f32
    %285 = vector.broadcast %cst_110 : f32 to vector<8x128xf32>
    %286 = arith.addf %284, %285 : vector<8x128xf32>
    %287 = math.tanh %268 : vector<8x128xf32>
    %cst_111 = arith.constant 5.000000e-01 : f32
    %288 = vector.broadcast %cst_111 : f32 to vector<8x128xf32>
    %289 = arith.mulf %288, %272 : vector<8x128xf32>
    %290 = math.tanh %289 : vector<8x128xf32>
    %cst_112 = arith.constant 5.000000e-01 : f32
    %291 = vector.broadcast %cst_112 : f32 to vector<8x128xf32>
    %292 = arith.mulf %291, %290 : vector<8x128xf32>
    %cst_113 = arith.constant 5.000000e-01 : f32
    %293 = vector.broadcast %cst_113 : f32 to vector<8x128xf32>
    %294 = arith.addf %292, %293 : vector<8x128xf32>
    %295 = arith.mulf %286, %248 : vector<8x128xf32>
    %296 = arith.mulf %279, %287 : vector<8x128xf32>
    %297 = arith.addf %295, %296 : vector<8x128xf32>
    %298 = math.tanh %297 : vector<8x128xf32>
    %299 = arith.mulf %294, %298 : vector<8x128xf32>
    %c5_114 = arith.constant 5 : index
    %c0_115 = arith.constant 0 : index
    %c0_116 = arith.constant 0 : index
    %300 = vector.load %arg6[%c5_114, %c0_115, %c0_116] : memref<8x8x128xf32, #tpu.memory_space<vmem>>, vector<1x8x128xf32>
    %301 = vector.shape_cast %300 : vector<1x8x128xf32> to vector<8x128xf32>
    %302 = vector.shape_cast %299 : vector<8x128xf32> to vector<1x8x128xf32>
    tpu.vector_store %arg6[%c5_114, %c0_115, %c0_116], %302 {strides = array<i32>} : memref<8x8x128xf32, #tpu.memory_space<vmem>>, vector<1x8x128xf32>,
    %c6 = arith.constant 6 : index
    %c0_117 = arith.constant 0 : index
    %c0_118 = arith.constant 0 : index
    %303 = vector.load %arg2[%c6, %c0_117, %c0_118] : memref<8x8x512xbf16, #tpu.memory_space<vmem>>, vector<1x8x512xbf16>
    %304 = vector.shape_cast %303 : vector<1x8x512xbf16> to vector<8x512xbf16>
    %305 = arith.truncf %299 : vector<8x128xf32> to vector<8x128xbf16>
    %306 = vector.extract_strided_slice %304 {offsets = [0, 0], sizes = [8, 128], strides = [1, 1]} : vector<8x512xbf16> to vector<8x128xbf16>
    %307 = arith.extf %306 : vector<8x128xbf16> to vector<8x128xf32>
    %cst_119 = arith.constant dense<0.000000e+00> : vector<8x128xf32>
    %308 = tpu.matmul %305, %3, %cst_119 {dimension_numbers = #tpu.dot_dimension_numbers<[1], [0], [0], [1], [0, 0, 1, 1], [], []>} : vector<8x128xbf16>, vector<128x128xbf16>, vector<8x128xf32> -> vector<8x128xf32>
    %309 = arith.addf %307, %308 : vector<8x128xf32>
    %310 = vector.extract_strided_slice %304 {offsets = [0, 128], sizes = [8, 128], strides = [1, 1]} : vector<8x512xbf16> to vector<8x128xbf16>
    %311 = arith.extf %310 : vector<8x128xbf16> to vector<8x128xf32>
    %cst_120 = arith.constant dense<0.000000e+00> : vector<8x128xf32>
    %312 = tpu.matmul %305, %4, %cst_120 {dimension_numbers = #tpu.dot_dimension_numbers<[1], [0], [0], [1], [0, 0, 1, 1], [], []>} : vector<8x128xbf16>, vector<128x128xbf16>, vector<8x128xf32> -> vector<8x128xf32>
    %313 = arith.addf %311, %312 : vector<8x128xf32>
    %314 = vector.extract_strided_slice %304 {offsets = [0, 256], sizes = [8, 128], strides = [1, 1]} : vector<8x512xbf16> to vector<8x128xbf16>
    %315 = arith.extf %314 : vector<8x128xbf16> to vector<8x128xf32>
    %cst_121 = arith.constant dense<0.000000e+00> : vector<8x128xf32>
    %316 = tpu.matmul %305, %5, %cst_121 {dimension_numbers = #tpu.dot_dimension_numbers<[1], [0], [0], [1], [0, 0, 1, 1], [], []>} : vector<8x128xbf16>, vector<128x128xbf16>, vector<8x128xf32> -> vector<8x128xf32>
    %317 = arith.addf %315, %316 : vector<8x128xf32>
    %318 = vector.extract_strided_slice %304 {offsets = [0, 384], sizes = [8, 128], strides = [1, 1]} : vector<8x512xbf16> to vector<8x128xbf16>
    %319 = arith.extf %318 : vector<8x128xbf16> to vector<8x128xf32>
    %cst_122 = arith.constant dense<0.000000e+00> : vector<8x128xf32>
    %320 = tpu.matmul %305, %6, %cst_122 {dimension_numbers = #tpu.dot_dimension_numbers<[1], [0], [0], [1], [0, 0, 1, 1], [], []>} : vector<8x128xbf16>, vector<128x128xbf16>, vector<8x128xf32> -> vector<8x128xf32>
    %321 = arith.addf %319, %320 : vector<8x128xf32>
    %cst_123 = arith.constant 5.000000e-01 : f32
    %322 = vector.broadcast %cst_123 : f32 to vector<8x128xf32>
    %323 = arith.mulf %322, %309 : vector<8x128xf32>
    %324 = math.tanh %323 : vector<8x128xf32>
    %cst_124 = arith.constant 5.000000e-01 : f32
    %325 = vector.broadcast %cst_124 : f32 to vector<8x128xf32>
    %326 = arith.mulf %325, %324 : vector<8x128xf32>
    %cst_125 = arith.constant 5.000000e-01 : f32
    %327 = vector.broadcast %cst_125 : f32 to vector<8x128xf32>
    %328 = arith.addf %326, %327 : vector<8x128xf32>
    %cst_126 = arith.constant 5.000000e-01 : f32
    %329 = vector.broadcast %cst_126 : f32 to vector<8x128xf32>
    %330 = arith.mulf %329, %313 : vector<8x128xf32>
    %331 = math.tanh %330 : vector<8x128xf32>
    %cst_127 = arith.constant 5.000000e-01 : f32
    %332 = vector.broadcast %cst_127 : f32 to vector<8x128xf32>
    %333 = arith.mulf %332, %331 : vector<8x128xf32>
    %cst_128 = arith.constant 5.000000e-01 : f32
    %334 = vector.broadcast %cst_128 : f32 to vector<8x128xf32>
    %335 = arith.addf %333, %334 : vector<8x128xf32>
    %336 = math.tanh %317 : vector<8x128xf32>
    %cst_129 = arith.constant 5.000000e-01 : f32
    %337 = vector.broadcast %cst_129 : f32 to vector<8x128xf32>
    %338 = arith.mulf %337, %321 : vector<8x128xf32>
    %339 = math.tanh %338 : vector<8x128xf32>
    %cst_130 = arith.constant 5.000000e-01 : f32
    %340 = vector.broadcast %cst_130 : f32 to vector<8x128xf32>
    %341 = arith.mulf %340, %339 : vector<8x128xf32>
    %cst_131 = arith.constant 5.000000e-01 : f32
    %342 = vector.broadcast %cst_131 : f32 to vector<8x128xf32>
    %343 = arith.addf %341, %342 : vector<8x128xf32>
    %344 = arith.mulf %335, %297 : vector<8x128xf32>
    %345 = arith.mulf %328, %336 : vector<8x128xf32>
    %346 = arith.addf %344, %345 : vector<8x128xf32>
    %347 = math.tanh %346 : vector<8x128xf32>
    %348 = arith.mulf %343, %347 : vector<8x128xf32>
    %c6_132 = arith.constant 6 : index
    %c0_133 = arith.constant 0 : index
    %c0_134 = arith.constant 0 : index
    %349 = vector.load %arg6[%c6_132, %c0_133, %c0_134] : memref<8x8x128xf32, #tpu.memory_space<vmem>>, vector<1x8x128xf32>
    %350 = vector.shape_cast %349 : vector<1x8x128xf32> to vector<8x128xf32>
    %351 = vector.shape_cast %348 : vector<8x128xf32> to vector<1x8x128xf32>
    tpu.vector_store %arg6[%c6_132, %c0_133, %c0_134], %351 {strides = array<i32>} : memref<8x8x128xf32, #tpu.memory_space<vmem>>, vector<1x8x128xf32>,
    %c7 = arith.constant 7 : index
    %c0_135 = arith.constant 0 : index
    %c0_136 = arith.constant 0 : index
    %352 = vector.load %arg2[%c7, %c0_135, %c0_136] : memref<8x8x512xbf16, #tpu.memory_space<vmem>>, vector<1x8x512xbf16>
    %353 = vector.shape_cast %352 : vector<1x8x512xbf16> to vector<8x512xbf16>
    %354 = arith.truncf %348 : vector<8x128xf32> to vector<8x128xbf16>
    %355 = vector.extract_strided_slice %353 {offsets = [0, 0], sizes = [8, 128], strides = [1, 1]} : vector<8x512xbf16> to vector<8x128xbf16>
    %356 = arith.extf %355 : vector<8x128xbf16> to vector<8x128xf32>
    %cst_137 = arith.constant dense<0.000000e+00> : vector<8x128xf32>
    %357 = tpu.matmul %354, %3, %cst_137 {dimension_numbers = #tpu.dot_dimension_numbers<[1], [0], [0], [1], [0, 0, 1, 1], [], []>} : vector<8x128xbf16>, vector<128x128xbf16>, vector<8x128xf32> -> vector<8x128xf32>
    %358 = arith.addf %356, %357 : vector<8x128xf32>
    %359 = vector.extract_strided_slice %353 {offsets = [0, 128], sizes = [8, 128], strides = [1, 1]} : vector<8x512xbf16> to vector<8x128xbf16>
    %360 = arith.extf %359 : vector<8x128xbf16> to vector<8x128xf32>
    %cst_138 = arith.constant dense<0.000000e+00> : vector<8x128xf32>
    %361 = tpu.matmul %354, %4, %cst_138 {dimension_numbers = #tpu.dot_dimension_numbers<[1], [0], [0], [1], [0, 0, 1, 1], [], []>} : vector<8x128xbf16>, vector<128x128xbf16>, vector<8x128xf32> -> vector<8x128xf32>
    %362 = arith.addf %360, %361 : vector<8x128xf32>
    %363 = vector.extract_strided_slice %353 {offsets = [0, 256], sizes = [8, 128], strides = [1, 1]} : vector<8x512xbf16> to vector<8x128xbf16>
    %364 = arith.extf %363 : vector<8x128xbf16> to vector<8x128xf32>
    %cst_139 = arith.constant dense<0.000000e+00> : vector<8x128xf32>
    %365 = tpu.matmul %354, %5, %cst_139 {dimension_numbers = #tpu.dot_dimension_numbers<[1], [0], [0], [1], [0, 0, 1, 1], [], []>} : vector<8x128xbf16>, vector<128x128xbf16>, vector<8x128xf32> -> vector<8x128xf32>
    %366 = arith.addf %364, %365 : vector<8x128xf32>
    %367 = vector.extract_strided_slice %353 {offsets = [0, 384], sizes = [8, 128], strides = [1, 1]} : vector<8x512xbf16> to vector<8x128xbf16>
    %368 = arith.extf %367 : vector<8x128xbf16> to vector<8x128xf32>
    %cst_140 = arith.constant dense<0.000000e+00> : vector<8x128xf32>
    %369 = tpu.matmul %354, %6, %cst_140 {dimension_numbers = #tpu.dot_dimension_numbers<[1], [0], [0], [1], [0, 0, 1, 1], [], []>} : vector<8x128xbf16>, vector<128x128xbf16>, vector<8x128xf32> -> vector<8x128xf32>
    %370 = arith.addf %368, %369 : vector<8x128xf32>
    %cst_141 = arith.constant 5.000000e-01 : f32
    %371 = vector.broadcast %cst_141 : f32 to vector<8x128xf32>
    %372 = arith.mulf %371, %358 : vector<8x128xf32>
    %373 = math.tanh %372 : vector<8x128xf32>
    %cst_142 = arith.constant 5.000000e-01 : f32
    %374 = vector.broadcast %cst_142 : f32 to vector<8x128xf32>
    %375 = arith.mulf %374, %373 : vector<8x128xf32>
    %cst_143 = arith.constant 5.000000e-01 : f32
    %376 = vector.broadcast %cst_143 : f32 to vector<8x128xf32>
    %377 = arith.addf %375, %376 : vector<8x128xf32>
    %cst_144 = arith.constant 5.000000e-01 : f32
    %378 = vector.broadcast %cst_144 : f32 to vector<8x128xf32>
    %379 = arith.mulf %378, %362 : vector<8x128xf32>
    %380 = math.tanh %379 : vector<8x128xf32>
    %cst_145 = arith.constant 5.000000e-01 : f32
    %381 = vector.broadcast %cst_145 : f32 to vector<8x128xf32>
    %382 = arith.mulf %381, %380 : vector<8x128xf32>
    %cst_146 = arith.constant 5.000000e-01 : f32
    %383 = vector.broadcast %cst_146 : f32 to vector<8x128xf32>
    %384 = arith.addf %382, %383 : vector<8x128xf32>
    %385 = math.tanh %366 : vector<8x128xf32>
    %cst_147 = arith.constant 5.000000e-01 : f32
    %386 = vector.broadcast %cst_147 : f32 to vector<8x128xf32>
    %387 = arith.mulf %386, %370 : vector<8x128xf32>
    %388 = math.tanh %387 : vector<8x128xf32>
    %cst_148 = arith.constant 5.000000e-01 : f32
    %389 = vector.broadcast %cst_148 : f32 to vector<8x128xf32>
    %390 = arith.mulf %389, %388 : vector<8x128xf32>
    %cst_149 = arith.constant 5.000000e-01 : f32
    %391 = vector.broadcast %cst_149 : f32 to vector<8x128xf32>
    %392 = arith.addf %390, %391 : vector<8x128xf32>
    %393 = arith.mulf %384, %346 : vector<8x128xf32>
    %394 = arith.mulf %377, %385 : vector<8x128xf32>
    %395 = arith.addf %393, %394 : vector<8x128xf32>
    %396 = math.tanh %395 : vector<8x128xf32>
    %397 = arith.mulf %392, %396 : vector<8x128xf32>
    %c7_150 = arith.constant 7 : index
    %c0_151 = arith.constant 0 : index
    %c0_152 = arith.constant 0 : index
    %398 = vector.load %arg6[%c7_150, %c0_151, %c0_152] : memref<8x8x128xf32, #tpu.memory_space<vmem>>, vector<1x8x128xf32>
    %399 = vector.shape_cast %398 : vector<1x8x128xf32> to vector<8x128xf32>
    %400 = vector.shape_cast %397 : vector<8x128xf32> to vector<1x8x128xf32>
    tpu.vector_store %arg6[%c7_150, %c0_151, %c0_152], %400 {strides = array<i32>} : memref<8x8x128xf32, #tpu.memory_space<vmem>>, vector<1x8x128xf32>,
    %c0_153 = arith.constant 0 : index
    %c0_154 = arith.constant 0 : index
    %401 = vector.load %arg9[%c0_153, %c0_154] : memref<8x128xf32, #tpu.memory_space<vmem>>, vector<8x128xf32>
    tpu.vector_store %arg9[%c0_153, %c0_154], %397 {strides = array<i32>} : memref<8x128xf32, #tpu.memory_space<vmem>>, vector<8x128xf32>,
    %c0_155 = arith.constant 0 : index
    %c0_156 = arith.constant 0 : index
    %402 = vector.load %arg10[%c0_155, %c0_156] : memref<8x128xf32, #tpu.memory_space<vmem>>, vector<8x128xf32>
    tpu.vector_store %arg10[%c0_155, %c0_156], %395 {strides = array<i32>} : memref<8x128xf32, #tpu.memory_space<vmem>>, vector<8x128xf32>,
    %c0_i32_157 = arith.constant 0 : i32
    %403 = arith.cmpi eq, %arg1, %c0_i32_157 : i32
    %404 = arith.extui %403 : i1 to i32
    %c0_i32_158 = arith.constant 0 : i32
    %405 = arith.cmpi ne, %404, %c0_i32_158 : i32
    scf.if %405 {
      %c0_159 = arith.constant 0 : index
      %c0_160 = arith.constant 0 : index
      %406 = vector.load %arg7[%c0_159, %c0_160] : memref<8x128xf32, #tpu.memory_space<vmem>>, vector<8x128xf32>
      tpu.vector_store %arg7[%c0_159, %c0_160], %397 {strides = array<i32>} : memref<8x128xf32, #tpu.memory_space<vmem>>, vector<8x128xf32>,
      %c0_161 = arith.constant 0 : index
      %c0_162 = arith.constant 0 : index
      %407 = vector.load %arg8[%c0_161, %c0_162] : memref<8x128xf32, #tpu.memory_space<vmem>>, vector<8x128xf32>
      tpu.vector_store %arg8[%c0_161, %c0_162], %395 {strides = array<i32>} : memref<8x128xf32, #tpu.memory_space<vmem>>, vector<8x128xf32>,
    } else {
    }
    return
  }
  func.func @transform_0(%arg0: i32, %arg1: i32) -> (i32, i32, i32) {
    %c0_i32 = arith.constant 0 : i32
    %c0_i32_0 = arith.constant 0 : i32
    return %arg1, %arg0, %c0_i32 : i32, i32, i32
  }
  func.func @transform_1(%arg0: i32, %arg1: i32) -> (i32, i32) {
    %c0_i32 = arith.constant 0 : i32
    %c0_i32_0 = arith.constant 0 : i32
    return %arg0, %c0_i32 : i32, i32
  }
  func.func @transform_2(%arg0: i32, %arg1: i32) -> (i32, i32) {
    %c0_i32 = arith.constant 0 : i32
    %c0_i32_0 = arith.constant 0 : i32
    return %arg0, %c0_i32 : i32, i32
  }
  func.func @transform_3(%arg0: i32, %arg1: i32) -> (i32, i32) {
    %c0_i32 = arith.constant 0 : i32
    %c0_i32_0 = arith.constant 0 : i32
    %c0_i32_1 = arith.constant 0 : i32
    return %c0_i32, %c0_i32_0 : i32, i32
  }
  func.func @transform_4(%arg0: i32, %arg1: i32) -> (i32, i32, i32) {
    %c0_i32 = arith.constant 0 : i32
    %c0_i32_0 = arith.constant 0 : i32
    return %arg1, %arg0, %c0_i32 : i32, i32, i32
  }
  func.func @transform_5(%arg0: i32, %arg1: i32) -> (i32, i32) {
    %c0_i32 = arith.constant 0 : i32
    %c0_i32_0 = arith.constant 0 : i32
    return %arg0, %c0_i32 : i32, i32
  }
  func.func @transform_6(%arg0: i32, %arg1: i32) -> (i32, i32) {
    %c0_i32 = arith.constant 0 : i32
    %c0_i32_0 = arith.constant 0 : i32
    return %arg0, %c0_i32 : i32, i32
  }
}

module attributes {stable_mosaic.version = 11 : i64} {
  func.func @_lstm_recurrent_kernel(%arg0: i32, %arg1: i32, %arg2: memref<8x8x512xbf16, #tpu.memory_space<vmem>>, %arg3: memref<8x128xf32, #tpu.memory_space<vmem>>, %arg4: memref<8x128xf32, #tpu.memory_space<vmem>>, %arg5: memref<128x512xbf16, #tpu.memory_space<vmem>>, %arg6: memref<8x8x128xf32, #tpu.memory_space<vmem>>, %arg7: memref<8x128xf32, #tpu.memory_space<vmem>>, %arg8: memref<8x128xf32, #tpu.memory_space<vmem>>, %arg9: memref<8x128xf32, #tpu.memory_space<vmem>>, %arg10: memref<8x128xf32, #tpu.memory_space<vmem>>) attributes {dimension_semantics = [#tpu.dimension_semantics<parallel>, #tpu.dimension_semantics<arbitrary>], iteration_bounds = array<i64: 1, 1>, scalar_prefetch = 0 : i64, scratch_operands = 2 : i64, tpu.core_type = #tpu.core_type<tc>, window_params = [{transform_indices = @transform_0, window_bounds = array<i64: 8, 8, 512>}, {transform_indices = @transform_1, window_bounds = array<i64: 8, 128>}, {transform_indices = @transform_2, window_bounds = array<i64: 8, 128>}, {pipeline_mode = #tpu.pipeline_mode<synchronous>, transform_indices = @transform_3, window_bounds = array<i64: 128, 512>}, {transform_indices = @transform_4, window_bounds = array<i64: 8, 8, 128>}, {transform_indices = @transform_5, window_bounds = array<i64: 8, 128>}, {transform_indices = @transform_6, window_bounds = array<i64: 8, 128>}]} {
    %c0_i32 = arith.constant 0 : i32
    %0 = arith.cmpi eq, %arg1, %c0_i32 : i32
    %1 = arith.extui %0 : i1 to i32
    %c0_i32_0 = arith.constant 0 : i32
    %2 = arith.cmpi ne, %1, %c0_i32_0 : i32
    scf.if %2 {
      %c0_159 = arith.constant 0 : index
      %c0_160 = arith.constant 0 : index
      %406 = vector.load %arg3[%c0_159, %c0_160] : memref<8x128xf32, #tpu.memory_space<vmem>>, vector<8x128xf32>
      %c0_161 = arith.constant 0 : index
      %c0_162 = arith.constant 0 : index
      %407 = vector.load %arg9[%c0_161, %c0_162] : memref<8x128xf32, #tpu.memory_space<vmem>>, vector<8x128xf32>
      tpu.vector_store %arg9[%c0_161, %c0_162], %406 {strides = array<i32>} : memref<8x128xf32, #tpu.memory_space<vmem>>, vector<8x128xf32>,
      %c0_163 = arith.constant 0 : index
      %c0_164 = arith.constant 0 : index
      %408 = vector.load %arg4[%c0_163, %c0_164] : memref<8x128xf32, #tpu.memory_space<vmem>>, vector<8x128xf32>
      %c0_165 = arith.constant 0 : index
      %c0_166 = arith.constant 0 : index
      %409 = vector.load %arg10[%c0_165, %c0_166] : memref<8x128xf32, #tpu.memory_space<vmem>>, vector<8x128xf32>
      tpu.vector_store %arg10[%c0_165, %c0_166], %408 {strides = array<i32>} : memref<8x128xf32, #tpu.memory_space<vmem>>, vector<8x128xf32>,
    } else {
    }
    %c0 = arith.constant 0 : index
    %c0_1 = arith.constant 0 : index
    %3 = vector.load %arg5[%c0, %c0_1] : memref<128x512xbf16, #tpu.memory_space<vmem>>, vector<128x128xbf16>
    %c0_2 = arith.constant 0 : index
    %c128 = arith.constant 128 : index
    %4 = vector.load %arg5[%c0_2, %c128] : memref<128x512xbf16, #tpu.memory_space<vmem>>, vector<128x128xbf16>
    %c0_3 = arith.constant 0 : index
    %c256 = arith.constant 256 : index
    %5 = vector.load %arg5[%c0_3, %c256] : memref<128x512xbf16, #tpu.memory_space<vmem>>, vector<128x128xbf16>
    %c0_4 = arith.constant 0 : index
    %c384 = arith.constant 384 : index
    %6 = vector.load %arg5[%c0_4, %c384] : memref<128x512xbf16, #tpu.memory_space<vmem>>, vector<128x128xbf16>
    %c0_5 = arith.constant 0 : index
    %c0_6 = arith.constant 0 : index
    %7 = vector.load %arg9[%c0_5, %c0_6] : memref<8x128xf32, #tpu.memory_space<vmem>>, vector<8x128xf32>
    %c0_7 = arith.constant 0 : index
    %c0_8 = arith.constant 0 : index
    %8 = vector.load %arg10[%c0_7, %c0_8] : memref<8x128xf32, #tpu.memory_space<vmem>>, vector<8x128xf32>
    %c0_9 = arith.constant 0 : index
    %c0_10 = arith.constant 0 : index
    %c0_11 = arith.constant 0 : index
    %9 = vector.load %arg2[%c0_9, %c0_10, %c0_11] : memref<8x8x512xbf16, #tpu.memory_space<vmem>>, vector<1x8x512xbf16>
    %10 = vector.shape_cast %9 : vector<1x8x512xbf16> to vector<8x512xbf16>
    %11 = arith.truncf %7 : vector<8x128xf32> to vector<8x128xbf16>
    %12 = vector.extract_strided_slice %10 {offsets = [0, 0], sizes = [8, 128], strides = [1, 1]} : vector<8x512xbf16> to vector<8x128xbf16>
    %13 = arith.extf %12 : vector<8x128xbf16> to vector<8x128xf32>
    %cst = arith.constant dense<0.000000e+00> : vector<8x128xf32>
    %14 = tpu.matmul %11, %3, %cst {dimension_numbers = #tpu.dot_dimension_numbers<[1], [0], [0], [1], [0, 0, 1, 1], [], []>} : vector<8x128xbf16>, vector<128x128xbf16>, vector<8x128xf32> -> vector<8x128xf32>
    %15 = arith.addf %13, %14 : vector<8x128xf32>
    %16 = vector.extract_strided_slice %10 {offsets = [0, 128], sizes = [8, 128], strides = [1, 1]} : vector<8x512xbf16> to vector<8x128xbf16>
    %17 = arith.extf %16 : vector<8x128xbf16> to vector<8x128xf32>
    %cst_12 = arith.constant dense<0.000000e+00> : vector<8x128xf32>
    %18 = tpu.matmul %11, %4, %cst_12 {dimension_numbers = #tpu.dot_dimension_numbers<[1], [0], [0], [1], [0, 0, 1, 1], [], []>} : vector<8x128xbf16>, vector<128x128xbf16>, vector<8x128xf32> -> vector<8x128xf32>
    %19 = arith.addf %17, %18 : vector<8x128xf32>
    %20 = vector.extract_strided_slice %10 {offsets = [0, 256], sizes = [8, 128], strides = [1, 1]} : vector<8x512xbf16> to vector<8x128xbf16>
    %21 = arith.extf %20 : vector<8x128xbf16> to vector<8x128xf32>
    %cst_13 = arith.constant dense<0.000000e+00> : vector<8x128xf32>
    %22 = tpu.matmul %11, %5, %cst_13 {dimension_numbers = #tpu.dot_dimension_numbers<[1], [0], [0], [1], [0, 0, 1, 1], [], []>} : vector<8x128xbf16>, vector<128x128xbf16>, vector<8x128xf32> -> vector<8x128xf32>
    %23 = arith.addf %21, %22 : vector<8x128xf32>
    %24 = vector.extract_strided_slice %10 {offsets = [0, 384], sizes = [8, 128], strides = [1, 1]} : vector<8x512xbf16> to vector<8x128xbf16>
    %25 = arith.extf %24 : vector<8x128xbf16> to vector<8x128xf32>
    %cst_14 = arith.constant dense<0.000000e+00> : vector<8x128xf32>
    %26 = tpu.matmul %11, %6, %cst_14 {dimension_numbers = #tpu.dot_dimension_numbers<[1], [0], [0], [1], [0, 0, 1, 1], [], []>} : vector<8x128xbf16>, vector<128x128xbf16>, vector<8x128xf32> -> vector<8x128xf32>
    %27 = arith.addf %25, %26 : vector<8x128xf32>
    %cst_15 = arith.constant 5.000000e-01 : f32
    %28 = vector.broadcast %cst_15 : f32 to vector<8x128xf32>
    %29 = arith.mulf %28, %15 : vector<8x128xf32>
    %30 = math.tanh %29 : vector<8x128xf32>
    %cst_16 = arith.constant 5.000000e-01 : f32
    %31 = vector.broadcast %cst_16 : f32 to vector<8x128xf32>
    %32 = arith.mulf %31, %30 : vector<8x128xf32>
    %cst_17 = arith.constant 5.000000e-01 : f32
    %33 = vector.broadcast %cst_17 : f32 to vector<8x128xf32>
    %34 = arith.addf %32, %33 : vector<8x128xf32>
    %cst_18 = arith.constant 5.000000e-01 : f32
    %35 = vector.broadcast %cst_18 : f32 to vector<8x128xf32>
    %36 = arith.mulf %35, %19 : vector<8x128xf32>
    %37 = math.tanh %36 : vector<8x128xf32>
    %cst_19 = arith.constant 5.000000e-01 : f32
    %38 = vector.broadcast %cst_19 : f32 to vector<8x128xf32>
    %39 = arith.mulf %38, %37 : vector<8x128xf32>
    %cst_20 = arith.constant 5.000000e-01 : f32
    %40 = vector.broadcast %cst_20 : f32 to vector<8x128xf32>
    %41 = arith.addf %39, %40 : vector<8x128xf32>
    %42 = math.tanh %23 : vector<8x128xf32>
    %cst_21 = arith.constant 5.000000e-01 : f32
    %43 = vector.broadcast %cst_21 : f32 to vector<8x128xf32>
    %44 = arith.mulf %43, %27 : vector<8x128xf32>
    %45 = math.tanh %44 : vector<8x128xf32>
    %cst_22 = arith.constant 5.000000e-01 : f32
    %46 = vector.broadcast %cst_22 : f32 to vector<8x128xf32>
    %47 = arith.mulf %46, %45 : vector<8x128xf32>
    %cst_23 = arith.constant 5.000000e-01 : f32
    %48 = vector.broadcast %cst_23 : f32 to vector<8x128xf32>
    %49 = arith.addf %47, %48 : vector<8x128xf32>
    %50 = arith.mulf %41, %8 : vector<8x128xf32>
    %51 = arith.mulf %34, %42 : vector<8x128xf32>
    %52 = arith.addf %50, %51 : vector<8x128xf32>
    %53 = math.tanh %52 : vector<8x128xf32>
    %54 = arith.mulf %49, %53 : vector<8x128xf32>
    %c0_24 = arith.constant 0 : index
    %c0_25 = arith.constant 0 : index
    %c0_26 = arith.constant 0 : index
    %55 = vector.load %arg6[%c0_24, %c0_25, %c0_26] : memref<8x8x128xf32, #tpu.memory_space<vmem>>, vector<1x8x128xf32>
    %56 = vector.shape_cast %55 : vector<1x8x128xf32> to vector<8x128xf32>
    %57 = vector.shape_cast %54 : vector<8x128xf32> to vector<1x8x128xf32>
    tpu.vector_store %arg6[%c0_24, %c0_25, %c0_26], %57 {strides = array<i32>} : memref<8x8x128xf32, #tpu.memory_space<vmem>>, vector<1x8x128xf32>,
    %c1 = arith.constant 1 : index
    %c0_27 = arith.constant 0 : index
    %c0_28 = arith.constant 0 : index
    %58 = vector.load %arg2[%c1, %c0_27, %c0_28] : memref<8x8x512xbf16, #tpu.memory_space<vmem>>, vector<1x8x512xbf16>
    %59 = vector.shape_cast %58 : vector<1x8x512xbf16> to vector<8x512xbf16>
    %60 = arith.truncf %54 : vector<8x128xf32> to vector<8x128xbf16>
    %61 = vector.extract_strided_slice %59 {offsets = [0, 0], sizes = [8, 128], strides = [1, 1]} : vector<8x512xbf16> to vector<8x128xbf16>
    %62 = arith.extf %61 : vector<8x128xbf16> to vector<8x128xf32>
    %cst_29 = arith.constant dense<0.000000e+00> : vector<8x128xf32>
    %63 = tpu.matmul %60, %3, %cst_29 {dimension_numbers = #tpu.dot_dimension_numbers<[1], [0], [0], [1], [0, 0, 1, 1], [], []>} : vector<8x128xbf16>, vector<128x128xbf16>, vector<8x128xf32> -> vector<8x128xf32>
    %64 = arith.addf %62, %63 : vector<8x128xf32>
    %65 = vector.extract_strided_slice %59 {offsets = [0, 128], sizes = [8, 128], strides = [1, 1]} : vector<8x512xbf16> to vector<8x128xbf16>
    %66 = arith.extf %65 : vector<8x128xbf16> to vector<8x128xf32>
    %cst_30 = arith.constant dense<0.000000e+00> : vector<8x128xf32>
    %67 = tpu.matmul %60, %4, %cst_30 {dimension_numbers = #tpu.dot_dimension_numbers<[1], [0], [0], [1], [0, 0, 1, 1], [], []>} : vector<8x128xbf16>, vector<128x128xbf16>, vector<8x128xf32> -> vector<8x128xf32>
    %68 = arith.addf %66, %67 : vector<8x128xf32>
    %69 = vector.extract_strided_slice %59 {offsets = [0, 256], sizes = [8, 128], strides = [1, 1]} : vector<8x512xbf16> to vector<8x128xbf16>
    %70 = arith.extf %69 : vector<8x128xbf16> to vector<8x128xf32>
    %cst_31 = arith.constant dense<0.000000e+00> : vector<8x128xf32>
    %71 = tpu.matmul %60, %5, %cst_31 {dimension_numbers = #tpu.dot_dimension_numbers<[1], [0], [0], [1], [0, 0, 1, 1], [], []>} : vector<8x128xbf16>, vector<128x128xbf16>, vector<8x128xf32> -> vector<8x128xf32>
    %72 = arith.addf %70, %71 : vector<8x128xf32>
    %73 = vector.extract_strided_slice %59 {offsets = [0, 384], sizes = [8, 128], strides = [1, 1]} : vector<8x512xbf16> to vector<8x128xbf16>
    %74 = arith.extf %73 : vector<8x128xbf16> to vector<8x128xf32>
    %cst_32 = arith.constant dense<0.000000e+00> : vector<8x128xf32>
    %75 = tpu.matmul %60, %6, %cst_32 {dimension_numbers = #tpu.dot_dimension_numbers<[1], [0], [0], [1], [0, 0, 1, 1], [], []>} : vector<8x128xbf16>, vector<128x128xbf16>, vector<8x128xf32> -> vector<8x128xf32>
    %76 = arith.addf %74, %75 : vector<8x128xf32>
    %cst_33 = arith.constant 5.000000e-01 : f32
    %77 = vector.broadcast %cst_33 : f32 to vector<8x128xf32>
    %78 = arith.mulf %77, %64 : vector<8x128xf32>
    %79 = math.tanh %78 : vector<8x128xf32>
    %cst_34 = arith.constant 5.000000e-01 : f32
    %80 = vector.broadcast %cst_34 : f32 to vector<8x128xf32>
    %81 = arith.mulf %80, %79 : vector<8x128xf32>
    %cst_35 = arith.constant 5.000000e-01 : f32
    %82 = vector.broadcast %cst_35 : f32 to vector<8x128xf32>
    %83 = arith.addf %81, %82 : vector<8x128xf32>
    %cst_36 = arith.constant 5.000000e-01 : f32
    %84 = vector.broadcast %cst_36 : f32 to vector<8x128xf32>
    %85 = arith.mulf %84, %68 : vector<8x128xf32>
    %86 = math.tanh %85 : vector<8x128xf32>
    %cst_37 = arith.constant 5.000000e-01 : f32
    %87 = vector.broadcast %cst_37 : f32 to vector<8x128xf32>
    %88 = arith.mulf %87, %86 : vector<8x128xf32>
    %cst_38 = arith.constant 5.000000e-01 : f32
    %89 = vector.broadcast %cst_38 : f32 to vector<8x128xf32>
    %90 = arith.addf %88, %89 : vector<8x128xf32>
    %91 = math.tanh %72 : vector<8x128xf32>
    %cst_39 = arith.constant 5.000000e-01 : f32
    %92 = vector.broadcast %cst_39 : f32 to vector<8x128xf32>
    %93 = arith.mulf %92, %76 : vector<8x128xf32>
    %94 = math.tanh %93 : vector<8x128xf32>
    %cst_40 = arith.constant 5.000000e-01 : f32
    %95 = vector.broadcast %cst_40 : f32 to vector<8x128xf32>
    %96 = arith.mulf %95, %94 : vector<8x128xf32>
    %cst_41 = arith.constant 5.000000e-01 : f32
    %97 = vector.broadcast %cst_41 : f32 to vector<8x128xf32>
    %98 = arith.addf %96, %97 : vector<8x128xf32>
    %99 = arith.mulf %90, %52 : vector<8x128xf32>
    %100 = arith.mulf %83, %91 : vector<8x128xf32>
    %101 = arith.addf %99, %100 : vector<8x128xf32>
    %102 = math.tanh %101 : vector<8x128xf32>
    %103 = arith.mulf %98, %102 : vector<8x128xf32>
    %c1_42 = arith.constant 1 : index
    %c0_43 = arith.constant 0 : index
    %c0_44 = arith.constant 0 : index
    %104 = vector.load %arg6[%c1_42, %c0_43, %c0_44] : memref<8x8x128xf32, #tpu.memory_space<vmem>>, vector<1x8x128xf32>
    %105 = vector.shape_cast %104 : vector<1x8x128xf32> to vector<8x128xf32>
    %106 = vector.shape_cast %103 : vector<8x128xf32> to vector<1x8x128xf32>
    tpu.vector_store %arg6[%c1_42, %c0_43, %c0_44], %106 {strides = array<i32>} : memref<8x8x128xf32, #tpu.memory_space<vmem>>, vector<1x8x128xf32>,
    %c2 = arith.constant 2 : index
    %c0_45 = arith.constant 0 : index
    %c0_46 = arith.constant 0 : index
    %107 = vector.load %arg2[%c2, %c0_45, %c0_46] : memref<8x8x512xbf16, #tpu.memory_space<vmem>>, vector<1x8x512xbf16>
    %108 = vector.shape_cast %107 : vector<1x8x512xbf16> to vector<8x512xbf16>
    %109 = arith.truncf %103 : vector<8x128xf32> to vector<8x128xbf16>
    %110 = vector.extract_strided_slice %108 {offsets = [0, 0], sizes = [8, 128], strides = [1, 1]} : vector<8x512xbf16> to vector<8x128xbf16>
    %111 = arith.extf %110 : vector<8x128xbf16> to vector<8x128xf32>
    %cst_47 = arith.constant dense<0.000000e+00> : vector<8x128xf32>
    %112 = tpu.matmul %109, %3, %cst_47 {dimension_numbers = #tpu.dot_dimension_numbers<[1], [0], [0], [1], [0, 0, 1, 1], [], []>} : vector<8x128xbf16>, vector<128x128xbf16>, vector<8x128xf32> -> vector<8x128xf32>
    %113 = arith.addf %111, %112 : vector<8x128xf32>
    %114 = vector.extract_strided_slice %108 {offsets = [0, 128], sizes = [8, 128], strides = [1, 1]} : vector<8x512xbf16> to vector<8x128xbf16>
    %115 = arith.extf %114 : vector<8x128xbf16> to vector<8x128xf32>
    %cst_48 = arith.constant dense<0.000000e+00> : vector<8x128xf32>
    %116 = tpu.matmul %109, %4, %cst_48 {dimension_numbers = #tpu.dot_dimension_numbers<[1], [0], [0], [1], [0, 0, 1, 1], [], []>} : vector<8x128xbf16>, vector<128x128xbf16>, vector<8x128xf32> -> vector<8x128xf32>
    %117 = arith.addf %115, %116 : vector<8x128xf32>
    %118 = vector.extract_strided_slice %108 {offsets = [0, 256], sizes = [8, 128], strides = [1, 1]} : vector<8x512xbf16> to vector<8x128xbf16>
    %119 = arith.extf %118 : vector<8x128xbf16> to vector<8x128xf32>
    %cst_49 = arith.constant dense<0.000000e+00> : vector<8x128xf32>
    %120 = tpu.matmul %109, %5, %cst_49 {dimension_numbers = #tpu.dot_dimension_numbers<[1], [0], [0], [1], [0, 0, 1, 1], [], []>} : vector<8x128xbf16>, vector<128x128xbf16>, vector<8x128xf32> -> vector<8x128xf32>
    %121 = arith.addf %119, %120 : vector<8x128xf32>
    %122 = vector.extract_strided_slice %108 {offsets = [0, 384], sizes = [8, 128], strides = [1, 1]} : vector<8x512xbf16> to vector<8x128xbf16>
    %123 = arith.extf %122 : vector<8x128xbf16> to vector<8x128xf32>
    %cst_50 = arith.constant dense<0.000000e+00> : vector<8x128xf32>
    %124 = tpu.matmul %109, %6, %cst_50 {dimension_numbers = #tpu.dot_dimension_numbers<[1], [0], [0], [1], [0, 0, 1, 1], [], []>} : vector<8x128xbf16>, vector<128x128xbf16>, vector<8x128xf32> -> vector<8x128xf32>
    %125 = arith.addf %123, %124 : vector<8x128xf32>
    %cst_51 = arith.constant 5.000000e-01 : f32
    %126 = vector.broadcast %cst_51 : f32 to vector<8x128xf32>
    %127 = arith.mulf %126, %113 : vector<8x128xf32>
    %128 = math.tanh %127 : vector<8x128xf32>
    %cst_52 = arith.constant 5.000000e-01 : f32
    %129 = vector.broadcast %cst_52 : f32 to vector<8x128xf32>
    %130 = arith.mulf %129, %128 : vector<8x128xf32>
    %cst_53 = arith.constant 5.000000e-01 : f32
    %131 = vector.broadcast %cst_53 : f32 to vector<8x128xf32>
    %132 = arith.addf %130, %131 : vector<8x128xf32>
    %cst_54 = arith.constant 5.000000e-01 : f32
    %133 = vector.broadcast %cst_54 : f32 to vector<8x128xf32>
    %134 = arith.mulf %133, %117 : vector<8x128xf32>
    %135 = math.tanh %134 : vector<8x128xf32>
    %cst_55 = arith.constant 5.000000e-01 : f32
    %136 = vector.broadcast %cst_55 : f32 to vector<8x128xf32>
    %137 = arith.mulf %136, %135 : vector<8x128xf32>
    %cst_56 = arith.constant 5.000000e-01 : f32
    %138 = vector.broadcast %cst_56 : f32 to vector<8x128xf32>
    %139 = arith.addf %137, %138 : vector<8x128xf32>
    %140 = math.tanh %121 : vector<8x128xf32>
    %cst_57 = arith.constant 5.000000e-01 : f32
    %141 = vector.broadcast %cst_57 : f32 to vector<8x128xf32>
    %142 = arith.mulf %141, %125 : vector<8x128xf32>
    %143 = math.tanh %142 : vector<8x128xf32>
    %cst_58 = arith.constant 5.000000e-01 : f32
    %144 = vector.broadcast %cst_58 : f32 to vector<8x128xf32>
    %145 = arith.mulf %144, %143 : vector<8x128xf32>
    %cst_59 = arith.constant 5.000000e-01 : f32
    %146 = vector.broadcast %cst_59 : f32 to vector<8x128xf32>
    %147 = arith.addf %145, %146 : vector<8x128xf32>
    %148 = arith.mulf %139, %101 : vector<8x128xf32>
    %149 = arith.mulf %132, %140 : vector<8x128xf32>
    %150 = arith.addf %148, %149 : vector<8x128xf32>
    %151 = math.tanh %150 : vector<8x128xf32>
    %152 = arith.mulf %147, %151 : vector<8x128xf32>
    %c2_60 = arith.constant 2 : index
    %c0_61 = arith.constant 0 : index
    %c0_62 = arith.constant 0 : index
    %153 = vector.load %arg6[%c2_60, %c0_61, %c0_62] : memref<8x8x128xf32, #tpu.memory_space<vmem>>, vector<1x8x128xf32>
    %154 = vector.shape_cast %153 : vector<1x8x128xf32> to vector<8x128xf32>
    %155 = vector.shape_cast %152 : vector<8x128xf32> to vector<1x8x128xf32>
    tpu.vector_store %arg6[%c2_60, %c0_61, %c0_62], %155 {strides = array<i32>} : memref<8x8x128xf32, #tpu.memory_space<vmem>>, vector<1x8x128xf32>,
    %c3 = arith.constant 3 : index
    %c0_63 = arith.constant 0 : index
    %c0_64 = arith.constant 0 : index
    %156 = vector.load %arg2[%c3, %c0_63, %c0_64] : memref<8x8x512xbf16, #tpu.memory_space<vmem>>, vector<1x8x512xbf16>
    %157 = vector.shape_cast %156 : vector<1x8x512xbf16> to vector<8x512xbf16>
    %158 = arith.truncf %152 : vector<8x128xf32> to vector<8x128xbf16>
    %159 = vector.extract_strided_slice %157 {offsets = [0, 0], sizes = [8, 128], strides = [1, 1]} : vector<8x512xbf16> to vector<8x128xbf16>
    %160 = arith.extf %159 : vector<8x128xbf16> to vector<8x128xf32>
    %cst_65 = arith.constant dense<0.000000e+00> : vector<8x128xf32>
    %161 = tpu.matmul %158, %3, %cst_65 {dimension_numbers = #tpu.dot_dimension_numbers<[1], [0], [0], [1], [0, 0, 1, 1], [], []>} : vector<8x128xbf16>, vector<128x128xbf16>, vector<8x128xf32> -> vector<8x128xf32>
    %162 = arith.addf %160, %161 : vector<8x128xf32>
    %163 = vector.extract_strided_slice %157 {offsets = [0, 128], sizes = [8, 128], strides = [1, 1]} : vector<8x512xbf16> to vector<8x128xbf16>
    %164 = arith.extf %163 : vector<8x128xbf16> to vector<8x128xf32>
    %cst_66 = arith.constant dense<0.000000e+00> : vector<8x128xf32>
    %165 = tpu.matmul %158, %4, %cst_66 {dimension_numbers = #tpu.dot_dimension_numbers<[1], [0], [0], [1], [0, 0, 1, 1], [], []>} : vector<8x128xbf16>, vector<128x128xbf16>, vector<8x128xf32> -> vector<8x128xf32>
    %166 = arith.addf %164, %165 : vector<8x128xf32>
    %167 = vector.extract_strided_slice %157 {offsets = [0, 256], sizes = [8, 128], strides = [1, 1]} : vector<8x512xbf16> to vector<8x128xbf16>
    %168 = arith.extf %167 : vector<8x128xbf16> to vector<8x128xf32>
    %cst_67 = arith.constant dense<0.000000e+00> : vector<8x128xf32>
    %169 = tpu.matmul %158, %5, %cst_67 {dimension_numbers = #tpu.dot_dimension_numbers<[1], [0], [0], [1], [0, 0, 1, 1], [], []>} : vector<8x128xbf16>, vector<128x128xbf16>, vector<8x128xf32> -> vector<8x128xf32>
    %170 = arith.addf %168, %169 : vector<8x128xf32>
    %171 = vector.extract_strided_slice %157 {offsets = [0, 384], sizes = [8, 128], strides = [1, 1]} : vector<8x512xbf16> to vector<8x128xbf16>
    %172 = arith.extf %171 : vector<8x128xbf16> to vector<8x128xf32>
    %cst_68 = arith.constant dense<0.000000e+00> : vector<8x128xf32>
    %173 = tpu.matmul %158, %6, %cst_68 {dimension_numbers = #tpu.dot_dimension_numbers<[1], [0], [0], [1], [0, 0, 1, 1], [], []>} : vector<8x128xbf16>, vector<128x128xbf16>, vector<8x128xf32> -> vector<8x128xf32>
    %174 = arith.addf %172, %173 : vector<8x128xf32>
    %cst_69 = arith.constant 5.000000e-01 : f32
    %175 = vector.broadcast %cst_69 : f32 to vector<8x128xf32>
    %176 = arith.mulf %175, %162 : vector<8x128xf32>
    %177 = math.tanh %176 : vector<8x128xf32>
    %cst_70 = arith.constant 5.000000e-01 : f32
    %178 = vector.broadcast %cst_70 : f32 to vector<8x128xf32>
    %179 = arith.mulf %178, %177 : vector<8x128xf32>
    %cst_71 = arith.constant 5.000000e-01 : f32
    %180 = vector.broadcast %cst_71 : f32 to vector<8x128xf32>
    %181 = arith.addf %179, %180 : vector<8x128xf32>
    %cst_72 = arith.constant 5.000000e-01 : f32
    %182 = vector.broadcast %cst_72 : f32 to vector<8x128xf32>
    %183 = arith.mulf %182, %166 : vector<8x128xf32>
    %184 = math.tanh %183 : vector<8x128xf32>
    %cst_73 = arith.constant 5.000000e-01 : f32
    %185 = vector.broadcast %cst_73 : f32 to vector<8x128xf32>
    %186 = arith.mulf %185, %184 : vector<8x128xf32>
    %cst_74 = arith.constant 5.000000e-01 : f32
    %187 = vector.broadcast %cst_74 : f32 to vector<8x128xf32>
    %188 = arith.addf %186, %187 : vector<8x128xf32>
    %189 = math.tanh %170 : vector<8x128xf32>
    %cst_75 = arith.constant 5.000000e-01 : f32
    %190 = vector.broadcast %cst_75 : f32 to vector<8x128xf32>
    %191 = arith.mulf %190, %174 : vector<8x128xf32>
    %192 = math.tanh %191 : vector<8x128xf32>
    %cst_76 = arith.constant 5.000000e-01 : f32
    %193 = vector.broadcast %cst_76 : f32 to vector<8x128xf32>
    %194 = arith.mulf %193, %192 : vector<8x128xf32>
    %cst_77 = arith.constant 5.000000e-01 : f32
    %195 = vector.broadcast %cst_77 : f32 to vector<8x128xf32>
    %196 = arith.addf %194, %195 : vector<8x128xf32>
    %197 = arith.mulf %188, %150 : vector<8x128xf32>
    %198 = arith.mulf %181, %189 : vector<8x128xf32>
    %199 = arith.addf %197, %198 : vector<8x128xf32>
    %200 = math.tanh %199 : vector<8x128xf32>
    %201 = arith.mulf %196, %200 : vector<8x128xf32>
    %c3_78 = arith.constant 3 : index
    %c0_79 = arith.constant 0 : index
    %c0_80 = arith.constant 0 : index
    %202 = vector.load %arg6[%c3_78, %c0_79, %c0_80] : memref<8x8x128xf32, #tpu.memory_space<vmem>>, vector<1x8x128xf32>
    %203 = vector.shape_cast %202 : vector<1x8x128xf32> to vector<8x128xf32>
    %204 = vector.shape_cast %201 : vector<8x128xf32> to vector<1x8x128xf32>
    tpu.vector_store %arg6[%c3_78, %c0_79, %c0_80], %204 {strides = array<i32>} : memref<8x8x128xf32, #tpu.memory_space<vmem>>, vector<1x8x128xf32>,
    %c4 = arith.constant 4 : index
    %c0_81 = arith.constant 0 : index
    %c0_82 = arith.constant 0 : index
    %205 = vector.load %arg2[%c4, %c0_81, %c0_82] : memref<8x8x512xbf16, #tpu.memory_space<vmem>>, vector<1x8x512xbf16>
    %206 = vector.shape_cast %205 : vector<1x8x512xbf16> to vector<8x512xbf16>
    %207 = arith.truncf %201 : vector<8x128xf32> to vector<8x128xbf16>
    %208 = vector.extract_strided_slice %206 {offsets = [0, 0], sizes = [8, 128], strides = [1, 1]} : vector<8x512xbf16> to vector<8x128xbf16>
    %209 = arith.extf %208 : vector<8x128xbf16> to vector<8x128xf32>
    %cst_83 = arith.constant dense<0.000000e+00> : vector<8x128xf32>
    %210 = tpu.matmul %207, %3, %cst_83 {dimension_numbers = #tpu.dot_dimension_numbers<[1], [0], [0], [1], [0, 0, 1, 1], [], []>} : vector<8x128xbf16>, vector<128x128xbf16>, vector<8x128xf32> -> vector<8x128xf32>
    %211 = arith.addf %209, %210 : vector<8x128xf32>
    %212 = vector.extract_strided_slice %206 {offsets = [0, 128], sizes = [8, 128], strides = [1, 1]} : vector<8x512xbf16> to vector<8x128xbf16>
    %213 = arith.extf %212 : vector<8x128xbf16> to vector<8x128xf32>
    %cst_84 = arith.constant dense<0.000000e+00> : vector<8x128xf32>
    %214 = tpu.matmul %207, %4, %cst_84 {dimension_numbers = #tpu.dot_dimension_numbers<[1], [0], [0], [1], [0, 0, 1, 1], [], []>} : vector<8x128xbf16>, vector<128x128xbf16>, vector<8x128xf32> -> vector<8x128xf32>
    %215 = arith.addf %213, %214 : vector<8x128xf32>
    %216 = vector.extract_strided_slice %206 {offsets = [0, 256], sizes = [8, 128], strides = [1, 1]} : vector<8x512xbf16> to vector<8x128xbf16>
    %217 = arith.extf %216 : vector<8x128xbf16> to vector<8x128xf32>
    %cst_85 = arith.constant dense<0.000000e+00> : vector<8x128xf32>
    %218 = tpu.matmul %207, %5, %cst_85 {dimension_numbers = #tpu.dot_dimension_numbers<[1], [0], [0], [1], [0, 0, 1, 1], [], []>} : vector<8x128xbf16>, vector<128x128xbf16>, vector<8x128xf32> -> vector<8x128xf32>
    %219 = arith.addf %217, %218 : vector<8x128xf32>
    %220 = vector.extract_strided_slice %206 {offsets = [0, 384], sizes = [8, 128], strides = [1, 1]} : vector<8x512xbf16> to vector<8x128xbf16>
    %221 = arith.extf %220 : vector<8x128xbf16> to vector<8x128xf32>
    %cst_86 = arith.constant dense<0.000000e+00> : vector<8x128xf32>
    %222 = tpu.matmul %207, %6, %cst_86 {dimension_numbers = #tpu.dot_dimension_numbers<[1], [0], [0], [1], [0, 0, 1, 1], [], []>} : vector<8x128xbf16>, vector<128x128xbf16>, vector<8x128xf32> -> vector<8x128xf32>
    %223 = arith.addf %221, %222 : vector<8x128xf32>
    %cst_87 = arith.constant 5.000000e-01 : f32
    %224 = vector.broadcast %cst_87 : f32 to vector<8x128xf32>
    %225 = arith.mulf %224, %211 : vector<8x128xf32>
    %226 = math.tanh %225 : vector<8x128xf32>
    %cst_88 = arith.constant 5.000000e-01 : f32
    %227 = vector.broadcast %cst_88 : f32 to vector<8x128xf32>
    %228 = arith.mulf %227, %226 : vector<8x128xf32>
    %cst_89 = arith.constant 5.000000e-01 : f32
    %229 = vector.broadcast %cst_89 : f32 to vector<8x128xf32>
    %230 = arith.addf %228, %229 : vector<8x128xf32>
    %cst_90 = arith.constant 5.000000e-01 : f32
    %231 = vector.broadcast %cst_90 : f32 to vector<8x128xf32>
    %232 = arith.mulf %231, %215 : vector<8x128xf32>
    %233 = math.tanh %232 : vector<8x128xf32>
    %cst_91 = arith.constant 5.000000e-01 : f32
    %234 = vector.broadcast %cst_91 : f32 to vector<8x128xf32>
    %235 = arith.mulf %234, %233 : vector<8x128xf32>
    %cst_92 = arith.constant 5.000000e-01 : f32
    %236 = vector.broadcast %cst_92 : f32 to vector<8x128xf32>
    %237 = arith.addf %235, %236 : vector<8x128xf32>
    %238 = math.tanh %219 : vector<8x128xf32>
    %cst_93 = arith.constant 5.000000e-01 : f32
    %239 = vector.broadcast %cst_93 : f32 to vector<8x128xf32>
    %240 = arith.mulf %239, %223 : vector<8x128xf32>
    %241 = math.tanh %240 : vector<8x128xf32>
    %cst_94 = arith.constant 5.000000e-01 : f32
    %242 = vector.broadcast %cst_94 : f32 to vector<8x128xf32>
    %243 = arith.mulf %242, %241 : vector<8x128xf32>
    %cst_95 = arith.constant 5.000000e-01 : f32
    %244 = vector.broadcast %cst_95 : f32 to vector<8x128xf32>
    %245 = arith.addf %243, %244 : vector<8x128xf32>
    %246 = arith.mulf %237, %199 : vector<8x128xf32>
    %247 = arith.mulf %230, %238 : vector<8x128xf32>
    %248 = arith.addf %246, %247 : vector<8x128xf32>
    %249 = math.tanh %248 : vector<8x128xf32>
    %250 = arith.mulf %245, %249 : vector<8x128xf32>
    %c4_96 = arith.constant 4 : index
    %c0_97 = arith.constant 0 : index
    %c0_98 = arith.constant 0 : index
    %251 = vector.load %arg6[%c4_96, %c0_97, %c0_98] : memref<8x8x128xf32, #tpu.memory_space<vmem>>, vector<1x8x128xf32>
    %252 = vector.shape_cast %251 : vector<1x8x128xf32> to vector<8x128xf32>
    %253 = vector.shape_cast %250 : vector<8x128xf32> to vector<1x8x128xf32>
    tpu.vector_store %arg6[%c4_96, %c0_97, %c0_98], %253 {strides = array<i32>} : memref<8x8x128xf32, #tpu.memory_space<vmem>>, vector<1x8x128xf32>,
    %c5 = arith.constant 5 : index
    %c0_99 = arith.constant 0 : index
    %c0_100 = arith.constant 0 : index
    %254 = vector.load %arg2[%c5, %c0_99, %c0_100] : memref<8x8x512xbf16, #tpu.memory_space<vmem>>, vector<1x8x512xbf16>
    %255 = vector.shape_cast %254 : vector<1x8x512xbf16> to vector<8x512xbf16>
    %256 = arith.truncf %250 : vector<8x128xf32> to vector<8x128xbf16>
    %257 = vector.extract_strided_slice %255 {offsets = [0, 0], sizes = [8, 128], strides = [1, 1]} : vector<8x512xbf16> to vector<8x128xbf16>
    %258 = arith.extf %257 : vector<8x128xbf16> to vector<8x128xf32>
    %cst_101 = arith.constant dense<0.000000e+00> : vector<8x128xf32>
    %259 = tpu.matmul %256, %3, %cst_101 {dimension_numbers = #tpu.dot_dimension_numbers<[1], [0], [0], [1], [0, 0, 1, 1], [], []>} : vector<8x128xbf16>, vector<128x128xbf16>, vector<8x128xf32> -> vector<8x128xf32>
    %260 = arith.addf %258, %259 : vector<8x128xf32>
    %261 = vector.extract_strided_slice %255 {offsets = [0, 128], sizes = [8, 128], strides = [1, 1]} : vector<8x512xbf16> to vector<8x128xbf16>
    %262 = arith.extf %261 : vector<8x128xbf16> to vector<8x128xf32>
    %cst_102 = arith.constant dense<0.000000e+00> : vector<8x128xf32>
    %263 = tpu.matmul %256, %4, %cst_102 {dimension_numbers = #tpu.dot_dimension_numbers<[1], [0], [0], [1], [0, 0, 1, 1], [], []>} : vector<8x128xbf16>, vector<128x128xbf16>, vector<8x128xf32> -> vector<8x128xf32>
    %264 = arith.addf %262, %263 : vector<8x128xf32>
    %265 = vector.extract_strided_slice %255 {offsets = [0, 256], sizes = [8, 128], strides = [1, 1]} : vector<8x512xbf16> to vector<8x128xbf16>
    %266 = arith.extf %265 : vector<8x128xbf16> to vector<8x128xf32>
    %cst_103 = arith.constant dense<0.000000e+00> : vector<8x128xf32>
    %267 = tpu.matmul %256, %5, %cst_103 {dimension_numbers = #tpu.dot_dimension_numbers<[1], [0], [0], [1], [0, 0, 1, 1], [], []>} : vector<8x128xbf16>, vector<128x128xbf16>, vector<8x128xf32> -> vector<8x128xf32>
    %268 = arith.addf %266, %267 : vector<8x128xf32>
    %269 = vector.extract_strided_slice %255 {offsets = [0, 384], sizes = [8, 128], strides = [1, 1]} : vector<8x512xbf16> to vector<8x128xbf16>
    %270 = arith.extf %269 : vector<8x128xbf16> to vector<8x128xf32>
    %cst_104 = arith.constant dense<0.000000e+00> : vector<8x128xf32>
    %271 = tpu.matmul %256, %6, %cst_104 {dimension_numbers = #tpu.dot_dimension_numbers<[1], [0], [0], [1], [0, 0, 1, 1], [], []>} : vector<8x128xbf16>, vector<128x128xbf16>, vector<8x128xf32> -> vector<8x128xf32>
    %272 = arith.addf %270, %271 : vector<8x128xf32>
    %cst_105 = arith.constant 5.000000e-01 : f32
    %273 = vector.broadcast %cst_105 : f32 to vector<8x128xf32>
    %274 = arith.mulf %273, %260 : vector<8x128xf32>
    %275 = math.tanh %274 : vector<8x128xf32>
    %cst_106 = arith.constant 5.000000e-01 : f32
    %276 = vector.broadcast %cst_106 : f32 to vector<8x128xf32>
    %277 = arith.mulf %276, %275 : vector<8x128xf32>
    %cst_107 = arith.constant 5.000000e-01 : f32
    %278 = vector.broadcast %cst_107 : f32 to vector<8x128xf32>
    %279 = arith.addf %277, %278 : vector<8x128xf32>
    %cst_108 = arith.constant 5.000000e-01 : f32
    %280 = vector.broadcast %cst_108 : f32 to vector<8x128xf32>
    %281 = arith.mulf %280, %264 : vector<8x128xf32>
    %282 = math.tanh %281 : vector<8x128xf32>
    %cst_109 = arith.constant 5.000000e-01 : f32
    %283 = vector.broadcast %cst_109 : f32 to vector<8x128xf32>
    %284 = arith.mulf %283, %282 : vector<8x128xf32>
    %cst_110 = arith.constant 5.000000e-01 : f32
    %285 = vector.broadcast %cst_110 : f32 to vector<8x128xf32>
    %286 = arith.addf %284, %285 : vector<8x128xf32>
    %287 = math.tanh %268 : vector<8x128xf32>
    %cst_111 = arith.constant 5.000000e-01 : f32
    %288 = vector.broadcast %cst_111 : f32 to vector<8x128xf32>
    %289 = arith.mulf %288, %272 : vector<8x128xf32>
    %290 = math.tanh %289 : vector<8x128xf32>
    %cst_112 = arith.constant 5.000000e-01 : f32
    %291 = vector.broadcast %cst_112 : f32 to vector<8x128xf32>
    %292 = arith.mulf %291, %290 : vector<8x128xf32>
    %cst_113 = arith.constant 5.000000e-01 : f32
    %293 = vector.broadcast %cst_113 : f32 to vector<8x128xf32>
    %294 = arith.addf %292, %293 : vector<8x128xf32>
    %295 = arith.mulf %286, %248 : vector<8x128xf32>
    %296 = arith.mulf %279, %287 : vector<8x128xf32>
    %297 = arith.addf %295, %296 : vector<8x128xf32>
    %298 = math.tanh %297 : vector<8x128xf32>
    %299 = arith.mulf %294, %298 : vector<8x128xf32>
    %c5_114 = arith.constant 5 : index
    %c0_115 = arith.constant 0 : index
    %c0_116 = arith.constant 0 : index
    %300 = vector.load %arg6[%c5_114, %c0_115, %c0_116] : memref<8x8x128xf32, #tpu.memory_space<vmem>>, vector<1x8x128xf32>
    %301 = vector.shape_cast %300 : vector<1x8x128xf32> to vector<8x128xf32>
    %302 = vector.shape_cast %299 : vector<8x128xf32> to vector<1x8x128xf32>
    tpu.vector_store %arg6[%c5_114, %c0_115, %c0_116], %302 {strides = array<i32>} : memref<8x8x128xf32, #tpu.memory_space<vmem>>, vector<1x8x128xf32>,
    %c6 = arith.constant 6 : index
    %c0_117 = arith.constant 0 : index
    %c0_118 = arith.constant 0 : index
    %303 = vector.load %arg2[%c6, %c0_117, %c0_118] : memref<8x8x512xbf16, #tpu.memory_space<vmem>>, vector<1x8x512xbf16>
    %304 = vector.shape_cast %303 : vector<1x8x512xbf16> to vector<8x512xbf16>
    %305 = arith.truncf %299 : vector<8x128xf32> to vector<8x128xbf16>
    %306 = vector.extract_strided_slice %304 {offsets = [0, 0], sizes = [8, 128], strides = [1, 1]} : vector<8x512xbf16> to vector<8x128xbf16>
    %307 = arith.extf %306 : vector<8x128xbf16> to vector<8x128xf32>
    %cst_119 = arith.constant dense<0.000000e+00> : vector<8x128xf32>
    %308 = tpu.matmul %305, %3, %cst_119 {dimension_numbers = #tpu.dot_dimension_numbers<[1], [0], [0], [1], [0, 0, 1, 1], [], []>} : vector<8x128xbf16>, vector<128x128xbf16>, vector<8x128xf32> -> vector<8x128xf32>
    %309 = arith.addf %307, %308 : vector<8x128xf32>
    %310 = vector.extract_strided_slice %304 {offsets = [0, 128], sizes = [8, 128], strides = [1, 1]} : vector<8x512xbf16> to vector<8x128xbf16>
    %311 = arith.extf %310 : vector<8x128xbf16> to vector<8x128xf32>
    %cst_120 = arith.constant dense<0.000000e+00> : vector<8x128xf32>
    %312 = tpu.matmul %305, %4, %cst_120 {dimension_numbers = #tpu.dot_dimension_numbers<[1], [0], [0], [1], [0, 0, 1, 1], [], []>} : vector<8x128xbf16>, vector<128x128xbf16>, vector<8x128xf32> -> vector<8x128xf32>
    %313 = arith.addf %311, %312 : vector<8x128xf32>
    %314 = vector.extract_strided_slice %304 {offsets = [0, 256], sizes = [8, 128], strides = [1, 1]} : vector<8x512xbf16> to vector<8x128xbf16>
    %315 = arith.extf %314 : vector<8x128xbf16> to vector<8x128xf32>
    %cst_121 = arith.constant dense<0.000000e+00> : vector<8x128xf32>
    %316 = tpu.matmul %305, %5, %cst_121 {dimension_numbers = #tpu.dot_dimension_numbers<[1], [0], [0], [1], [0, 0, 1, 1], [], []>} : vector<8x128xbf16>, vector<128x128xbf16>, vector<8x128xf32> -> vector<8x128xf32>
    %317 = arith.addf %315, %316 : vector<8x128xf32>
    %318 = vector.extract_strided_slice %304 {offsets = [0, 384], sizes = [8, 128], strides = [1, 1]} : vector<8x512xbf16> to vector<8x128xbf16>
    %319 = arith.extf %318 : vector<8x128xbf16> to vector<8x128xf32>
    %cst_122 = arith.constant dense<0.000000e+00> : vector<8x128xf32>
    %320 = tpu.matmul %305, %6, %cst_122 {dimension_numbers = #tpu.dot_dimension_numbers<[1], [0], [0], [1], [0, 0, 1, 1], [], []>} : vector<8x128xbf16>, vector<128x128xbf16>, vector<8x128xf32> -> vector<8x128xf32>
    %321 = arith.addf %319, %320 : vector<8x128xf32>
    %cst_123 = arith.constant 5.000000e-01 : f32
    %322 = vector.broadcast %cst_123 : f32 to vector<8x128xf32>
    %323 = arith.mulf %322, %309 : vector<8x128xf32>
    %324 = math.tanh %323 : vector<8x128xf32>
    %cst_124 = arith.constant 5.000000e-01 : f32
    %325 = vector.broadcast %cst_124 : f32 to vector<8x128xf32>
    %326 = arith.mulf %325, %324 : vector<8x128xf32>
    %cst_125 = arith.constant 5.000000e-01 : f32
    %327 = vector.broadcast %cst_125 : f32 to vector<8x128xf32>
    %328 = arith.addf %326, %327 : vector<8x128xf32>
    %cst_126 = arith.constant 5.000000e-01 : f32
    %329 = vector.broadcast %cst_126 : f32 to vector<8x128xf32>
    %330 = arith.mulf %329, %313 : vector<8x128xf32>
    %331 = math.tanh %330 : vector<8x128xf32>
    %cst_127 = arith.constant 5.000000e-01 : f32
    %332 = vector.broadcast %cst_127 : f32 to vector<8x128xf32>
    %333 = arith.mulf %332, %331 : vector<8x128xf32>
    %cst_128 = arith.constant 5.000000e-01 : f32
    %334 = vector.broadcast %cst_128 : f32 to vector<8x128xf32>
    %335 = arith.addf %333, %334 : vector<8x128xf32>
    %336 = math.tanh %317 : vector<8x128xf32>
    %cst_129 = arith.constant 5.000000e-01 : f32
    %337 = vector.broadcast %cst_129 : f32 to vector<8x128xf32>
    %338 = arith.mulf %337, %321 : vector<8x128xf32>
    %339 = math.tanh %338 : vector<8x128xf32>
    %cst_130 = arith.constant 5.000000e-01 : f32
    %340 = vector.broadcast %cst_130 : f32 to vector<8x128xf32>
    %341 = arith.mulf %340, %339 : vector<8x128xf32>
    %cst_131 = arith.constant 5.000000e-01 : f32
    %342 = vector.broadcast %cst_131 : f32 to vector<8x128xf32>
    %343 = arith.addf %341, %342 : vector<8x128xf32>
    %344 = arith.mulf %335, %297 : vector<8x128xf32>
    %345 = arith.mulf %328, %336 : vector<8x128xf32>
    %346 = arith.addf %344, %345 : vector<8x128xf32>
    %347 = math.tanh %346 : vector<8x128xf32>
    %348 = arith.mulf %343, %347 : vector<8x128xf32>
    %c6_132 = arith.constant 6 : index
    %c0_133 = arith.constant 0 : index
    %c0_134 = arith.constant 0 : index
    %349 = vector.load %arg6[%c6_132, %c0_133, %c0_134] : memref<8x8x128xf32, #tpu.memory_space<vmem>>, vector<1x8x128xf32>
    %350 = vector.shape_cast %349 : vector<1x8x128xf32> to vector<8x128xf32>
    %351 = vector.shape_cast %348 : vector<8x128xf32> to vector<1x8x128xf32>
    tpu.vector_store %arg6[%c6_132, %c0_133, %c0_134], %351 {strides = array<i32>} : memref<8x8x128xf32, #tpu.memory_space<vmem>>, vector<1x8x128xf32>,
    %c7 = arith.constant 7 : index
    %c0_135 = arith.constant 0 : index
    %c0_136 = arith.constant 0 : index
    %352 = vector.load %arg2[%c7, %c0_135, %c0_136] : memref<8x8x512xbf16, #tpu.memory_space<vmem>>, vector<1x8x512xbf16>
    %353 = vector.shape_cast %352 : vector<1x8x512xbf16> to vector<8x512xbf16>
    %354 = arith.truncf %348 : vector<8x128xf32> to vector<8x128xbf16>
    %355 = vector.extract_strided_slice %353 {offsets = [0, 0], sizes = [8, 128], strides = [1, 1]} : vector<8x512xbf16> to vector<8x128xbf16>
    %356 = arith.extf %355 : vector<8x128xbf16> to vector<8x128xf32>
    %cst_137 = arith.constant dense<0.000000e+00> : vector<8x128xf32>
    %357 = tpu.matmul %354, %3, %cst_137 {dimension_numbers = #tpu.dot_dimension_numbers<[1], [0], [0], [1], [0, 0, 1, 1], [], []>} : vector<8x128xbf16>, vector<128x128xbf16>, vector<8x128xf32> -> vector<8x128xf32>
    %358 = arith.addf %356, %357 : vector<8x128xf32>
    %359 = vector.extract_strided_slice %353 {offsets = [0, 128], sizes = [8, 128], strides = [1, 1]} : vector<8x512xbf16> to vector<8x128xbf16>
    %360 = arith.extf %359 : vector<8x128xbf16> to vector<8x128xf32>
    %cst_138 = arith.constant dense<0.000000e+00> : vector<8x128xf32>
    %361 = tpu.matmul %354, %4, %cst_138 {dimension_numbers = #tpu.dot_dimension_numbers<[1], [0], [0], [1], [0, 0, 1, 1], [], []>} : vector<8x128xbf16>, vector<128x128xbf16>, vector<8x128xf32> -> vector<8x128xf32>
    %362 = arith.addf %360, %361 : vector<8x128xf32>
    %363 = vector.extract_strided_slice %353 {offsets = [0, 256], sizes = [8, 128], strides = [1, 1]} : vector<8x512xbf16> to vector<8x128xbf16>
    %364 = arith.extf %363 : vector<8x128xbf16> to vector<8x128xf32>
    %cst_139 = arith.constant dense<0.000000e+00> : vector<8x128xf32>
    %365 = tpu.matmul %354, %5, %cst_139 {dimension_numbers = #tpu.dot_dimension_numbers<[1], [0], [0], [1], [0, 0, 1, 1], [], []>} : vector<8x128xbf16>, vector<128x128xbf16>, vector<8x128xf32> -> vector<8x128xf32>
    %366 = arith.addf %364, %365 : vector<8x128xf32>
    %367 = vector.extract_strided_slice %353 {offsets = [0, 384], sizes = [8, 128], strides = [1, 1]} : vector<8x512xbf16> to vector<8x128xbf16>
    %368 = arith.extf %367 : vector<8x128xbf16> to vector<8x128xf32>
    %cst_140 = arith.constant dense<0.000000e+00> : vector<8x128xf32>
    %369 = tpu.matmul %354, %6, %cst_140 {dimension_numbers = #tpu.dot_dimension_numbers<[1], [0], [0], [1], [0, 0, 1, 1], [], []>} : vector<8x128xbf16>, vector<128x128xbf16>, vector<8x128xf32> -> vector<8x128xf32>
    %370 = arith.addf %368, %369 : vector<8x128xf32>
    %cst_141 = arith.constant 5.000000e-01 : f32
    %371 = vector.broadcast %cst_141 : f32 to vector<8x128xf32>
    %372 = arith.mulf %371, %358 : vector<8x128xf32>
    %373 = math.tanh %372 : vector<8x128xf32>
    %cst_142 = arith.constant 5.000000e-01 : f32
    %374 = vector.broadcast %cst_142 : f32 to vector<8x128xf32>
    %375 = arith.mulf %374, %373 : vector<8x128xf32>
    %cst_143 = arith.constant 5.000000e-01 : f32
    %376 = vector.broadcast %cst_143 : f32 to vector<8x128xf32>
    %377 = arith.addf %375, %376 : vector<8x128xf32>
    %cst_144 = arith.constant 5.000000e-01 : f32
    %378 = vector.broadcast %cst_144 : f32 to vector<8x128xf32>
    %379 = arith.mulf %378, %362 : vector<8x128xf32>
    %380 = math.tanh %379 : vector<8x128xf32>
    %cst_145 = arith.constant 5.000000e-01 : f32
    %381 = vector.broadcast %cst_145 : f32 to vector<8x128xf32>
    %382 = arith.mulf %381, %380 : vector<8x128xf32>
    %cst_146 = arith.constant 5.000000e-01 : f32
    %383 = vector.broadcast %cst_146 : f32 to vector<8x128xf32>
    %384 = arith.addf %382, %383 : vector<8x128xf32>
    %385 = math.tanh %366 : vector<8x128xf32>
    %cst_147 = arith.constant 5.000000e-01 : f32
    %386 = vector.broadcast %cst_147 : f32 to vector<8x128xf32>
    %387 = arith.mulf %386, %370 : vector<8x128xf32>
    %388 = math.tanh %387 : vector<8x128xf32>
    %cst_148 = arith.constant 5.000000e-01 : f32
    %389 = vector.broadcast %cst_148 : f32 to vector<8x128xf32>
    %390 = arith.mulf %389, %388 : vector<8x128xf32>
    %cst_149 = arith.constant 5.000000e-01 : f32
    %391 = vector.broadcast %cst_149 : f32 to vector<8x128xf32>
    %392 = arith.addf %390, %391 : vector<8x128xf32>
    %393 = arith.mulf %384, %346 : vector<8x128xf32>
    %394 = arith.mulf %377, %385 : vector<8x128xf32>
    %395 = arith.addf %393, %394 : vector<8x128xf32>
    %396 = math.tanh %395 : vector<8x128xf32>
    %397 = arith.mulf %392, %396 : vector<8x128xf32>
    %c7_150 = arith.constant 7 : index
    %c0_151 = arith.constant 0 : index
    %c0_152 = arith.constant 0 : index
    %398 = vector.load %arg6[%c7_150, %c0_151, %c0_152] : memref<8x8x128xf32, #tpu.memory_space<vmem>>, vector<1x8x128xf32>
    %399 = vector.shape_cast %398 : vector<1x8x128xf32> to vector<8x128xf32>
    %400 = vector.shape_cast %397 : vector<8x128xf32> to vector<1x8x128xf32>
    tpu.vector_store %arg6[%c7_150, %c0_151, %c0_152], %400 {strides = array<i32>} : memref<8x8x128xf32, #tpu.memory_space<vmem>>, vector<1x8x128xf32>,
    %c0_153 = arith.constant 0 : index
    %c0_154 = arith.constant 0 : index
    %401 = vector.load %arg9[%c0_153, %c0_154] : memref<8x128xf32, #tpu.memory_space<vmem>>, vector<8x128xf32>
    tpu.vector_store %arg9[%c0_153, %c0_154], %397 {strides = array<i32>} : memref<8x128xf32, #tpu.memory_space<vmem>>, vector<8x128xf32>,
    %c0_155 = arith.constant 0 : index
    %c0_156 = arith.constant 0 : index
    %402 = vector.load %arg10[%c0_155, %c0_156] : memref<8x128xf32, #tpu.memory_space<vmem>>, vector<8x128xf32>
    tpu.vector_store %arg10[%c0_155, %c0_156], %395 {strides = array<i32>} : memref<8x128xf32, #tpu.memory_space<vmem>>, vector<8x128xf32>,
    %c0_i32_157 = arith.constant 0 : i32
    %403 = arith.cmpi eq, %arg1, %c0_i32_157 : i32
    %404 = arith.extui %403 : i1 to i32
    %c0_i32_158 = arith.constant 0 : i32
    %405 = arith.cmpi ne, %404, %c0_i32_158 : i32
    scf.if %405 {
      %c0_159 = arith.constant 0 : index
      %c0_160 = arith.constant 0 : index
      %406 = vector.load %arg7[%c0_159, %c0_160] : memref<8x128xf32, #tpu.memory_space<vmem>>, vector<8x128xf32>
      tpu.vector_store %arg7[%c0_159, %c0_160], %397 {strides = array<i32>} : memref<8x128xf32, #tpu.memory_space<vmem>>, vector<8x128xf32>,
      %c0_161 = arith.constant 0 : index
      %c0_162 = arith.constant 0 : index
      %407 = vector.load %arg8[%c0_161, %c0_162] : memref<8x128xf32, #tpu.memory_space<vmem>>, vector<8x128xf32>
      tpu.vector_store %arg8[%c0_161, %c0_162], %395 {strides = array<i32>} : memref<8x128xf32, #tpu.memory_space<vmem>>, vector<8x128xf32>,
    } else {
    }
    return
  }
  func.func @transform_0(%arg0: i32, %arg1: i32) -> (i32, i32, i32) {
    %c0_i32 = arith.constant 0 : i32
    %c0_i32_0 = arith.constant 0 : i32
    return %arg1, %arg0, %c0_i32 : i32, i32, i32
  }
  func.func @transform_1(%arg0: i32, %arg1: i32) -> (i32, i32) {
    %c0_i32 = arith.constant 0 : i32
    %c0_i32_0 = arith.constant 0 : i32
    return %arg0, %c0_i32 : i32, i32
  }
  func.func @transform_2(%arg0: i32, %arg1: i32) -> (i32, i32) {
    %c0_i32 = arith.constant 0 : i32
    %c0_i32_0 = arith.constant 0 : i32
    return %arg0, %c0_i32 : i32, i32
  }
  func.func @transform_3(%arg0: i32, %arg1: i32) -> (i32, i32) {
    %c0_i32 = arith.constant 0 : i32
    %c0_i32_0 = arith.constant 0 : i32
    %c0_i32_1 = arith.constant 0 : i32
    return %c0_i32, %c0_i32_0 : i32, i32
  }
  func.func @transform_4(%arg0: i32, %arg1: i32) -> (i32, i32, i32) {
    %c0_i32 = arith.constant 0 : i32
    %c0_i32_0 = arith.constant 0 : i32
    return %arg1, %arg0, %c0_i32 : i32, i32, i32
  }
  func.func @transform_5(%arg0: i32, %arg1: i32) -> (i32, i32) {
    %c0_i32 = arith.constant 0 : i32
    %c0_i32_0 = arith.constant 0 : i32
    return %arg0, %c0_i32 : i32, i32
  }
  func.func @transform_6(%arg0: i32, %arg1: i32) -> (i32, i32) {
    %c0_i32 = arith.constant 0 : i32
    %c0_i32_0 = arith.constant 0 : i32
    return %arg0, %c0_i32 : i32, i32
  }
}

module attributes {stable_mosaic.version = 11 : i64} {
  func.func @_input_proj_kernel(%arg0: i32, %arg1: i32, %arg2: memref<64x16xbf16, #tpu.memory_space<vmem>>, %arg3: memref<16x512xbf16, #tpu.memory_space<vmem>>, %arg4: memref<1x512xf32, #tpu.memory_space<vmem>>, %arg5: memref<64x512xbf16, #tpu.memory_space<vmem>>) attributes {dimension_semantics = [#tpu.dimension_semantics<parallel>, #tpu.dimension_semantics<parallel>], iteration_bounds = array<i64: 1, 1>, scalar_prefetch = 0 : i64, scratch_operands = 0 : i64, tpu.core_type = #tpu.core_type<tc>, window_params = [{transform_indices = @transform_0, window_bounds = array<i64: 64, 16>}, {transform_indices = @transform_1, window_bounds = array<i64: 16, 512>}, {transform_indices = @transform_2, window_bounds = array<i64: 1, 512>}, {transform_indices = @transform_3, window_bounds = array<i64: 64, 512>}]} {
    %c0 = arith.constant 0 : index
    %c0_0 = arith.constant 0 : index
    %0 = vector.load %arg2[%c0, %c0_0] : memref<64x16xbf16, #tpu.memory_space<vmem>>, vector<64x16xbf16>
    %c0_1 = arith.constant 0 : index
    %c0_2 = arith.constant 0 : index
    %1 = vector.load %arg3[%c0_1, %c0_2] : memref<16x512xbf16, #tpu.memory_space<vmem>>, vector<16x512xbf16>
    %cst = arith.constant dense<0.000000e+00> : vector<64x512xf32>
    %2 = tpu.matmul %0, %1, %cst {dimension_numbers = #tpu.dot_dimension_numbers<[1], [0], [0], [1], [0, 0, 1, 1], [], []>} : vector<64x16xbf16>, vector<16x512xbf16>, vector<64x512xf32> -> vector<64x512xf32>
    %c0_3 = arith.constant 0 : index
    %c0_4 = arith.constant 0 : index
    %3 = vector.load %arg4[%c0_3, %c0_4] : memref<1x512xf32, #tpu.memory_space<vmem>>, vector<1x512xf32>
    %4 = vector.broadcast %3 : vector<1x512xf32> to vector<64x512xf32>
    %5 = arith.addf %2, %4 : vector<64x512xf32>
    %6 = arith.truncf %5 : vector<64x512xf32> to vector<64x512xbf16>
    %c0_5 = arith.constant 0 : index
    %c0_6 = arith.constant 0 : index
    %7 = vector.load %arg5[%c0_5, %c0_6] : memref<64x512xbf16, #tpu.memory_space<vmem>>, vector<64x512xbf16>
    tpu.vector_store %arg5[%c0_5, %c0_6], %6 {strides = array<i32>} : memref<64x512xbf16, #tpu.memory_space<vmem>>, vector<64x512xbf16>,
    return
  }
  func.func @transform_0(%arg0: i32, %arg1: i32) -> (i32, i32) {
    %c0_i32 = arith.constant 0 : i32
    %c0_i32_0 = arith.constant 0 : i32
    return %arg0, %c0_i32 : i32, i32
  }
  func.func @transform_1(%arg0: i32, %arg1: i32) -> (i32, i32) {
    %c0_i32 = arith.constant 0 : i32
    %c0_i32_0 = arith.constant 0 : i32
    return %c0_i32, %arg1 : i32, i32
  }
  func.func @transform_2(%arg0: i32, %arg1: i32) -> (i32, i32) {
    %c0_i32 = arith.constant 0 : i32
    %c0_i32_0 = arith.constant 0 : i32
    return %c0_i32, %arg1 : i32, i32
  }
  func.func @transform_3(%arg0: i32, %arg1: i32) -> (i32, i32) {
    %c0_i32 = arith.constant 0 : i32
    return %arg0, %arg1 : i32, i32
  }
}

</mosaic_0001>

<bundles_post_ra>
// kernel: lstm_layer_pallas.2
= control target key start
LH: loop header
LB: loop body
LE: loop exit
PB: predicated region body
PF: predicated region fallthrough
CT: control target
= control target key end

     0   :  { %8 = vsyncpa [#allocation3], 0  ;;  %s461_s12 = smov [#allocation2]   ;;  %s615_s0 = inlined_call_operand.vmem [shape: bf16[64,16], index: 0, kind: input, shape index: {}]   ;;  %s616_s1 = inlined_call_operand.vmem [shape: bf16[16,512], index: 1, kind: input, shape index: {}]   ;;  %s617_s2 = inlined_call_operand.hbm [shape: f32[1,512], index: 2, kind: input, shape index: {}]   ;;  %s618_s3 = inlined_call_operand.vmem [shape: bf16[64,512], index: 3, kind: output, shape index: {}]  }
   0x1   :  { %s19_s13 = sshll.u32 %s461_s12, 4  ;;  %s437_s16 = scalar_lea.hbm %s617_s2, 64  ;;  %s20_s13 = int_to_ptr.vmem [resolvable:$true] %s19_s13 }
   0x2   :  { %p438_p0 = scmp.ne.s32.totalorder %s617_s2, %s437_s16  ;;  %p441_p1 = scmp.lt.u32.totalorder %s437_s16, %s617_s2 }
   0x4   :  { %p443_p2 = pnand %p441_p1, %p438_p0 }
   0x6   :  { %446 = shalt.err (!%p443_p2)
}
   0x7   :  { %s447_s21 = scalar_lea.vmem %s20_s13, 64  ;;  %p452_p4 = scmp.lt.s32.totalorder %s20_s13, %s20_s13 }
   0x8   :  { %p448_p3 = scmp.ne.s32.totalorder %s20_s13, %s447_s21  ;;  %p453_p5 = scmp.lt.s32.totalorder %s447_s21, %s447_s21 }
   0xa   :  { %p454_p6 = por %p453_p5, %p452_p4 }
   0xc   :  { %p455_p7 = pnand %p454_p6, %p448_p3 }
   0xe   :  { %458 = shalt.err (!%p455_p7)
}
   0xf   :  { %22 = dma.hbm_to_vmem [thread:$0]  %s617_s2, 64, %s20_s13, [#allocation3]  }
  0x10   :  { %459 = dma.done.wait [#allocation3], 64  }
  0x11   :  { %460 = vsyncadd [#allocation3], 4294967232  ;;  %v462_v0 = vmov 0   ;;  %v427_v1 = vld [vmem:[%s616_s1 + $0x4] ss:$16 sps:$4 sm:$0xff]   ;;  %vm101_vm0 = vcmask 130048   ;;  %v41_v9 = vlaneseq }
  0x12   :  { %146 = vmatprep.mubr.bf16.mxu0 %v462_v0  ;;  %219 = vmatprep.mubr.bf16.mxu1 %v462_v0  ;;  %v429_v2 = vld [vmem:[%s616_s1 + $0xc] ss:$16 sps:$4 sm:$0xff]   ;;  %v431_v3 = vld [vmem:[%s616_s1] ss:$16 sps:$4 sm:$0xff]   ;;  %v432_v4 = vld [vmem:[%s616_s1 + $0x8] ss:$16 sps:$4 sm:$0xff]  }
  0x13   :  { %114 = vmatprep.subr.bf16.mxu0 %v427_v1  ;;  %187 = vmatprep.subr.bf16.mxu1 %v429_v2  ;;  %v433_v5 = vld [vmem:[%s615_s0] sm:$0xff]   ;;  %v434_v6 = vld [vmem:[%s615_s0 + $0x8] sm:$0xff]   ;;  %v435_v7 = vld [vmem:[%s615_s0 + $0x10] sm:$0xff]   ;;  %v42_v10 = vshrl.u32 %v41_v9, 7 }
  0x14   :  { %115 = vmatpush1.bf16.msra.mxu0 %v431_v3  ;;  %188 = vmatpush1.bf16.msra.mxu1 %v432_v4  ;;  %v436_v8 = vld [vmem:[%s615_s0 + $0x18] sm:$0xff]   ;;  %v39_v13 = vld [vmem:[#allocation2] sm:$0xf] }
  0x15   :  { %v43_v11 = vsub.s32 0, %v42_v10  ;;  %v51_v12 = vsub.s32 2, %v42_v10  ;;  %v47_v14 = vsub.s32 1, %v42_v10  ;;  %v55_v15 = vsub.s32 3, %v42_v10 }
  0x17   :  { %385 = vmatmul.mubr.msk.bf16.vlgmr.msra.gmra.mrb[0].mxu0 %vm101_vm0, %v433_v5  ;;  %389 = vmatmul.mubr.msk.bf16.vlgmr.msra.gmra.mrb[0].mxu1 %vm101_vm0, %v433_v5  ;;  %v527_v16 = vrot.slane %v39_v13, %v43_v11  ;;  %v529_v17 = vrot.slane %v39_v13, %v51_v12  ;;  %v531_v18 = vrot.slane %v39_v13, %v47_v14 }
  0x18   :  { %156 = vmatprep.mubr.bf16.mxu0 %v462_v0  ;;  %229 = vmatprep.mubr.bf16.mxu1 %v462_v0  ;;  %v533_v19 = vrot.slane %v39_v13, %v55_v15 }
  0x1f   :  { %386 = vmatmul.mubr.msk.bf16.gmra.mrb[4].mxu0 %vm101_vm0, %v434_v6  ;;  %390 = vmatmul.mubr.msk.bf16.gmra.mrb[4].mxu1 %vm101_vm0, %v434_v6 }
  0x20   :  { %166 = vmatprep.mubr.bf16.mxu0 %v462_v0  ;;  %239 = vmatprep.mubr.bf16.mxu1 %v462_v0 }
  0x27   :  { %387 = vmatmul.mubr.msk.bf16.gmra.mrb[8].mxu0 %vm101_vm0, %v435_v7  ;;  %391 = vmatmul.mubr.msk.bf16.gmra.mrb[8].mxu1 %vm101_vm0, %v435_v7 }
  0x28   :  { %176 = vmatprep.mubr.bf16.mxu0 %v462_v0  ;;  %249 = vmatprep.mubr.bf16.mxu1 %v462_v0 }
  0x2f   :  { %388 = vmatmul.mubr.msk.bf16.gmra.mrb[12].mxu0 %vm101_vm0, %v436_v8  ;;  %392 = vmatmul.mubr.msk.bf16.gmra.mrb[12].mxu1 %vm101_vm0, %v436_v8 }
  0xea   :  { %v148_v20 = vpop.f32.mrb[0].mxu0  ;;  %v221_v21 = vpop.f32.mrb[0].mxu1 }
  0xeb   :  { %v149_v22 = vadd.f32 %v148_v20, %v527_v16  ;;  %v222_v23 = vadd.f32 %v221_v21, %v529_v17  ;;  %v150_v24 = vpop.f32.mrb[1].mxu0  ;;  %v223_v25 = vpop.f32.mrb[1].mxu1 }
  0xec   :  { %v151_v26 = vadd.f32 %v150_v24, %v531_v18  ;;  %v224_v27 = vadd.f32 %v223_v25, %v533_v19  ;;  %v152_v28 = vpop.f32.mrb[2].mxu0  ;;  %v225_v29 = vpop.f32.mrb[2].mxu1 }
  0xed   :  { %v153_v30 = vadd.f32 %v152_v28, %v527_v16  ;;  %v226_v31 = vadd.f32 %v225_v29, %v529_v17  ;;  %v154_v32 = vpop.f32.mrb[3].mxu0  ;;  %v227_v33 = vpop.f32.mrb[3].mxu1 }
  0xee   :  { %v409_v34 = vpack.c.bf16 %v151_v26, %v149_v22  ;;  %v410_v35 = vpack.c.bf16 %v224_v27, %v222_v23  ;;  %v155_v36 = vadd.f32 %v154_v32, %v531_v18  ;;  %v228_v37 = vadd.f32 %v227_v33, %v533_v19 }
  0xf0   :  { %356 = vst [vmem:[%s618_s3] sm:$0xff] %v409_v34  ;;  %357 = vst [vmem:[%s618_s3 + $0x8] sm:$0xff] %v410_v35  ;;  %v411_v38 = vpack.c.bf16 %v155_v36, %v153_v30  ;;  %v412_v39 = vpack.c.bf16 %v228_v37, %v226_v31 }
  0xf2   :  { %358 = vst [vmem:[%s618_s3 + $0x10] sm:$0xff] %v411_v38  ;;  %359 = vst [vmem:[%s618_s3 + $0x18] sm:$0xff] %v412_v39  ;;  %v158_v40 = vpop.f32.mrb[4].mxu0  ;;  %v231_v41 = vpop.f32.mrb[4].mxu1 }
  0xf3   :  { %v159_v42 = vadd.f32 %v158_v40, %v527_v16  ;;  %v232_v43 = vadd.f32 %v231_v41, %v529_v17  ;;  %v160_v44 = vpop.f32.mrb[5].mxu0  ;;  %v233_v45 = vpop.f32.mrb[5].mxu1 }
  0xf4   :  { %v161_v46 = vadd.f32 %v160_v44, %v531_v18  ;;  %v234_v47 = vadd.f32 %v233_v45, %v533_v19  ;;  %v162_v48 = vpop.f32.mrb[6].mxu0  ;;  %v235_v49 = vpop.f32.mrb[6].mxu1 }
  0xf5   :  { %v163_v50 = vadd.f32 %v162_v48, %v527_v16  ;;  %v236_v51 = vadd.f32 %v235_v49, %v529_v17  ;;  %v164_v52 = vpop.f32.mrb[7].mxu0  ;;  %v237_v53 = vpop.f32.mrb[7].mxu1 }
  0xf6   :  { %v413_v54 = vpack.c.bf16 %v161_v46, %v159_v42  ;;  %v414_v55 = vpack.c.bf16 %v234_v47, %v232_v43  ;;  %v165_v56 = vadd.f32 %v164_v52, %v531_v18  ;;  %v238_v57 = vadd.f32 %v237_v53, %v533_v19 }
  0xf8   :  { %360 = vst [vmem:[%s618_s3 + $0x20] sm:$0xff] %v413_v54  ;;  %361 = vst [vmem:[%s618_s3 + $0x28] sm:$0xff] %v414_v55  ;;  %v415_v58 = vpack.c.bf16 %v165_v56, %v163_v50  ;;  %v416_v59 = vpack.c.bf16 %v238_v57, %v236_v51 }
  0xfa   :  { %362 = vst [vmem:[%s618_s3 + $0x30] sm:$0xff] %v415_v58  ;;  %363 = vst [vmem:[%s618_s3 + $0x38] sm:$0xff] %v416_v59  ;;  %v168_v60 = vpop.f32.mrb[8].mxu0  ;;  %v241_v61 = vpop.f32.mrb[8].mxu1 }
  0xfb   :  { %v169_v62 = vadd.f32 %v168_v60, %v527_v16  ;;  %v242_v63 = vadd.f32 %v241_v61, %v529_v17  ;;  %v170_v0 = vpop.f32.mrb[9].mxu0  ;;  %v243_v1 = vpop.f32.mrb[9].mxu1 }
  0xfc   :  { %v171_v2 = vadd.f32 %v170_v0, %v531_v18  ;;  %v244_v3 = vadd.f32 %v243_v1, %v533_v19  ;;  %v172_v4 = vpop.f32.mrb[10].mxu0  ;;  %v245_v5 = vpop.f32.mrb[10].mxu1 }
  0xfd   :  { %v173_v6 = vadd.f32 %v172_v4, %v527_v16  ;;  %v246_v7 = vadd.f32 %v245_v5, %v529_v17  ;;  %v174_v8 = vpop.f32.mrb[11].mxu0  ;;  %v247_v9 = vpop.f32.mrb[11].mxu1 }
  0xfe   :  { %v417_v10 = vpack.c.bf16 %v171_v2, %v169_v62  ;;  %v418_v11 = vpack.c.bf16 %v244_v3, %v242_v63  ;;  %v175_v12 = vadd.f32 %v174_v8, %v531_v18  ;;  %v248_v13 = vadd.f32 %v247_v9, %v533_v19 }
 0x100   :  { %364 = vst [vmem:[%s618_s3 + $0x40] sm:$0xff] %v417_v10  ;;  %365 = vst [vmem:[%s618_s3 + $0x48] sm:$0xff] %v418_v11  ;;  %v419_v14 = vpack.c.bf16 %v175_v12, %v173_v6  ;;  %v420_v15 = vpack.c.bf16 %v248_v13, %v246_v7 }
 0x102   :  { %366 = vst [vmem:[%s618_s3 + $0x50] sm:$0xff] %v419_v14  ;;  %367 = vst [vmem:[%s618_s3 + $0x58] sm:$0xff] %v420_v15  ;;  %v178_v20 = vpop.f32.mrb[12].mxu0  ;;  %v251_v21 = vpop.f32.mrb[12].mxu1 }
 0x103   :  { %v179_v22 = vadd.f32 %v178_v20, %v527_v16  ;;  %v252_v23 = vadd.f32 %v251_v21, %v529_v17  ;;  %v180_v24 = vpop.f32.mrb[13].mxu0  ;;  %v253_v25 = vpop.f32.mrb[13].mxu1 }
 0x104   :  { %v181_v26 = vadd.f32 %v180_v24, %v531_v18  ;;  %v254_v27 = vadd.f32 %v253_v25, %v533_v19  ;;  %v182_v28 = vpop.f32.mrb[14].mxu0  ;;  %v255_v29 = vpop.f32.mrb[14].mxu1 }
 0x105   :  { %v183_v30 = vadd.f32 %v182_v28, %v527_v16  ;;  %v256_v31 = vadd.f32 %v255_v29, %v529_v17  ;;  %v184_v32 = vpop.f32.mrb[15].mxu0  ;;  %v257_v33 = vpop.f32.mrb[15].mxu1 }
 0x106   :  { %v421_v34 = vpack.c.bf16 %v181_v26, %v179_v22  ;;  %v422_v35 = vpack.c.bf16 %v254_v27, %v252_v23  ;;  %v185_v36 = vadd.f32 %v184_v32, %v531_v18  ;;  %v258_v37 = vadd.f32 %v257_v33, %v533_v19 }
 0x108   :  { %368 = vst [vmem:[%s618_s3 + $0x60] sm:$0xff] %v421_v34  ;;  %369 = vst [vmem:[%s618_s3 + $0x68] sm:$0xff] %v422_v35  ;;  %v423_v38 = vpack.c.bf16 %v185_v36, %v183_v30  ;;  %v424_v16 = vpack.c.bf16 %v258_v37, %v256_v31 }
 0x10a   :  { %370 = vst [vmem:[%s618_s3 + $0x70] sm:$0xff] %v423_v38  ;;  %371 = vst [vmem:[%s618_s3 + $0x78] sm:$0xff] %v424_v16 }
 0x10b   :  { %376 = vsyncpa [#allocation3], 1 }

// kernel: lstm_layer_pallas.3
= control target key start
LH: loop header
LB: loop body
LE: loop exit
PB: predicated region body
PF: predicated region fallthrough
CT: control target
= control target key end

     0   :  { %v3048_v0 = vmov 0.0   ;;  %vm3049_vm0 = vmmov 0   ;;  %s4084_s0 = inlined_call_operand.vmem [shape: bf16[8,8,512], index: 0, kind: input, shape index: {}]   ;;  %s4085_s1 = inlined_call_operand.vmem [shape: f32[8,128], index: 1, kind: input, shape index: {}]   ;;  %s4086_s2 = inlined_call_operand.vmem [shape: f32[8,128], index: 2, kind: input, shape index: {}]   ;;  %s4087_s3 = inlined_call_operand.vmem [shape: bf16[128,512], index: 3, kind: input, shape index: {}]   ;;  %s4088_s4 = inlined_call_operand.hbm [shape: f32[8,8,128], index: 4, kind: output, shape index: {0}]   ;;  %s4089_s5 = inlined_call_operand.vmem [shape: f32[8,128], index: 5, kind: output, shape index: {1}]   ;;  %s4090_s6 = inlined_call_operand.vmem [shape: f32[8,128], index: 6, kind: output, shape index: {2}]  }
   0x1   :  { %2235 = vmatprep.subr.bf16.mxu0 %v3048_v0  ;;  %v3092_v1 = vld [vmem:[%s4087_s3] ss:$16 sps:$4 sm:$0xff]   ;;  %2255 = vmatprep.subr.bf16.mxu1 %v3048_v0  ;;  %v3108_v3 = vld [vmem:[%s4087_s3 + $0x4] ss:$16 sps:$4 sm:$0xff]   ;;  %v3209_v19 = vld [vmem:[%s4087_s3 + $0x8] ss:$16 sps:$4 sm:$0xff]  }
   0x2   :  { %v3098_v2 = vld [vmem:[%s4087_s3 + $0x20] ss:$16 sps:$4 sm:$0xff]   ;;  %2251 = vmatprep.mubr.msk.bf16.mxu0 %vm3049_vm0, %v3048_v0  ;;  %2271 = vmatprep.mubr.msk.bf16.mxu1 %vm3049_vm0, %v3048_v0  ;;  %v3115_v4 = vld [vmem:[%s4087_s3 + $0x24] ss:$16 sps:$4 sm:$0xff]   ;;  %v3216_v20 = vld [vmem:[%s4087_s3 + $0xc] ss:$16 sps:$4 sm:$0xff]  }
   0x3   :  { %2236 = vmatpush3.bf16.msra.mxu0 %v3092_v1  ;;  %2256 = vmatpush3.bf16.msra.mxu1 %v3108_v3  ;;  %v3122_v5 = vld [vmem:[%s4087_s3 + $0x40] ss:$16 sps:$4 sm:$0xff]   ;;  %v3129_v6 = vld [vmem:[%s4087_s3 + $0x44] ss:$16 sps:$4 sm:$0xff]  }
   0x4   :  { %2237 = vmatprep.subr.bf16.mxu0 %v3048_v0  ;;  %2257 = vmatprep.subr.bf16.mxu1 %v3048_v0  ;;  %v3136_v7 = vld [vmem:[%s4087_s3 + $0x60] ss:$16 sps:$4 sm:$0xff]   ;;  %v3143_v8 = vld [vmem:[%s4087_s3 + $0x64] ss:$16 sps:$4 sm:$0xff]  }
   0x5   :  { %v3150_v9 = vld [vmem:[%s4087_s3 + $0x80] ss:$16 sps:$4 sm:$0xff]   ;;  %v3157_v10 = vld [vmem:[%s4087_s3 + $0x84] ss:$16 sps:$4 sm:$0xff]  }
   0x6   :  { %v3164_v11 = vld [vmem:[%s4087_s3 + $0xa0] ss:$16 sps:$4 sm:$0xff]   ;;  %v3171_v12 = vld [vmem:[%s4087_s3 + $0xa4] ss:$16 sps:$4 sm:$0xff]  }
   0x7   :  { %2238 = vmatpush3.bf16.msra.mxu0 %v3098_v2  ;;  %2258 = vmatpush3.bf16.msra.mxu1 %v3115_v4  ;;  %v3178_v13 = vld [vmem:[%s4087_s3 + $0xc0] ss:$16 sps:$4 sm:$0xff]   ;;  %v3185_v14 = vld [vmem:[%s4087_s3 + $0xc4] ss:$16 sps:$4 sm:$0xff]  }
   0x8   :  { %2239 = vmatprep.subr.bf16.mxu0 %v3048_v0  ;;  %2259 = vmatprep.subr.bf16.mxu1 %v3048_v0  ;;  %v3190_v15 = vld [vmem:[%s4087_s3 + $0xe0] ss:$16 sps:$4 sm:$0xff]   ;;  %v3202_v17 = vld [vmem:[%s4087_s3 + $0xe4] ss:$16 sps:$4 sm:$0xff]  }
   0x9   :  { %v26_v16 = vld [vmem:[%s4085_s1] sm:$0xff] }
   0xa   :  { %v98_v18 = vpack.c.bf16 %v26_v16, %v26_v16 }
   0xb   :  { %2240 = vmatpush3.bf16.msra.mxu0 %v3122_v5  ;;  %2260 = vmatpush3.bf16.msra.mxu1 %v3129_v6 }
   0xc   :  { %2241 = vmatprep.subr.bf16.mxu0 %v3048_v0  ;;  %2261 = vmatprep.subr.bf16.mxu1 %v3048_v0 }
   0xf   :  { %2242 = vmatpush3.bf16.msra.mxu0 %v3136_v7  ;;  %2262 = vmatpush3.bf16.msra.mxu1 %v3143_v8 }
  0x10   :  { %2243 = vmatprep.subr.bf16.mxu0 %v3048_v0  ;;  %2263 = vmatprep.subr.bf16.mxu1 %v3048_v0 }
  0x13   :  { %2244 = vmatpush3.bf16.msra.mxu0 %v3150_v9  ;;  %2264 = vmatpush3.bf16.msra.mxu1 %v3157_v10 }
  0x14   :  { %2245 = vmatprep.subr.bf16.mxu0 %v3048_v0  ;;  %2265 = vmatprep.subr.bf16.mxu1 %v3048_v0 }
  0x17   :  { %2246 = vmatpush3.bf16.msra.mxu0 %v3164_v11  ;;  %2266 = vmatpush3.bf16.msra.mxu1 %v3171_v12 }
  0x18   :  { %2247 = vmatprep.subr.bf16.mxu0 %v3048_v0  ;;  %2267 = vmatprep.subr.bf16.mxu1 %v3048_v0 }
  0x1b   :  { %2248 = vmatpush3.bf16.msra.mxu0 %v3178_v13  ;;  %2268 = vmatpush3.bf16.msra.mxu1 %v3185_v14 }
  0x1c   :  { %2249 = vmatprep.subr.bf16.mxu0 %v3048_v0  ;;  %2269 = vmatprep.subr.bf16.mxu1 %v3048_v0 }
  0x1f   :  { %2250 = vmatpush3.bf16.msra.mxu0 %v3190_v15  ;;  %2270 = vmatpush3.bf16.msra.mxu1 %v3202_v17 }
  0x20   :  { %2275 = vmatprep.subr.bf16.mxu0 %v3048_v0 }
  0x21   :  { %12 = vsyncpa [#allocation5], 0  ;;  %2295 = vmatprep.subr.bf16.mxu1 %v3048_v0  ;;  %v3223_v21 = vld [vmem:[%s4087_s3 + $0x28] ss:$16 sps:$4 sm:$0xff]   ;;  %v3232_v22 = vld [vmem:[%s4087_s3 + $0x2c] ss:$16 sps:$4 sm:$0xff]  }
  0x22   :  { %2252 = vmatmul.mubr.bf16.vlgmr.msra.gmra.mrb[0].mxu0 %v98_v18  ;;  %2272 = vmatmul.mubr.bf16.vlgmr.msra.gmra.mrb[0].mxu1 %v98_v18  ;;  %v3241_v23 = vld [vmem:[%s4087_s3 + $0x48] ss:$16 sps:$4 sm:$0xff]   ;;  %v3248_v24 = vld [vmem:[%s4087_s3 + $0x4c] ss:$16 sps:$4 sm:$0xff]   ;;  %v96_v43 = vld [vmem:[%s4084_s0] sm:$0xff]  ;;  %s3050_s8 = smov [#allocation4]  }
  0x23   :  { %2276 = vmatpush3.bf16.msra.mxu0 %v3209_v19  ;;  %2291 = vmatprep.mubr.msk.bf16.mxu0 %vm3049_vm0, %v3048_v0  ;;  %v3255_v25 = vld [vmem:[%s4087_s3 + $0x68] ss:$16 sps:$4 sm:$0xff]   ;;  %v3262_v26 = vld [vmem:[%s4087_s3 + $0x6c] ss:$16 sps:$4 sm:$0xff]   ;;  %v190_v44 = vrot.slane %v96_v43, 4  ;;  %v99_v46 = vunpack.c.l.bf16 %v96_v43  ;;  %s1882_s1 = sshll.u32 %s3050_s8, 4  ;;  %s1883_s1 = int_to_ptr.vmem [resolvable:$true] %s1882_s1 }
  0x24   :  { %2277 = vmatprep.subr.bf16.mxu0 %v3048_v0  ;;  %2296 = vmatpush3.bf16.msra.mxu1 %v3216_v20  ;;  %v3269_v27 = vld [vmem:[%s4087_s3 + $0x88] ss:$16 sps:$4 sm:$0xff]   ;;  %v3276_v28 = vld [vmem:[%s4087_s3 + $0x8c] ss:$16 sps:$4 sm:$0xff]   ;;  %s3024_s11 = scalar_lea.vmem %s1883_s1, 1024  ;;  %p3029_p1 = scmp.lt.s32.totalorder %s1883_s1, %s1883_s1 }
  0x25   :  { %2311 = vmatprep.mubr.msk.bf16.mxu1 %vm3049_vm0, %v3048_v0  ;;  %2297 = vmatprep.subr.bf16.mxu1 %v3048_v0  ;;  %v3283_v29 = vld [vmem:[%s4087_s3 + $0xa8] ss:$16 sps:$4 sm:$0xff]   ;;  %v3290_v30 = vld [vmem:[%s4087_s3 + $0xac] ss:$16 sps:$4 sm:$0xff]   ;;  %v192_v45 = vunpack.c.l.bf16 %v190_v44  ;;  %p3025_p0 = scmp.ne.s32.totalorder %s1883_s1, %s3024_s11  ;;  %p3030_p2 = scmp.lt.s32.totalorder %s3024_s11, %s3024_s11 }
  0x26   :  { %v3297_v31 = vld [vmem:[%s4087_s3 + $0xc8] ss:$16 sps:$4 sm:$0xff]   ;;  %v3304_v32 = vld [vmem:[%s4087_s3 + $0xcc] ss:$16 sps:$4 sm:$0xff]  }
  0x27   :  { %2278 = vmatpush3.bf16.msra.mxu0 %v3223_v21  ;;  %v3311_v33 = vld [vmem:[%s4087_s3 + $0xe8] ss:$16 sps:$4 sm:$0xff]   ;;  %v3318_v34 = vld [vmem:[%s4087_s3 + $0xec] ss:$16 sps:$4 sm:$0xff]   ;;  %p3031_p3 = por %p3030_p2, %p3029_p1 }
  0x28   :  { %2279 = vmatprep.subr.bf16.mxu0 %v3048_v0  ;;  %2298 = vmatpush3.bf16.msra.mxu1 %v3232_v22  ;;  %v97_v51 = vld [vmem:[%s4084_s0 + $0x8] sm:$0xff] }
  0x29   :  { %2299 = vmatprep.subr.bf16.mxu1 %v3048_v0  ;;  %v373_v52 = vrot.slane %v97_v51, 4  ;;  %v282_v53 = vunpack.c.l.bf16 %v97_v51  ;;  %p3032_p4 = pnand %p3031_p3, %p3025_p0 }
  0x2b   :  { %2280 = vmatpush3.bf16.msra.mxu0 %v3241_v23  ;;  %v375_v54 = vunpack.c.l.bf16 %v373_v52 }
  0x2c   :  { %2281 = vmatprep.subr.bf16.mxu0 %v3048_v0  ;;  %2300 = vmatpush3.bf16.msra.mxu1 %v3248_v24 }
  0x2d   :  { %2301 = vmatprep.subr.bf16.mxu1 %v3048_v0 }
  0x2f   :  { %2282 = vmatpush3.bf16.msra.mxu0 %v3255_v25 }
  0x30   :  { %2283 = vmatprep.subr.bf16.mxu0 %v3048_v0  ;;  %2302 = vmatpush3.bf16.msra.mxu1 %v3262_v26 }
  0x31   :  { %2303 = vmatprep.subr.bf16.mxu1 %v3048_v0 }
  0x33   :  { %2284 = vmatpush3.bf16.msra.mxu0 %v3269_v27 }
  0x34   :  { %2285 = vmatprep.subr.bf16.mxu0 %v3048_v0  ;;  %2304 = vmatpush3.bf16.msra.mxu1 %v3276_v28 }
  0x35   :  { %2305 = vmatprep.subr.bf16.mxu1 %v3048_v0 }
  0x37   :  { %2286 = vmatpush3.bf16.msra.mxu0 %v3283_v29 }
  0x38   :  { %2287 = vmatprep.subr.bf16.mxu0 %v3048_v0  ;;  %2306 = vmatpush3.bf16.msra.mxu1 %v3290_v30 }
  0x39   :  { %2307 = vmatprep.subr.bf16.mxu1 %v3048_v0 }
  0x3b   :  { %2288 = vmatpush3.bf16.msra.mxu0 %v3297_v31 }
  0x3c   :  { %2289 = vmatprep.subr.bf16.mxu0 %v3048_v0  ;;  %2308 = vmatpush3.bf16.msra.mxu1 %v3304_v32 }
  0x3d   :  { %2309 = vmatprep.subr.bf16.mxu1 %v3048_v0 }
  0x3f   :  { %2290 = vmatpush3.bf16.msra.mxu0 %v3311_v33 }
  0x40   :  { %2315 = vmatprep.subr.bf16.mxu0 %v3048_v0  ;;  %2310 = vmatpush3.bf16.msra.mxu1 %v3318_v34 }
  0x41   :  { %2335 = vmatprep.subr.bf16.mxu1 %v3048_v0 }
  0x42   :  { %2292 = vmatmul.mubr.bf16.vlgmr.msra.gmra.mrb[4].mxu0 %v98_v18 }
  0x43   :  { %2316 = vmatpush3.bf16.msra.mxu0 %v3092_v1  ;;  %2331 = vmatprep.mubr.msk.bf16.mxu0 %vm3049_vm0, %v3048_v0 }
  0x44   :  { %2312 = vmatmul.mubr.bf16.vlgmr.msra.gmra.mrb[4].mxu1 %v98_v18  ;;  %2317 = vmatprep.subr.bf16.mxu0 %v3048_v0 }
  0x45   :  { %2336 = vmatpush3.bf16.msra.mxu1 %v3108_v3  ;;  %2351 = vmatprep.mubr.msk.bf16.mxu1 %vm3049_vm0, %v3048_v0 }
  0x46   :  { %2337 = vmatprep.subr.bf16.mxu1 %v3048_v0 }
  0x47   :  { %2318 = vmatpush3.bf16.msra.mxu0 %v3098_v2 }
  0x48   :  { %2319 = vmatprep.subr.bf16.mxu0 %v3048_v0 }
  0x49   :  { %2338 = vmatpush3.bf16.msra.mxu1 %v3115_v4 }
  0x4a   :  { %2339 = vmatprep.subr.bf16.mxu1 %v3048_v0 }
  0x4b   :  { %2320 = vmatpush3.bf16.msra.mxu0 %v3122_v5 }
  0x4c   :  { %2321 = vmatprep.subr.bf16.mxu0 %v3048_v0 }
  0x4d   :  { %2340 = vmatpush3.bf16.msra.mxu1 %v3129_v6 }
  0x4e   :  { %2341 = vmatprep.subr.bf16.mxu1 %v3048_v0 }
  0x4f   :  { %2322 = vmatpush3.bf16.msra.mxu0 %v3136_v7 }
  0x50   :  { %2323 = vmatprep.subr.bf16.mxu0 %v3048_v0 }
  0x51   :  { %2342 = vmatpush3.bf16.msra.mxu1 %v3143_v8 }
  0x52   :  { %2343 = vmatprep.subr.bf16.mxu1 %v3048_v0 }
  0x53   :  { %2324 = vmatpush3.bf16.msra.mxu0 %v3150_v9 }
  0x54   :  { %2325 = vmatprep.subr.bf16.mxu0 %v3048_v0 }
  0x55   :  { %2344 = vmatpush3.bf16.msra.mxu1 %v3157_v10 }
  0x56   :  { %2345 = vmatprep.subr.bf16.mxu1 %v3048_v0 }
  0x57   :  { %2326 = vmatpush3.bf16.msra.mxu0 %v3164_v11 }
  0x58   :  { %2327 = vmatprep.subr.bf16.mxu0 %v3048_v0 }
  0x59   :  { %2346 = vmatpush3.bf16.msra.mxu1 %v3171_v12 }
  0x5a   :  { %2347 = vmatprep.subr.bf16.mxu1 %v3048_v0 }
  0x5b   :  { %2328 = vmatpush3.bf16.msra.mxu0 %v3178_v13 }
  0x5c   :  { %2329 = vmatprep.subr.bf16.mxu0 %v3048_v0 }
  0x5d   :  { %2348 = vmatpush3.bf16.msra.mxu1 %v3185_v14 }
  0x5e   :  { %2349 = vmatprep.subr.bf16.mxu1 %v3048_v0 }
  0x5f   :  { %2330 = vmatpush3.bf16.msra.mxu0 %v3190_v15 }
  0x60   :  { %2355 = vmatprep.subr.bf16.mxu0 %v3048_v0 }
  0x61   :  { %2350 = vmatpush3.bf16.msra.mxu1 %v3202_v17 }
  0x62   :  { %2375 = vmatprep.subr.bf16.mxu1 %v3048_v0 }
  0xf5   :  { %v182_v35 = vpop.f32.mrb[0].mxu0  ;;  %v275_v38 = vpop.f32.mrb[0].mxu1 }
  0xf6   :  { %v2253_v36 = vpop.f32.mrb[1].mxu0  ;;  %v2273_v40 = vpop.f32.mrb[1].mxu1  ;;  %v281_v47 = vadd.f32 %v275_v38, %v192_v45  ;;  %v188_v48 = vadd.f32 %v182_v35, %v99_v46 }
  0xf7   :  { %v185_v37 = vpop.f32.mrb[2].mxu0  ;;  %v278_v41 = vpop.f32.mrb[2].mxu1  ;;  %v28_v40 = vld [vmem:[%s4086_s2] sm:$0xff] }
  0xf8   :  { %v2254_v39 = vpop.f32.mrb[3].mxu0  ;;  %v2274_v42 = vpop.f32.mrb[3].mxu1  ;;  %v469_v49 = vmul.f32 0.5, %v281_v47  ;;  %v465_v50 = vmul.f32 0.5, %v188_v48 }
  0xfa   :  { %2912 = vtanh.f32 %v469_v49 }
  0xfb   :  { %2914 = vtanh.f32 %v465_v50 }
 0x104   :  { %v2913_v60 = vpop.eup %2912 }
 0x105   :  { %v2915_v18 = vpop.eup %2914  ;;  %v471_v37 = vmul.f32 0.5, %v2913_v60  ;;  %v1933_v60 = vld [vmem:[%s4084_s0 + $0x10] sm:$0xff] }
 0x106   :  { %v467_v38 = vmul.f32 0.5, %v2915_v18 }
 0x107   :  { %v472_v39 = vadd.f32 0.5, %v471_v37  ;;  %v1934_v37 = vld [vmem:[%s4084_s0 + $0x18] sm:$0xff] }
 0x108   :  { %v468_v41 = vadd.f32 0.5, %v467_v38  ;;  %v618_v38 = vrot.slane %v1934_v37, 4 }
 0x109   :  { %v478_v43 = vmul.f32 %v472_v39, %v28_v40  ;;  %v575_v39 = vunpack.c.l.bf16 %v1934_v37 }
 0x10a   :  { %v620_v40 = vunpack.c.l.bf16 %v618_v38 }
 0x115   :  { %v365_v55 = vpop.f32.mrb[4].mxu0 }
 0x116   :  { %v371_v56 = vadd.f32 %v365_v55, %v282_v53  ;;  %v2293_v57 = vpop.f32.mrb[5].mxu0 }
 0x117   :  { %v368_v58 = vpop.f32.mrb[6].mxu0  ;;  %v458_v59 = vpop.f32.mrb[4].mxu1 }
 0x118   :  { %2916 = vtanh.f32 %v371_v56  ;;  %v2294_v61 = vpop.f32.mrb[7].mxu0  ;;  %v464_v62 = vadd.f32 %v458_v59, %v375_v54  ;;  %v2313_v63 = vpop.f32.mrb[5].mxu1 }
 0x119   :  { %v461_v16 = vpop.f32.mrb[6].mxu1  ;;  %v531_v61 = vrot.slane %v1933_v60, 4  ;;  %v488_v63 = vunpack.c.l.bf16 %v1933_v60 }
 0x11a   :  { %v474_v35 = vmul.f32 0.5, %v464_v62  ;;  %v2314_v36 = vpop.f32.mrb[7].mxu1 }
 0x11b   :  { %v533_v62 = vunpack.c.l.bf16 %v531_v61 }
 0x11c   :  { %2918 = vtanh.f32 %v474_v35 }
 0x122   :  { %v2917_v42 = vpop.eup %2916 }
 0x123   :  { %v479_v44 = vmul.f32 %v2917_v42, %v468_v41 }
 0x125   :  { %v3370_v45 = vadd.f32 %v479_v44, %v478_v43 }
 0x126   :  { %v2919_v46 = vpop.eup %2918 }
 0x127   :  { %2920 = vtanh.f32 %v3370_v45  ;;  %v476_v47 = vmul.f32 0.5, %v2919_v46 }
 0x129   :  { %v477_v48 = vadd.f32 0.5, %v476_v47 }
 0x131   :  { %v2921_v49 = vpop.eup %2920 }
 0x132   :  { %v482_v50 = vmul.f32 %v2921_v49, %v477_v48 }
 0x134   :  { %483 = vst [vmem:[#allocation4] sm:$0xff] %v482_v50  ;;  %v487_v51 = vpack.c.bf16 %v482_v50, %v482_v50 }
 0x136   :  { %2332 = vmatmul.mubr.bf16.vlgmr.msra.gmra.mrb[8].mxu0 %v487_v51  ;;  %2352 = vmatmul.mubr.bf16.vlgmr.msra.gmra.mrb[8].mxu1 %v487_v51 }
 0x137   :  { %2356 = vmatpush3.bf16.msra.mxu0 %v3209_v19  ;;  %2376 = vmatpush3.bf16.msra.mxu1 %v3216_v20 }
 0x138   :  { %2357 = vmatprep.subr.bf16.mxu0 %v3048_v0  ;;  %2377 = vmatprep.subr.bf16.mxu1 %v3048_v0 }
 0x139   :  { %2371 = vmatprep.mubr.msk.bf16.mxu0 %vm3049_vm0, %v3048_v0  ;;  %2391 = vmatprep.mubr.msk.bf16.mxu1 %vm3049_vm0, %v3048_v0 }
 0x13b   :  { %2358 = vmatpush3.bf16.msra.mxu0 %v3223_v21  ;;  %2378 = vmatpush3.bf16.msra.mxu1 %v3232_v22 }
 0x13c   :  { %2359 = vmatprep.subr.bf16.mxu0 %v3048_v0  ;;  %2379 = vmatprep.subr.bf16.mxu1 %v3048_v0 }
 0x13f   :  { %2360 = vmatpush3.bf16.msra.mxu0 %v3241_v23  ;;  %2380 = vmatpush3.bf16.msra.mxu1 %v3248_v24 }
 0x140   :  { %2361 = vmatprep.subr.bf16.mxu0 %v3048_v0  ;;  %2381 = vmatprep.subr.bf16.mxu1 %v3048_v0 }
 0x143   :  { %2362 = vmatpush3.bf16.msra.mxu0 %v3255_v25  ;;  %2382 = vmatpush3.bf16.msra.mxu1 %v3262_v26 }
 0x144   :  { %2363 = vmatprep.subr.bf16.mxu0 %v3048_v0  ;;  %2383 = vmatprep.subr.bf16.mxu1 %v3048_v0 }
 0x147   :  { %2364 = vmatpush3.bf16.msra.mxu0 %v3269_v27  ;;  %2384 = vmatpush3.bf16.msra.mxu1 %v3276_v28 }
 0x148   :  { %2365 = vmatprep.subr.bf16.mxu0 %v3048_v0  ;;  %2385 = vmatprep.subr.bf16.mxu1 %v3048_v0 }
 0x14b   :  { %2366 = vmatpush3.bf16.msra.mxu0 %v3283_v29  ;;  %2386 = vmatpush3.bf16.msra.mxu1 %v3290_v30 }
 0x14c   :  { %2367 = vmatprep.subr.bf16.mxu0 %v3048_v0  ;;  %2387 = vmatprep.subr.bf16.mxu1 %v3048_v0 }
 0x14f   :  { %2368 = vmatpush3.bf16.msra.mxu0 %v3297_v31  ;;  %2388 = vmatpush3.bf16.msra.mxu1 %v3304_v32 }
 0x150   :  { %2369 = vmatprep.subr.bf16.mxu0 %v3048_v0  ;;  %2389 = vmatprep.subr.bf16.mxu1 %v3048_v0 }
 0x153   :  { %2370 = vmatpush3.bf16.msra.mxu0 %v3311_v33  ;;  %2390 = vmatpush3.bf16.msra.mxu1 %v3318_v34 }
 0x154   :  { %2395 = vmatprep.subr.bf16.mxu0 %v3048_v0  ;;  %2415 = vmatprep.subr.bf16.mxu1 %v3048_v0 }
 0x156   :  { %2372 = vmatmul.mubr.bf16.vlgmr.msra.gmra.mrb[12].mxu0 %v487_v51  ;;  %2392 = vmatmul.mubr.bf16.vlgmr.msra.gmra.mrb[12].mxu1 %v487_v51 }
 0x157   :  { %2396 = vmatpush3.bf16.msra.mxu0 %v3092_v1  ;;  %2416 = vmatpush3.bf16.msra.mxu1 %v3108_v3 }
 0x158   :  { %2397 = vmatprep.subr.bf16.mxu0 %v3048_v0  ;;  %2417 = vmatprep.subr.bf16.mxu1 %v3048_v0 }
 0x159   :  { %2411 = vmatprep.mubr.msk.bf16.mxu0 %vm3049_vm0, %v3048_v0  ;;  %2431 = vmatprep.mubr.msk.bf16.mxu1 %vm3049_vm0, %v3048_v0 }
 0x15b   :  { %2398 = vmatpush3.bf16.msra.mxu0 %v3098_v2  ;;  %2418 = vmatpush3.bf16.msra.mxu1 %v3115_v4 }
 0x15c   :  { %2399 = vmatprep.subr.bf16.mxu0 %v3048_v0  ;;  %2419 = vmatprep.subr.bf16.mxu1 %v3048_v0 }
 0x15f   :  { %2400 = vmatpush3.bf16.msra.mxu0 %v3122_v5  ;;  %2420 = vmatpush3.bf16.msra.mxu1 %v3129_v6 }
 0x160   :  { %2401 = vmatprep.subr.bf16.mxu0 %v3048_v0  ;;  %2421 = vmatprep.subr.bf16.mxu1 %v3048_v0 }
 0x163   :  { %2402 = vmatpush3.bf16.msra.mxu0 %v3136_v7  ;;  %2422 = vmatpush3.bf16.msra.mxu1 %v3143_v8 }
 0x164   :  { %2403 = vmatprep.subr.bf16.mxu0 %v3048_v0  ;;  %2423 = vmatprep.subr.bf16.mxu1 %v3048_v0 }
 0x167   :  { %2404 = vmatpush3.bf16.msra.mxu0 %v3150_v9  ;;  %2424 = vmatpush3.bf16.msra.mxu1 %v3157_v10 }
 0x168   :  { %2405 = vmatprep.subr.bf16.mxu0 %v3048_v0  ;;  %2425 = vmatprep.subr.bf16.mxu1 %v3048_v0 }
 0x16b   :  { %2406 = vmatpush3.bf16.msra.mxu0 %v3164_v11  ;;  %2426 = vmatpush3.bf16.msra.mxu1 %v3171_v12 }
 0x16c   :  { %2407 = vmatprep.subr.bf16.mxu0 %v3048_v0  ;;  %2427 = vmatprep.subr.bf16.mxu1 %v3048_v0 }
 0x16f   :  { %2408 = vmatpush3.bf16.msra.mxu0 %v3178_v13  ;;  %2428 = vmatpush3.bf16.msra.mxu1 %v3185_v14 }
 0x170   :  { %2409 = vmatprep.subr.bf16.mxu0 %v3048_v0  ;;  %2429 = vmatprep.subr.bf16.mxu1 %v3048_v0 }
 0x173   :  { %2410 = vmatpush3.bf16.msra.mxu0 %v3190_v15  ;;  %2430 = vmatpush3.bf16.msra.mxu1 %v3202_v17 }
 0x174   :  { %2435 = vmatprep.subr.bf16.mxu0 %v3048_v0  ;;  %2455 = vmatprep.subr.bf16.mxu1 %v3048_v0 }
 0x209   :  { %v523_v52 = vpop.f32.mrb[8].mxu0  ;;  %v568_v53 = vpop.f32.mrb[8].mxu1 }
 0x20a   :  { %v2333_v54 = vpop.f32.mrb[9].mxu0  ;;  %v2353_v55 = vpop.f32.mrb[9].mxu1  ;;  %v574_v16 = vadd.f32 %v568_v53, %v533_v62  ;;  %v529_v18 = vadd.f32 %v523_v52, %v488_v63 }
 0x20b   :  { %v526_v56 = vpop.f32.mrb[10].mxu0  ;;  %v571_v57 = vpop.f32.mrb[10].mxu1 }
 0x20c   :  { %v2334_v58 = vpop.f32.mrb[11].mxu0  ;;  %v2354_v59 = vpop.f32.mrb[11].mxu1  ;;  %v666_v35 = vmul.f32 0.5, %v574_v16  ;;  %v662_v36 = vmul.f32 0.5, %v529_v18 }
 0x20e   :  { %2922 = vtanh.f32 %v666_v35 }
 0x20f   :  { %2924 = vtanh.f32 %v662_v36 }
 0x218   :  { %v2923_v50 = vpop.eup %2922 }
 0x219   :  { %v2925_v53 = vpop.eup %2924  ;;  %v668_v54 = vmul.f32 0.5, %v2923_v50 }
 0x21a   :  { %v664_v56 = vmul.f32 0.5, %v2925_v53 }
 0x21b   :  { %v669_v57 = vadd.f32 0.5, %v668_v54 }
 0x21c   :  { %v665_v58 = vadd.f32 0.5, %v664_v56 }
 0x21d   :  { %v675_v60 = vmul.f32 %v669_v57, %v3370_v45 }
 0x229   :  { %v610_v41 = vpop.f32.mrb[12].mxu0  ;;  %v655_v42 = vpop.f32.mrb[12].mxu1 }
 0x22a   :  { %v616_v43 = vadd.f32 %v610_v41, %v575_v39  ;;  %v2373_v44 = vpop.f32.mrb[13].mxu0  ;;  %v2393_v46 = vpop.f32.mrb[13].mxu1  ;;  %v661_v47 = vadd.f32 %v655_v42, %v620_v40 }
 0x22b   :  { %v613_v48 = vpop.f32.mrb[14].mxu0  ;;  %v658_v49 = vpop.f32.mrb[14].mxu1  ;;  %v1936_v44 = vld [vmem:[%s4084_s0 + $0x28] sm:$0xff] }
 0x22c   :  { %2926 = vtanh.f32 %v616_v43  ;;  %v2374_v51 = vpop.f32.mrb[15].mxu0  ;;  %v2394_v52 = vpop.f32.mrb[15].mxu1  ;;  %v671_v55 = vmul.f32 0.5, %v661_v47  ;;  %v816_v46 = vrot.slane %v1936_v44, 4  ;;  %v773_v47 = vunpack.c.l.bf16 %v1936_v44  ;;  %v1938_v44 = vld [vmem:[%s4084_s0 + $0x38] sm:$0xff] }
 0x22e   :  { %2928 = vtanh.f32 %v671_v55  ;;  %v818_v48 = vunpack.c.l.bf16 %v816_v46  ;;  %v1014_v46 = vrot.slane %v1938_v44, 4 }
 0x236   :  { %v2927_v59 = vpop.eup %2926 }
 0x237   :  { %v676_v61 = vmul.f32 %v2927_v59, %v665_v58 }
 0x238   :  { %v2929_v63 = vpop.eup %2928 }
 0x239   :  { %v3452_v62 = vadd.f32 %v676_v61, %v675_v60  ;;  %v673_v16 = vmul.f32 0.5, %v2929_v63 }
 0x23b   :  { %2930 = vtanh.f32 %v3452_v62  ;;  %v674_v18 = vadd.f32 0.5, %v673_v16 }
 0x245   :  { %v2931_v35 = vpop.eup %2930 }
 0x246   :  { %v679_v36 = vmul.f32 %v2931_v35, %v674_v18 }
 0x248   :  { %681 = vst [vmem:[#allocation4 + $0x8] sm:$0xff] %v679_v36  ;;  %v685_v37 = vpack.c.bf16 %v679_v36, %v679_v36 }
 0x24a   :  { %2412 = vmatmul.mubr.bf16.vlgmr.msra.gmra.mrb[16].mxu0 %v685_v37  ;;  %2432 = vmatmul.mubr.bf16.vlgmr.msra.gmra.mrb[16].mxu1 %v685_v37 }
 0x24b   :  { %2436 = vmatpush3.bf16.msra.mxu0 %v3209_v19  ;;  %2456 = vmatpush3.bf16.msra.mxu1 %v3216_v20 }
 0x24c   :  { %2437 = vmatprep.subr.bf16.mxu0 %v3048_v0  ;;  %2457 = vmatprep.subr.bf16.mxu1 %v3048_v0 }
 0x24d   :  { %2451 = vmatprep.mubr.msk.bf16.mxu0 %vm3049_vm0, %v3048_v0  ;;  %2471 = vmatprep.mubr.msk.bf16.mxu1 %vm3049_vm0, %v3048_v0 }
 0x24f   :  { %2438 = vmatpush3.bf16.msra.mxu0 %v3223_v21  ;;  %2458 = vmatpush3.bf16.msra.mxu1 %v3232_v22 }
 0x250   :  { %2439 = vmatprep.subr.bf16.mxu0 %v3048_v0  ;;  %2459 = vmatprep.subr.bf16.mxu1 %v3048_v0 }
 0x253   :  { %2440 = vmatpush3.bf16.msra.mxu0 %v3241_v23  ;;  %2460 = vmatpush3.bf16.msra.mxu1 %v3248_v24 }
 0x254   :  { %2441 = vmatprep.subr.bf16.mxu0 %v3048_v0  ;;  %2461 = vmatprep.subr.bf16.mxu1 %v3048_v0 }
 0x257   :  { %2442 = vmatpush3.bf16.msra.mxu0 %v3255_v25  ;;  %2462 = vmatpush3.bf16.msra.mxu1 %v3262_v26 }
 0x258   :  { %2443 = vmatprep.subr.bf16.mxu0 %v3048_v0  ;;  %2463 = vmatprep.subr.bf16.mxu1 %v3048_v0 }
 0x25b   :  { %2444 = vmatpush3.bf16.msra.mxu0 %v3269_v27  ;;  %2464 = vmatpush3.bf16.msra.mxu1 %v3276_v28 }
 0x25c   :  { %2445 = vmatprep.subr.bf16.mxu0 %v3048_v0  ;;  %2465 = vmatprep.subr.bf16.mxu1 %v3048_v0 }
 0x25f   :  { %2446 = vmatpush3.bf16.msra.mxu0 %v3283_v29  ;;  %2466 = vmatpush3.bf16.msra.mxu1 %v3290_v30 }
 0x260   :  { %2447 = vmatprep.subr.bf16.mxu0 %v3048_v0  ;;  %2467 = vmatprep.subr.bf16.mxu1 %v3048_v0 }
 0x263   :  { %2448 = vmatpush3.bf16.msra.mxu0 %v3297_v31  ;;  %2468 = vmatpush3.bf16.msra.mxu1 %v3304_v32 }
 0x264   :  { %2449 = vmatprep.subr.bf16.mxu0 %v3048_v0  ;;  %2469 = vmatprep.subr.bf16.mxu1 %v3048_v0 }
 0x267   :  { %2450 = vmatpush3.bf16.msra.mxu0 %v3311_v33  ;;  %2470 = vmatpush3.bf16.msra.mxu1 %v3318_v34 }
 0x268   :  { %2475 = vmatprep.subr.bf16.mxu0 %v3048_v0  ;;  %2495 = vmatprep.subr.bf16.mxu1 %v3048_v0 }
 0x26a   :  { %2452 = vmatmul.mubr.bf16.vlgmr.msra.gmra.mrb[20].mxu0 %v685_v37  ;;  %2472 = vmatmul.mubr.bf16.vlgmr.msra.gmra.mrb[20].mxu1 %v685_v37 }
 0x26b   :  { %2476 = vmatpush3.bf16.msra.mxu0 %v3092_v1  ;;  %2496 = vmatpush3.bf16.msra.mxu1 %v3108_v3 }
 0x26c   :  { %2477 = vmatprep.subr.bf16.mxu0 %v3048_v0  ;;  %2497 = vmatprep.subr.bf16.mxu1 %v3048_v0 }
 0x26d   :  { %2491 = vmatprep.mubr.msk.bf16.mxu0 %vm3049_vm0, %v3048_v0  ;;  %2511 = vmatprep.mubr.msk.bf16.mxu1 %vm3049_vm0, %v3048_v0 }
 0x26f   :  { %2478 = vmatpush3.bf16.msra.mxu0 %v3098_v2  ;;  %2498 = vmatpush3.bf16.msra.mxu1 %v3115_v4 }
 0x270   :  { %2479 = vmatprep.subr.bf16.mxu0 %v3048_v0  ;;  %2499 = vmatprep.subr.bf16.mxu1 %v3048_v0 }
 0x273   :  { %2480 = vmatpush3.bf16.msra.mxu0 %v3122_v5  ;;  %2500 = vmatpush3.bf16.msra.mxu1 %v3129_v6 }
 0x274   :  { %2481 = vmatprep.subr.bf16.mxu0 %v3048_v0  ;;  %2501 = vmatprep.subr.bf16.mxu1 %v3048_v0 }
 0x277   :  { %2482 = vmatpush3.bf16.msra.mxu0 %v3136_v7  ;;  %2502 = vmatpush3.bf16.msra.mxu1 %v3143_v8 }
 0x278   :  { %2483 = vmatprep.subr.bf16.mxu0 %v3048_v0  ;;  %2503 = vmatprep.subr.bf16.mxu1 %v3048_v0 }
 0x27b   :  { %2484 = vmatpush3.bf16.msra.mxu0 %v3150_v9  ;;  %2504 = vmatpush3.bf16.msra.mxu1 %v3157_v10  ;;  %v1935_v9 = vld [vmem:[%s4084_s0 + $0x20] sm:$0xff] }
 0x27c   :  { %2485 = vmatprep.subr.bf16.mxu0 %v3048_v0  ;;  %2505 = vmatprep.subr.bf16.mxu1 %v3048_v0  ;;  %v729_v45 = vrot.slane %v1935_v9, 4  ;;  %v686_v39 = vunpack.c.l.bf16 %v1935_v9 }
 0x27e   :  { %v731_v38 = vunpack.c.l.bf16 %v729_v45 }
 0x27f   :  { %2486 = vmatpush3.bf16.msra.mxu0 %v3164_v11  ;;  %2506 = vmatpush3.bf16.msra.mxu1 %v3171_v12 }
 0x280   :  { %2487 = vmatprep.subr.bf16.mxu0 %v3048_v0  ;;  %2507 = vmatprep.subr.bf16.mxu1 %v3048_v0 }
 0x283   :  { %2488 = vmatpush3.bf16.msra.mxu0 %v3178_v13  ;;  %2508 = vmatpush3.bf16.msra.mxu1 %v3185_v14 }
 0x284   :  { %2489 = vmatprep.subr.bf16.mxu0 %v3048_v0  ;;  %2509 = vmatprep.subr.bf16.mxu1 %v3048_v0 }
 0x287   :  { %2490 = vmatpush3.bf16.msra.mxu0 %v3190_v15  ;;  %2510 = vmatpush3.bf16.msra.mxu1 %v3202_v17 }
 0x288   :  { %2515 = vmatprep.subr.bf16.mxu0 %v3048_v0  ;;  %2535 = vmatprep.subr.bf16.mxu1 %v3048_v0 }
 0x31d   :  { %v721_v1 = vpop.f32.mrb[16].mxu0  ;;  %v766_v2 = vpop.f32.mrb[16].mxu1 }
 0x31e   :  { %v2413_v3 = vpop.f32.mrb[17].mxu0  ;;  %v2433_v4 = vpop.f32.mrb[17].mxu1  ;;  %v772_v40 = vadd.f32 %v766_v2, %v731_v38  ;;  %v727_v41 = vadd.f32 %v721_v1, %v686_v39  ;;  %v1937_v38 = vld [vmem:[%s4084_s0 + $0x30] sm:$0xff] }
 0x31f   :  { %v724_v5 = vpop.f32.mrb[18].mxu0  ;;  %v769_v6 = vpop.f32.mrb[18].mxu1  ;;  %v927_v39 = vrot.slane %v1937_v38, 4 }
 0x320   :  { %v2414_v7 = vpop.f32.mrb[19].mxu0  ;;  %v2434_v8 = vpop.f32.mrb[19].mxu1  ;;  %v864_v42 = vmul.f32 0.5, %v772_v40  ;;  %v860_v43 = vmul.f32 0.5, %v727_v41  ;;  %v884_v40 = vunpack.c.l.bf16 %v1937_v38  ;;  %v3727_v38 = vld [vmem:[%s4087_s3 + $0x88] ss:$16 sps:$4 sm:$0xff]  }
 0x322   :  { %2932 = vtanh.f32 %v864_v42 }
 0x323   :  { %2934 = vtanh.f32 %v860_v43 }
 0x32c   :  { %v2933_v57 = vpop.eup %2932 }
 0x32d   :  { %v2935_v60 = vpop.eup %2934  ;;  %v866_v61 = vmul.f32 0.5, %v2933_v57 }
 0x32e   :  { %v862_v16 = vmul.f32 0.5, %v2935_v60 }
 0x32f   :  { %v867_v18 = vadd.f32 0.5, %v866_v61 }
 0x330   :  { %v863_v35 = vadd.f32 0.5, %v862_v16 }
 0x331   :  { %v873_v37 = vmul.f32 %v867_v18, %v3452_v62 }
 0x33d   :  { %v808_v49 = vpop.f32.mrb[20].mxu0  ;;  %v853_v50 = vpop.f32.mrb[20].mxu1 }
 0x33e   :  { %v814_v51 = vadd.f32 %v808_v49, %v773_v47  ;;  %v2453_v52 = vpop.f32.mrb[21].mxu0  ;;  %v2473_v53 = vpop.f32.mrb[21].mxu1  ;;  %v859_v54 = vadd.f32 %v853_v50, %v818_v48  ;;  %v971_v47 = vunpack.c.l.bf16 %v1938_v44  ;;  %v1016_v48 = vunpack.c.l.bf16 %v1014_v46  ;;  %v1939_v46 = vld [vmem:[%s4084_s0 + $0x40] sm:$0xff] }
 0x33f   :  { %v811_v55 = vpop.f32.mrb[22].mxu0  ;;  %v856_v56 = vpop.f32.mrb[22].mxu1 }
 0x340   :  { %2936 = vtanh.f32 %v814_v51  ;;  %v2454_v58 = vpop.f32.mrb[23].mxu0  ;;  %v2474_v59 = vpop.f32.mrb[23].mxu1  ;;  %v869_v63 = vmul.f32 0.5, %v859_v54 }
 0x342   :  { %2938 = vtanh.f32 %v869_v63 }
 0x34a   :  { %v2937_v36 = vpop.eup %2936 }
 0x34b   :  { %v874_v1 = vmul.f32 %v2937_v36, %v863_v35 }
 0x34c   :  { %v2939_v3 = vpop.eup %2938 }
 0x34d   :  { %v3534_v2 = vadd.f32 %v874_v1, %v873_v37  ;;  %v871_v4 = vmul.f32 0.5, %v2939_v3 }
 0x34f   :  { %2940 = vtanh.f32 %v3534_v2  ;;  %v872_v5 = vadd.f32 0.5, %v871_v4 }
 0x359   :  { %v2941_v6 = vpop.eup %2940 }
 0x35a   :  { %v877_v7 = vmul.f32 %v2941_v6, %v872_v5 }
 0x35c   :  { %879 = vst [vmem:[#allocation4 + $0x10] sm:$0xff] %v877_v7  ;;  %v883_v8 = vpack.c.bf16 %v877_v7, %v877_v7 }
 0x35e   :  { %2492 = vmatmul.mubr.bf16.vlgmr.msra.gmra.mrb[24].mxu0 %v883_v8  ;;  %2512 = vmatmul.mubr.bf16.vlgmr.msra.gmra.mrb[24].mxu1 %v883_v8 }
 0x35f   :  { %2516 = vmatpush3.bf16.msra.mxu0 %v3209_v19  ;;  %2536 = vmatpush3.bf16.msra.mxu1 %v3216_v20  ;;  %v3576_v19 = vld [vmem:[%s4087_s3] ss:$16 sps:$4 sm:$0xff]   ;;  %v3582_v20 = vld [vmem:[%s4087_s3 + $0x4] ss:$16 sps:$4 sm:$0xff]  }
 0x360   :  { %2517 = vmatprep.subr.bf16.mxu0 %v3048_v0  ;;  %2537 = vmatprep.subr.bf16.mxu1 %v3048_v0 }
 0x361   :  { %2531 = vmatprep.mubr.msk.bf16.mxu0 %vm3049_vm0, %v3048_v0  ;;  %2551 = vmatprep.mubr.msk.bf16.mxu1 %vm3049_vm0, %v3048_v0 }
 0x363   :  { %2518 = vmatpush3.bf16.msra.mxu0 %v3223_v21  ;;  %2538 = vmatpush3.bf16.msra.mxu1 %v3232_v22  ;;  %v3594_v21 = vld [vmem:[%s4087_s3 + $0x20] ss:$16 sps:$4 sm:$0xff]   ;;  %v3600_v22 = vld [vmem:[%s4087_s3 + $0x24] ss:$16 sps:$4 sm:$0xff]  }
 0x364   :  { %2519 = vmatprep.subr.bf16.mxu0 %v3048_v0  ;;  %2539 = vmatprep.subr.bf16.mxu1 %v3048_v0 }
 0x367   :  { %2520 = vmatpush3.bf16.msra.mxu0 %v3241_v23  ;;  %2540 = vmatpush3.bf16.msra.mxu1 %v3248_v24  ;;  %v3608_v23 = vld [vmem:[%s4087_s3 + $0x40] ss:$16 sps:$4 sm:$0xff]   ;;  %v3614_v24 = vld [vmem:[%s4087_s3 + $0x44] ss:$16 sps:$4 sm:$0xff]  }
 0x368   :  { %2521 = vmatprep.subr.bf16.mxu0 %v3048_v0  ;;  %2541 = vmatprep.subr.bf16.mxu1 %v3048_v0 }
 0x36b   :  { %2522 = vmatpush3.bf16.msra.mxu0 %v3255_v25  ;;  %2542 = vmatpush3.bf16.msra.mxu1 %v3262_v26  ;;  %v3622_v25 = vld [vmem:[%s4087_s3 + $0x60] ss:$16 sps:$4 sm:$0xff]   ;;  %v3628_v26 = vld [vmem:[%s4087_s3 + $0x64] ss:$16 sps:$4 sm:$0xff]  }
 0x36c   :  { %2523 = vmatprep.subr.bf16.mxu0 %v3048_v0  ;;  %2543 = vmatprep.subr.bf16.mxu1 %v3048_v0 }
 0x36f   :  { %2524 = vmatpush3.bf16.msra.mxu0 %v3269_v27  ;;  %2544 = vmatpush3.bf16.msra.mxu1 %v3276_v28  ;;  %v3636_v27 = vld [vmem:[%s4087_s3 + $0x80] ss:$16 sps:$4 sm:$0xff]  }
 0x370   :  { %2525 = vmatprep.subr.bf16.mxu0 %v3048_v0  ;;  %2545 = vmatprep.subr.bf16.mxu1 %v3048_v0 }
 0x373   :  { %2526 = vmatpush3.bf16.msra.mxu0 %v3283_v29  ;;  %2546 = vmatpush3.bf16.msra.mxu1 %v3290_v30 }
 0x374   :  { %2527 = vmatprep.subr.bf16.mxu0 %v3048_v0  ;;  %2547 = vmatprep.subr.bf16.mxu1 %v3048_v0 }
 0x377   :  { %2528 = vmatpush3.bf16.msra.mxu0 %v3297_v31  ;;  %2548 = vmatpush3.bf16.msra.mxu1 %v3304_v32 }
 0x378   :  { %2529 = vmatprep.subr.bf16.mxu0 %v3048_v0  ;;  %2549 = vmatprep.subr.bf16.mxu1 %v3048_v0 }
 0x37b   :  { %2530 = vmatpush3.bf16.msra.mxu0 %v3311_v33  ;;  %2550 = vmatpush3.bf16.msra.mxu1 %v3318_v34 }
 0x37c   :  { %2555 = vmatprep.subr.bf16.mxu0 %v3048_v0  ;;  %2575 = vmatprep.subr.bf16.mxu1 %v3048_v0 }
 0x37e   :  { %2532 = vmatmul.mubr.bf16.vlgmr.msra.gmra.mrb[28].mxu0 %v883_v8  ;;  %2552 = vmatmul.mubr.bf16.vlgmr.msra.gmra.mrb[28].mxu1 %v883_v8 }
 0x37f   :  { %2556 = vmatpush3.bf16.msra.mxu0 %v3576_v19  ;;  %2576 = vmatpush3.bf16.msra.mxu1 %v3582_v20 }
 0x380   :  { %2557 = vmatprep.subr.bf16.mxu0 %v3048_v0  ;;  %2577 = vmatprep.subr.bf16.mxu1 %v3048_v0 }
 0x381   :  { %2571 = vmatprep.mubr.msk.bf16.mxu0 %vm3049_vm0, %v3048_v0  ;;  %2591 = vmatprep.mubr.msk.bf16.mxu1 %vm3049_vm0, %v3048_v0 }
 0x383   :  { %2558 = vmatpush3.bf16.msra.mxu0 %v3594_v21  ;;  %2578 = vmatpush3.bf16.msra.mxu1 %v3600_v22 }
 0x384   :  { %2559 = vmatprep.subr.bf16.mxu0 %v3048_v0  ;;  %2579 = vmatprep.subr.bf16.mxu1 %v3048_v0 }
 0x387   :  { %2560 = vmatpush3.bf16.msra.mxu0 %v3608_v23  ;;  %2580 = vmatpush3.bf16.msra.mxu1 %v3614_v24 }
 0x388   :  { %2561 = vmatprep.subr.bf16.mxu0 %v3048_v0  ;;  %2581 = vmatprep.subr.bf16.mxu1 %v3048_v0 }
 0x38b   :  { %2562 = vmatpush3.bf16.msra.mxu0 %v3622_v25  ;;  %2582 = vmatpush3.bf16.msra.mxu1 %v3628_v26 }
 0x38c   :  { %2563 = vmatprep.subr.bf16.mxu0 %v3048_v0  ;;  %2583 = vmatprep.subr.bf16.mxu1 %v3048_v0 }
 0x38f   :  { %2564 = vmatpush3.bf16.msra.mxu0 %v3636_v27  ;;  %2584 = vmatpush3.bf16.msra.mxu1 %v3157_v10 }
 0x390   :  { %2565 = vmatprep.subr.bf16.mxu0 %v3048_v0  ;;  %2585 = vmatprep.subr.bf16.mxu1 %v3048_v0 }
 0x393   :  { %2566 = vmatpush3.bf16.msra.mxu0 %v3164_v11  ;;  %2586 = vmatpush3.bf16.msra.mxu1 %v3171_v12 }
 0x394   :  { %2567 = vmatprep.subr.bf16.mxu0 %v3048_v0  ;;  %2587 = vmatprep.subr.bf16.mxu1 %v3048_v0 }
 0x397   :  { %2568 = vmatpush3.bf16.msra.mxu0 %v3178_v13  ;;  %2588 = vmatpush3.bf16.msra.mxu1 %v3185_v14 }
 0x398   :  { %2569 = vmatprep.subr.bf16.mxu0 %v3048_v0  ;;  %2589 = vmatprep.subr.bf16.mxu1 %v3048_v0 }
 0x39b   :  { %2570 = vmatpush3.bf16.msra.mxu0 %v3190_v15  ;;  %2590 = vmatpush3.bf16.msra.mxu1 %v3202_v17  ;;  %v929_v15 = vunpack.c.l.bf16 %v927_v39 }
 0x39c   :  { %2595 = vmatprep.subr.bf16.mxu0 %v3048_v0  ;;  %2615 = vmatprep.subr.bf16.mxu1 %v3048_v0 }
 0x431   :  { %v919_v10 = vpop.f32.mrb[24].mxu0  ;;  %v964_v11 = vpop.f32.mrb[24].mxu1 }
 0x432   :  { %v2493_v12 = vpop.f32.mrb[25].mxu0  ;;  %v2513_v62 = vpop.f32.mrb[25].mxu1  ;;  %v970_v17 = vadd.f32 %v964_v11, %v929_v15  ;;  %v925_v41 = vadd.f32 %v919_v10, %v884_v40  ;;  %v3667_v11 = vld [vmem:[%s4087_s3 + $0x8] ss:$16 sps:$4 sm:$0xff]  }
 0x433   :  { %v922_v9 = vpop.f32.mrb[26].mxu0  ;;  %v967_v13 = vpop.f32.mrb[26].mxu1  ;;  %v3685_v12 = vld [vmem:[%s4087_s3 + $0x28] ss:$16 sps:$4 sm:$0xff]   ;;  %v3691_v62 = vld [vmem:[%s4087_s3 + $0x2c] ss:$16 sps:$4 sm:$0xff]  }
 0x434   :  { %v2494_v45 = vpop.f32.mrb[27].mxu0  ;;  %v2514_v14 = vpop.f32.mrb[27].mxu1  ;;  %v1062_v42 = vmul.f32 0.5, %v970_v17  ;;  %v1058_v43 = vmul.f32 0.5, %v925_v41  ;;  %v3699_v9 = vld [vmem:[%s4087_s3 + $0x48] ss:$16 sps:$4 sm:$0xff]  }
 0x435   :  { %v3705_v13 = vld [vmem:[%s4087_s3 + $0x4c] ss:$16 sps:$4 sm:$0xff]   ;;  %v3713_v45 = vld [vmem:[%s4087_s3 + $0x68] ss:$16 sps:$4 sm:$0xff]  }
 0x436   :  { %2942 = vtanh.f32 %v1062_v42  ;;  %v3719_v14 = vld [vmem:[%s4087_s3 + $0x6c] ss:$16 sps:$4 sm:$0xff]  }
 0x437   :  { %2944 = vtanh.f32 %v1058_v43 }
 0x440   :  { %v2943_v57 = vpop.eup %2942 }
 0x441   :  { %v2945_v60 = vpop.eup %2944  ;;  %v1064_v61 = vmul.f32 0.5, %v2943_v57 }
 0x442   :  { %v1060_v16 = vmul.f32 0.5, %v2945_v60 }
 0x443   :  { %v1065_v18 = vadd.f32 0.5, %v1064_v61 }
 0x444   :  { %v1061_v35 = vadd.f32 0.5, %v1060_v16 }
 0x445   :  { %v1071_v37 = vmul.f32 %v1065_v18, %v3534_v2  ;;  %v3673_v2 = vld [vmem:[%s4087_s3 + $0xc] ss:$16 sps:$4 sm:$0xff]  }
 0x451   :  { %v1006_v49 = vpop.f32.mrb[28].mxu0  ;;  %v1051_v50 = vpop.f32.mrb[28].mxu1 }
 0x452   :  { %v1012_v51 = vadd.f32 %v1006_v49, %v971_v47  ;;  %v2533_v52 = vpop.f32.mrb[29].mxu0  ;;  %v2553_v53 = vpop.f32.mrb[29].mxu1  ;;  %v1057_v54 = vadd.f32 %v1051_v50, %v1016_v48  ;;  %v1125_v47 = vrot.slane %v1939_v46, 4  ;;  %v1082_v49 = vunpack.c.l.bf16 %v1939_v46 }
 0x453   :  { %v1009_v55 = vpop.f32.mrb[30].mxu0  ;;  %v1054_v56 = vpop.f32.mrb[30].mxu1 }
 0x454   :  { %2946 = vtanh.f32 %v1012_v51  ;;  %v2534_v58 = vpop.f32.mrb[31].mxu0  ;;  %v2554_v59 = vpop.f32.mrb[31].mxu1  ;;  %v1067_v63 = vmul.f32 0.5, %v1057_v54  ;;  %v1127_v48 = vunpack.c.l.bf16 %v1125_v47  ;;  %v1940_v54 = vld [vmem:[%s4084_s0 + $0x48] sm:$0xff] }
 0x455   :  { %v1212_v55 = vrot.slane %v1940_v54, 4  ;;  %v1169_v56 = vunpack.c.l.bf16 %v1940_v54 }
 0x456   :  { %2948 = vtanh.f32 %v1067_v63 }
 0x457   :  { %v1214_v57 = vunpack.c.l.bf16 %v1212_v55 }
 0x45e   :  { %v2947_v36 = vpop.eup %2946 }
 0x45f   :  { %v1072_v1 = vmul.f32 %v2947_v36, %v1061_v35 }
 0x460   :  { %v2949_v4 = vpop.eup %2948 }
 0x461   :  { %v3661_v3 = vadd.f32 %v1072_v1, %v1071_v37  ;;  %v1069_v5 = vmul.f32 0.5, %v2949_v4 }
 0x463   :  { %2950 = vtanh.f32 %v3661_v3  ;;  %v1070_v6 = vadd.f32 0.5, %v1069_v5 }
 0x46d   :  { %v2951_v7 = vpop.eup %2950 }
 0x46e   :  { %v1075_v8 = vmul.f32 %v2951_v7, %v1070_v6 }
 0x470   :  { %1077 = vst [vmem:[#allocation4 + $0x18] sm:$0xff] %v1075_v8  ;;  %v1081_v10 = vpack.c.bf16 %v1075_v8, %v1075_v8 }
 0x472   :  { %2572 = vmatmul.mubr.bf16.vlgmr.msra.gmra.mrb[32].mxu0 %v1081_v10  ;;  %2592 = vmatmul.mubr.bf16.vlgmr.msra.gmra.mrb[32].mxu1 %v1081_v10 }
 0x473   :  { %2596 = vmatpush3.bf16.msra.mxu0 %v3667_v11  ;;  %2616 = vmatpush3.bf16.msra.mxu1 %v3673_v2 }
 0x474   :  { %2597 = vmatprep.subr.bf16.mxu0 %v3048_v0  ;;  %2617 = vmatprep.subr.bf16.mxu1 %v3048_v0 }
 0x475   :  { %2611 = vmatprep.mubr.msk.bf16.mxu0 %vm3049_vm0, %v3048_v0  ;;  %2631 = vmatprep.mubr.msk.bf16.mxu1 %vm3049_vm0, %v3048_v0 }
 0x477   :  { %2598 = vmatpush3.bf16.msra.mxu0 %v3685_v12  ;;  %2618 = vmatpush3.bf16.msra.mxu1 %v3691_v62 }
 0x478   :  { %2599 = vmatprep.subr.bf16.mxu0 %v3048_v0  ;;  %2619 = vmatprep.subr.bf16.mxu1 %v3048_v0 }
 0x47b   :  { %2600 = vmatpush3.bf16.msra.mxu0 %v3699_v9  ;;  %2620 = vmatpush3.bf16.msra.mxu1 %v3705_v13 }
 0x47c   :  { %2601 = vmatprep.subr.bf16.mxu0 %v3048_v0  ;;  %2621 = vmatprep.subr.bf16.mxu1 %v3048_v0 }
 0x47f   :  { %2602 = vmatpush3.bf16.msra.mxu0 %v3713_v45  ;;  %2622 = vmatpush3.bf16.msra.mxu1 %v3719_v14 }
 0x480   :  { %2603 = vmatprep.subr.bf16.mxu0 %v3048_v0  ;;  %2623 = vmatprep.subr.bf16.mxu1 %v3048_v0 }
 0x483   :  { %2604 = vmatpush3.bf16.msra.mxu0 %v3727_v38  ;;  %2624 = vmatpush3.bf16.msra.mxu1 %v3276_v28  ;;  %v3769_v28 = vld [vmem:[%s4087_s3 + $0x84] ss:$16 sps:$4 sm:$0xff]  }
 0x484   :  { %2605 = vmatprep.subr.bf16.mxu0 %v3048_v0  ;;  %2625 = vmatprep.subr.bf16.mxu1 %v3048_v0 }
 0x487   :  { %2606 = vmatpush3.bf16.msra.mxu0 %v3283_v29  ;;  %2626 = vmatpush3.bf16.msra.mxu1 %v3290_v30  ;;  %v3777_v29 = vld [vmem:[%s4087_s3 + $0xa0] ss:$16 sps:$4 sm:$0xff]   ;;  %v3783_v30 = vld [vmem:[%s4087_s3 + $0xa4] ss:$16 sps:$4 sm:$0xff]  }
 0x488   :  { %2607 = vmatprep.subr.bf16.mxu0 %v3048_v0  ;;  %2627 = vmatprep.subr.bf16.mxu1 %v3048_v0 }
 0x48b   :  { %2608 = vmatpush3.bf16.msra.mxu0 %v3297_v31  ;;  %2628 = vmatpush3.bf16.msra.mxu1 %v3304_v32  ;;  %v3791_v31 = vld [vmem:[%s4087_s3 + $0xc0] ss:$16 sps:$4 sm:$0xff]   ;;  %v3797_v32 = vld [vmem:[%s4087_s3 + $0xc4] ss:$16 sps:$4 sm:$0xff]  }
 0x48c   :  { %2609 = vmatprep.subr.bf16.mxu0 %v3048_v0  ;;  %2629 = vmatprep.subr.bf16.mxu1 %v3048_v0 }
 0x48f   :  { %2610 = vmatpush3.bf16.msra.mxu0 %v3311_v33  ;;  %2630 = vmatpush3.bf16.msra.mxu1 %v3318_v34  ;;  %v3805_v33 = vld [vmem:[%s4087_s3 + $0xe0] ss:$16 sps:$4 sm:$0xff]   ;;  %v3811_v34 = vld [vmem:[%s4087_s3 + $0xe4] ss:$16 sps:$4 sm:$0xff]  }
 0x490   :  { %2635 = vmatprep.subr.bf16.mxu0 %v3048_v0  ;;  %2655 = vmatprep.subr.bf16.mxu1 %v3048_v0 }
 0x492   :  { %2612 = vmatmul.mubr.bf16.vlgmr.msra.gmra.mrb[36].mxu0 %v1081_v10  ;;  %2632 = vmatmul.mubr.bf16.vlgmr.msra.gmra.mrb[36].mxu1 %v1081_v10 }
 0x493   :  { %2636 = vmatpush3.bf16.msra.mxu0 %v3576_v19  ;;  %2656 = vmatpush3.bf16.msra.mxu1 %v3582_v20 }
 0x494   :  { %2637 = vmatprep.subr.bf16.mxu0 %v3048_v0  ;;  %2657 = vmatprep.subr.bf16.mxu1 %v3048_v0 }
 0x495   :  { %2651 = vmatprep.mubr.msk.bf16.mxu0 %vm3049_vm0, %v3048_v0  ;;  %2671 = vmatprep.mubr.msk.bf16.mxu1 %vm3049_vm0, %v3048_v0 }
 0x497   :  { %2638 = vmatpush3.bf16.msra.mxu0 %v3594_v21  ;;  %2658 = vmatpush3.bf16.msra.mxu1 %v3600_v22 }
 0x498   :  { %2639 = vmatprep.subr.bf16.mxu0 %v3048_v0  ;;  %2659 = vmatprep.subr.bf16.mxu1 %v3048_v0 }
 0x49b   :  { %2640 = vmatpush3.bf16.msra.mxu0 %v3608_v23  ;;  %2660 = vmatpush3.bf16.msra.mxu1 %v3614_v24 }
 0x49c   :  { %2641 = vmatprep.subr.bf16.mxu0 %v3048_v0  ;;  %2661 = vmatprep.subr.bf16.mxu1 %v3048_v0 }
 0x49f   :  { %2642 = vmatpush3.bf16.msra.mxu0 %v3622_v25  ;;  %2662 = vmatpush3.bf16.msra.mxu1 %v3628_v26 }
 0x4a0   :  { %2643 = vmatprep.subr.bf16.mxu0 %v3048_v0  ;;  %2663 = vmatprep.subr.bf16.mxu1 %v3048_v0 }
 0x4a3   :  { %2644 = vmatpush3.bf16.msra.mxu0 %v3636_v27  ;;  %2664 = vmatpush3.bf16.msra.mxu1 %v3769_v28 }
 0x4a4   :  { %2645 = vmatprep.subr.bf16.mxu0 %v3048_v0  ;;  %2665 = vmatprep.subr.bf16.mxu1 %v3048_v0 }
 0x4a7   :  { %2646 = vmatpush3.bf16.msra.mxu0 %v3777_v29  ;;  %2666 = vmatpush3.bf16.msra.mxu1 %v3783_v30 }
 0x4a8   :  { %2647 = vmatprep.subr.bf16.mxu0 %v3048_v0  ;;  %2667 = vmatprep.subr.bf16.mxu1 %v3048_v0 }
 0x4ab   :  { %2648 = vmatpush3.bf16.msra.mxu0 %v3791_v31  ;;  %2668 = vmatpush3.bf16.msra.mxu1 %v3797_v32 }
 0x4ac   :  { %2649 = vmatprep.subr.bf16.mxu0 %v3048_v0  ;;  %2669 = vmatprep.subr.bf16.mxu1 %v3048_v0 }
 0x4af   :  { %2650 = vmatpush3.bf16.msra.mxu0 %v3805_v33  ;;  %2670 = vmatpush3.bf16.msra.mxu1 %v3811_v34 }
 0x4b0   :  { %2675 = vmatprep.subr.bf16.mxu0 %v3048_v0  ;;  %2695 = vmatprep.subr.bf16.mxu1 %v3048_v0 }
 0x545   :  { %v1117_v39 = vpop.f32.mrb[32].mxu0  ;;  %v1162_v15 = vpop.f32.mrb[32].mxu1 }
 0x546   :  { %v2573_v40 = vpop.f32.mrb[33].mxu0  ;;  %v2593_v17 = vpop.f32.mrb[33].mxu1  ;;  %v1168_v50 = vadd.f32 %v1162_v15, %v1127_v48  ;;  %v1123_v51 = vadd.f32 %v1117_v39, %v1082_v49  ;;  %v3858_v48 = vld [vmem:[%s4087_s3 + $0xa8] ss:$16 sps:$4 sm:$0xff]   ;;  %v3864_v49 = vld [vmem:[%s4087_s3 + $0xac] ss:$16 sps:$4 sm:$0xff]  }
 0x547   :  { %v1120_v41 = vpop.f32.mrb[34].mxu0  ;;  %v1165_v42 = vpop.f32.mrb[34].mxu1 }
 0x548   :  { %v2574_v43 = vpop.f32.mrb[35].mxu0  ;;  %v2594_v44 = vpop.f32.mrb[35].mxu1  ;;  %v1260_v52 = vmul.f32 0.5, %v1168_v50  ;;  %v1256_v53 = vmul.f32 0.5, %v1123_v51  ;;  %v3872_v50 = vld [vmem:[%s4087_s3 + $0xc8] ss:$16 sps:$4 sm:$0xff]  }
 0x549   :  { %v3878_v51 = vld [vmem:[%s4087_s3 + $0xcc] ss:$16 sps:$4 sm:$0xff]  }
 0x54a   :  { %2952 = vtanh.f32 %v1260_v52  ;;  %v3886_v52 = vld [vmem:[%s4087_s3 + $0xe8] ss:$16 sps:$4 sm:$0xff]  }
 0x54b   :  { %2954 = vtanh.f32 %v1256_v53  ;;  %v3892_v53 = vld [vmem:[%s4087_s3 + $0xec] ss:$16 sps:$4 sm:$0xff]  }
 0x554   :  { %v2953_v36 = vpop.eup %2952 }
 0x555   :  { %v2955_v4 = vpop.eup %2954  ;;  %v1262_v5 = vmul.f32 0.5, %v2953_v36 }
 0x556   :  { %v1258_v7 = vmul.f32 0.5, %v2955_v4 }
 0x557   :  { %v1263_v8 = vadd.f32 0.5, %v1262_v5  ;;  %v1942_v5 = vld [vmem:[%s4084_s0 + $0x58] sm:$0xff] }
 0x558   :  { %v1259_v10 = vadd.f32 0.5, %v1258_v7  ;;  %v1367_v7 = vunpack.c.l.bf16 %v1942_v5 }
 0x559   :  { %v1269_v15 = vmul.f32 %v1263_v8, %v3661_v3  ;;  %v3850_v3 = vld [vmem:[%s4087_s3 + $0x8c] ss:$16 sps:$4 sm:$0xff]  }
 0x565   :  { %v1204_v58 = vpop.f32.mrb[36].mxu0  ;;  %v1249_v59 = vpop.f32.mrb[36].mxu1 }
 0x566   :  { %v1210_v60 = vadd.f32 %v1204_v58, %v1169_v56  ;;  %v2613_v61 = vpop.f32.mrb[37].mxu0  ;;  %v2633_v63 = vpop.f32.mrb[37].mxu1  ;;  %v1255_v16 = vadd.f32 %v1249_v59, %v1214_v57 }
 0x567   :  { %v1207_v18 = vpop.f32.mrb[38].mxu0  ;;  %v1252_v35 = vpop.f32.mrb[38].mxu1  ;;  %v1941_v63 = vld [vmem:[%s4084_s0 + $0x50] sm:$0xff] }
 0x568   :  { %2956 = vtanh.f32 %v1210_v60  ;;  %v2614_v37 = vpop.f32.mrb[39].mxu0  ;;  %v2634_v1 = vpop.f32.mrb[39].mxu1  ;;  %v1265_v6 = vmul.f32 0.5, %v1255_v16  ;;  %v1323_v16 = vrot.slane %v1941_v63, 4  ;;  %v1280_v35 = vunpack.c.l.bf16 %v1941_v63 }
 0x56a   :  { %2958 = vtanh.f32 %v1265_v6  ;;  %v1325_v18 = vunpack.c.l.bf16 %v1323_v16  ;;  %v1410_v6 = vrot.slane %v1942_v5, 4 }
 0x56c   :  { %v1412_v8 = vunpack.c.l.bf16 %v1410_v6 }
 0x572   :  { %v2957_v39 = vpop.eup %2956 }
 0x573   :  { %v1270_v40 = vmul.f32 %v2957_v39, %v1259_v10 }
 0x574   :  { %v2959_v41 = vpop.eup %2958 }
 0x575   :  { %v3823_v17 = vadd.f32 %v1270_v40, %v1269_v15  ;;  %v1267_v42 = vmul.f32 0.5, %v2959_v41 }
 0x577   :  { %2960 = vtanh.f32 %v3823_v17  ;;  %v1268_v43 = vadd.f32 0.5, %v1267_v42 }
 0x581   :  { %v2961_v44 = vpop.eup %2960 }
 0x582   :  { %v1273_v46 = vmul.f32 %v2961_v44, %v1268_v43 }
 0x584   :  { %1275 = vst [vmem:[#allocation4 + $0x20] sm:$0xff] %v1273_v46  ;;  %v1279_v47 = vpack.c.bf16 %v1273_v46, %v1273_v46 }
 0x586   :  { %2652 = vmatmul.mubr.bf16.vlgmr.msra.gmra.mrb[40].mxu0 %v1279_v47  ;;  %2672 = vmatmul.mubr.bf16.vlgmr.msra.gmra.mrb[40].mxu1 %v1279_v47 }
 0x587   :  { %2676 = vmatpush3.bf16.msra.mxu0 %v3667_v11  ;;  %2696 = vmatpush3.bf16.msra.mxu1 %v3673_v2 }
 0x588   :  { %2677 = vmatprep.subr.bf16.mxu0 %v3048_v0  ;;  %2697 = vmatprep.subr.bf16.mxu1 %v3048_v0 }
 0x589   :  { %2691 = vmatprep.mubr.msk.bf16.mxu0 %vm3049_vm0, %v3048_v0  ;;  %2711 = vmatprep.mubr.msk.bf16.mxu1 %vm3049_vm0, %v3048_v0 }
 0x58b   :  { %2678 = vmatpush3.bf16.msra.mxu0 %v3685_v12  ;;  %2698 = vmatpush3.bf16.msra.mxu1 %v3691_v62 }
 0x58c   :  { %2679 = vmatprep.subr.bf16.mxu0 %v3048_v0  ;;  %2699 = vmatprep.subr.bf16.mxu1 %v3048_v0 }
 0x58f   :  { %2680 = vmatpush3.bf16.msra.mxu0 %v3699_v9  ;;  %2700 = vmatpush3.bf16.msra.mxu1 %v3705_v13 }
 0x590   :  { %2681 = vmatprep.subr.bf16.mxu0 %v3048_v0  ;;  %2701 = vmatprep.subr.bf16.mxu1 %v3048_v0 }
 0x593   :  { %2682 = vmatpush3.bf16.msra.mxu0 %v3713_v45  ;;  %2702 = vmatpush3.bf16.msra.mxu1 %v3719_v14 }
 0x594   :  { %2683 = vmatprep.subr.bf16.mxu0 %v3048_v0  ;;  %2703 = vmatprep.subr.bf16.mxu1 %v3048_v0 }
 0x597   :  { %2684 = vmatpush3.bf16.msra.mxu0 %v3727_v38  ;;  %2704 = vmatpush3.bf16.msra.mxu1 %v3850_v3 }
 0x598   :  { %2685 = vmatprep.subr.bf16.mxu0 %v3048_v0  ;;  %2705 = vmatprep.subr.bf16.mxu1 %v3048_v0 }
 0x59b   :  { %2686 = vmatpush3.bf16.msra.mxu0 %v3858_v48  ;;  %2706 = vmatpush3.bf16.msra.mxu1 %v3864_v49 }
 0x59c   :  { %2687 = vmatprep.subr.bf16.mxu0 %v3048_v0  ;;  %2707 = vmatprep.subr.bf16.mxu1 %v3048_v0 }
 0x59f   :  { %2688 = vmatpush3.bf16.msra.mxu0 %v3872_v50  ;;  %2708 = vmatpush3.bf16.msra.mxu1 %v3878_v51 }
 0x5a0   :  { %2689 = vmatprep.subr.bf16.mxu0 %v3048_v0  ;;  %2709 = vmatprep.subr.bf16.mxu1 %v3048_v0 }
 0x5a3   :  { %2690 = vmatpush3.bf16.msra.mxu0 %v3886_v52  ;;  %2710 = vmatpush3.bf16.msra.mxu1 %v3892_v53 }
 0x5a4   :  { %2715 = vmatprep.subr.bf16.mxu0 %v3048_v0  ;;  %2735 = vmatprep.subr.bf16.mxu1 %v3048_v0 }
 0x5a6   :  { %2692 = vmatmul.mubr.bf16.vlgmr.msra.gmra.mrb[44].mxu0 %v1279_v47  ;;  %2712 = vmatmul.mubr.bf16.vlgmr.msra.gmra.mrb[44].mxu1 %v1279_v47 }
 0x5a7   :  { %2716 = vmatpush3.bf16.msra.mxu0 %v3576_v19  ;;  %2736 = vmatpush3.bf16.msra.mxu1 %v3582_v20 }
 0x5a8   :  { %2717 = vmatprep.subr.bf16.mxu0 %v3048_v0  ;;  %2737 = vmatprep.subr.bf16.mxu1 %v3048_v0 }
 0x5a9   :  { %2731 = vmatprep.mubr.msk.bf16.mxu0 %vm3049_vm0, %v3048_v0  ;;  %2751 = vmatprep.mubr.msk.bf16.mxu1 %vm3049_vm0, %v3048_v0 }
 0x5ab   :  { %2718 = vmatpush3.bf16.msra.mxu0 %v3594_v21  ;;  %2738 = vmatpush3.bf16.msra.mxu1 %v3600_v22 }
 0x5ac   :  { %2719 = vmatprep.subr.bf16.mxu0 %v3048_v0  ;;  %2739 = vmatprep.subr.bf16.mxu1 %v3048_v0 }
 0x5af   :  { %2720 = vmatpush3.bf16.msra.mxu0 %v3608_v23  ;;  %2740 = vmatpush3.bf16.msra.mxu1 %v3614_v24 }
 0x5b0   :  { %2721 = vmatprep.subr.bf16.mxu0 %v3048_v0  ;;  %2741 = vmatprep.subr.bf16.mxu1 %v3048_v0 }
 0x5b3   :  { %2722 = vmatpush3.bf16.msra.mxu0 %v3622_v25  ;;  %2742 = vmatpush3.bf16.msra.mxu1 %v3628_v26 }
 0x5b4   :  { %2723 = vmatprep.subr.bf16.mxu0 %v3048_v0  ;;  %2743 = vmatprep.subr.bf16.mxu1 %v3048_v0 }
 0x5b7   :  { %2724 = vmatpush3.bf16.msra.mxu0 %v3636_v27  ;;  %2744 = vmatpush3.bf16.msra.mxu1 %v3769_v28 }
 0x5b8   :  { %2725 = vmatprep.subr.bf16.mxu0 %v3048_v0  ;;  %2745 = vmatprep.subr.bf16.mxu1 %v3048_v0 }
 0x5bb   :  { %2726 = vmatpush3.bf16.msra.mxu0 %v3777_v29  ;;  %2746 = vmatpush3.bf16.msra.mxu1 %v3783_v30 }
 0x5bc   :  { %2727 = vmatprep.subr.bf16.mxu0 %v3048_v0  ;;  %2747 = vmatprep.subr.bf16.mxu1 %v3048_v0 }
 0x5bf   :  { %2728 = vmatpush3.bf16.msra.mxu0 %v3791_v31  ;;  %2748 = vmatpush3.bf16.msra.mxu1 %v3797_v32 }
 0x5c0   :  { %2729 = vmatprep.subr.bf16.mxu0 %v3048_v0  ;;  %2749 = vmatprep.subr.bf16.mxu1 %v3048_v0 }
 0x5c3   :  { %2730 = vmatpush3.bf16.msra.mxu0 %v3805_v33  ;;  %2750 = vmatpush3.bf16.msra.mxu1 %v3811_v34 }
 0x5c4   :  { %2755 = vmatprep.subr.bf16.mxu0 %v3048_v0  ;;  %2775 = vmatprep.subr.bf16.mxu1 %v3048_v0 }
 0x659   :  { %v1315_v54 = vpop.f32.mrb[40].mxu0  ;;  %v1360_v55 = vpop.f32.mrb[40].mxu1 }
 0x65a   :  { %v2653_v56 = vpop.f32.mrb[41].mxu0  ;;  %v2673_v57 = vpop.f32.mrb[41].mxu1  ;;  %v1366_v36 = vadd.f32 %v1360_v55, %v1325_v18  ;;  %v1321_v37 = vadd.f32 %v1315_v54, %v1280_v35 }
 0x65b   :  { %v1318_v58 = vpop.f32.mrb[42].mxu0  ;;  %v1363_v59 = vpop.f32.mrb[42].mxu1 }
 0x65c   :  { %v2654_v60 = vpop.f32.mrb[43].mxu0  ;;  %v2674_v61 = vpop.f32.mrb[43].mxu1  ;;  %v1458_v1 = vmul.f32 0.5, %v1366_v36  ;;  %v1454_v4 = vmul.f32 0.5, %v1321_v37 }
 0x65e   :  { %2962 = vtanh.f32 %v1458_v1 }
 0x65f   :  { %2964 = vtanh.f32 %v1454_v4 }
 0x668   :  { %v2963_v46 = vpop.eup %2962 }
 0x669   :  { %v2965_v55 = vpop.eup %2964  ;;  %v1460_v56 = vmul.f32 0.5, %v2963_v46 }
 0x66a   :  { %v1456_v58 = vmul.f32 0.5, %v2965_v55 }
 0x66b   :  { %v1461_v59 = vadd.f32 0.5, %v1460_v56 }
 0x66c   :  { %v1457_v60 = vadd.f32 0.5, %v1456_v58 }
 0x66d   :  { %v1467_v63 = vmul.f32 %v1461_v59, %v3823_v17  ;;  %v1944_v17 = vld [vmem:[%s4084_s0 + $0x68] sm:$0xff] }
 0x66e   :  { %v1608_v6 = vrot.slane %v1944_v17, 4 }
 0x679   :  { %v1402_v10 = vpop.f32.mrb[44].mxu0  ;;  %v1447_v39 = vpop.f32.mrb[44].mxu1 }
 0x67a   :  { %v1408_v15 = vadd.f32 %v1402_v10, %v1367_v7  ;;  %v2693_v40 = vpop.f32.mrb[45].mxu0  ;;  %v2713_v41 = vpop.f32.mrb[45].mxu1  ;;  %v1453_v42 = vadd.f32 %v1447_v39, %v1412_v8  ;;  %v1565_v7 = vunpack.c.l.bf16 %v1944_v17  ;;  %v1610_v8 = vunpack.c.l.bf16 %v1608_v6 }
 0x67b   :  { %v1405_v43 = vpop.f32.mrb[46].mxu0  ;;  %v1450_v44 = vpop.f32.mrb[46].mxu1 }
 0x67c   :  { %2966 = vtanh.f32 %v1408_v15  ;;  %v2694_v47 = vpop.f32.mrb[47].mxu0  ;;  %v2714_v54 = vpop.f32.mrb[47].mxu1  ;;  %v1463_v57 = vmul.f32 0.5, %v1453_v42 }
 0x67e   :  { %2968 = vtanh.f32 %v1463_v57 }
 0x686   :  { %v2967_v61 = vpop.eup %2966 }
 0x687   :  { %v1468_v16 = vmul.f32 %v2967_v61, %v1457_v60 }
 0x688   :  { %v2969_v35 = vpop.eup %2968 }
 0x689   :  { %v3940_v18 = vadd.f32 %v1468_v16, %v1467_v63  ;;  %v1465_v36 = vmul.f32 0.5, %v2969_v35 }
 0x68b   :  { %2970 = vtanh.f32 %v3940_v18  ;;  %v1466_v37 = vadd.f32 0.5, %v1465_v36 }
 0x695   :  { %v2971_v1 = vpop.eup %2970 }
 0x696   :  { %v1471_v4 = vmul.f32 %v2971_v1, %v1466_v37 }
 0x698   :  { %1473 = vst [vmem:[#allocation4 + $0x28] sm:$0xff] %v1471_v4  ;;  %v1477_v5 = vpack.c.bf16 %v1471_v4, %v1471_v4 }
 0x69a   :  { %2732 = vmatmul.mubr.bf16.vlgmr.msra.gmra.mrb[48].mxu0 %v1477_v5  ;;  %2752 = vmatmul.mubr.bf16.vlgmr.msra.gmra.mrb[48].mxu1 %v1477_v5 }
 0x69b   :  { %2756 = vmatpush3.bf16.msra.mxu0 %v3667_v11  ;;  %2776 = vmatpush3.bf16.msra.mxu1 %v3673_v2 }
 0x69c   :  { %2757 = vmatprep.subr.bf16.mxu0 %v3048_v0  ;;  %2777 = vmatprep.subr.bf16.mxu1 %v3048_v0 }
 0x69d   :  { %2771 = vmatprep.mubr.msk.bf16.mxu0 %vm3049_vm0, %v3048_v0  ;;  %2791 = vmatprep.mubr.msk.bf16.mxu1 %vm3049_vm0, %v3048_v0 }
 0x69f   :  { %2758 = vmatpush3.bf16.msra.mxu0 %v3685_v12  ;;  %2778 = vmatpush3.bf16.msra.mxu1 %v3691_v62 }
 0x6a0   :  { %2759 = vmatprep.subr.bf16.mxu0 %v3048_v0  ;;  %2779 = vmatprep.subr.bf16.mxu1 %v3048_v0 }
 0x6a3   :  { %2760 = vmatpush3.bf16.msra.mxu0 %v3699_v9  ;;  %2780 = vmatpush3.bf16.msra.mxu1 %v3705_v13 }
 0x6a4   :  { %2761 = vmatprep.subr.bf16.mxu0 %v3048_v0  ;;  %2781 = vmatprep.subr.bf16.mxu1 %v3048_v0 }
 0x6a7   :  { %2762 = vmatpush3.bf16.msra.mxu0 %v3713_v45  ;;  %2782 = vmatpush3.bf16.msra.mxu1 %v3719_v14 }
 0x6a8   :  { %2763 = vmatprep.subr.bf16.mxu0 %v3048_v0  ;;  %2783 = vmatprep.subr.bf16.mxu1 %v3048_v0 }
 0x6ab   :  { %2764 = vmatpush3.bf16.msra.mxu0 %v3727_v38  ;;  %2784 = vmatpush3.bf16.msra.mxu1 %v3850_v3 }
 0x6ac   :  { %2765 = vmatprep.subr.bf16.mxu0 %v3048_v0  ;;  %2785 = vmatprep.subr.bf16.mxu1 %v3048_v0 }
 0x6af   :  { %2766 = vmatpush3.bf16.msra.mxu0 %v3858_v48  ;;  %2786 = vmatpush3.bf16.msra.mxu1 %v3864_v49 }
 0x6b0   :  { %2767 = vmatprep.subr.bf16.mxu0 %v3048_v0  ;;  %2787 = vmatprep.subr.bf16.mxu1 %v3048_v0 }
 0x6b3   :  { %2768 = vmatpush3.bf16.msra.mxu0 %v3872_v50  ;;  %2788 = vmatpush3.bf16.msra.mxu1 %v3878_v51 }
 0x6b4   :  { %2769 = vmatprep.subr.bf16.mxu0 %v3048_v0  ;;  %2789 = vmatprep.subr.bf16.mxu1 %v3048_v0 }
 0x6b7   :  { %2770 = vmatpush3.bf16.msra.mxu0 %v3886_v52  ;;  %2790 = vmatpush3.bf16.msra.mxu1 %v3892_v53 }
 0x6b8   :  { %2795 = vmatprep.subr.bf16.mxu0 %v3048_v0  ;;  %2815 = vmatprep.subr.bf16.mxu1 %v3048_v0 }
 0x6ba   :  { %2772 = vmatmul.mubr.bf16.vlgmr.msra.gmra.mrb[52].mxu0 %v1477_v5  ;;  %2792 = vmatmul.mubr.bf16.vlgmr.msra.gmra.mrb[52].mxu1 %v1477_v5 }
 0x6bb   :  { %2796 = vmatpush3.bf16.msra.mxu0 %v3576_v19  ;;  %2816 = vmatpush3.bf16.msra.mxu1 %v3582_v20 }
 0x6bc   :  { %2797 = vmatprep.subr.bf16.mxu0 %v3048_v0  ;;  %2817 = vmatprep.subr.bf16.mxu1 %v3048_v0 }
 0x6bd   :  { %2811 = vmatprep.mubr.msk.bf16.mxu0 %vm3049_vm0, %v3048_v0  ;;  %2831 = vmatprep.mubr.msk.bf16.mxu1 %vm3049_vm0, %v3048_v0 }
 0x6bf   :  { %2798 = vmatpush3.bf16.msra.mxu0 %v3594_v21  ;;  %2818 = vmatpush3.bf16.msra.mxu1 %v3600_v22 }
 0x6c0   :  { %2799 = vmatprep.subr.bf16.mxu0 %v3048_v0  ;;  %2819 = vmatprep.subr.bf16.mxu1 %v3048_v0 }
 0x6c3   :  { %2800 = vmatpush3.bf16.msra.mxu0 %v3608_v23  ;;  %2820 = vmatpush3.bf16.msra.mxu1 %v3614_v24 }
 0x6c4   :  { %2801 = vmatprep.subr.bf16.mxu0 %v3048_v0  ;;  %2821 = vmatprep.subr.bf16.mxu1 %v3048_v0 }
 0x6c7   :  { %2802 = vmatpush3.bf16.msra.mxu0 %v3622_v25  ;;  %2822 = vmatpush3.bf16.msra.mxu1 %v3628_v26 }
 0x6c8   :  { %2803 = vmatprep.subr.bf16.mxu0 %v3048_v0  ;;  %2823 = vmatprep.subr.bf16.mxu1 %v3048_v0 }
 0x6cb   :  { %2804 = vmatpush3.bf16.msra.mxu0 %v3636_v27  ;;  %2824 = vmatpush3.bf16.msra.mxu1 %v3769_v28  ;;  %v1943_v27 = vld [vmem:[%s4084_s0 + $0x60] sm:$0xff] }
 0x6cc   :  { %2805 = vmatprep.subr.bf16.mxu0 %v3048_v0  ;;  %2825 = vmatprep.subr.bf16.mxu1 %v3048_v0  ;;  %v1521_v28 = vrot.slane %v1943_v27, 4 }
 0x6cf   :  { %2806 = vmatpush3.bf16.msra.mxu0 %v3777_v29  ;;  %2826 = vmatpush3.bf16.msra.mxu1 %v3783_v30  ;;  %v1523_v29 = vunpack.c.l.bf16 %v1521_v28  ;;  %v1478_v30 = vunpack.c.l.bf16 %v1943_v27 }
 0x6d0   :  { %2807 = vmatprep.subr.bf16.mxu0 %v3048_v0  ;;  %2827 = vmatprep.subr.bf16.mxu1 %v3048_v0 }
 0x6d3   :  { %2808 = vmatpush3.bf16.msra.mxu0 %v3791_v31  ;;  %2828 = vmatpush3.bf16.msra.mxu1 %v3797_v32 }
 0x6d4   :  { %2809 = vmatprep.subr.bf16.mxu0 %v3048_v0  ;;  %2829 = vmatprep.subr.bf16.mxu1 %v3048_v0 }
 0x6d7   :  { %2810 = vmatpush3.bf16.msra.mxu0 %v3805_v33  ;;  %2830 = vmatpush3.bf16.msra.mxu1 %v3811_v34 }
 0x6d8   :  { %2835 = vmatprep.subr.bf16.mxu0 %v3048_v0  ;;  %2855 = vmatprep.subr.bf16.mxu1 %v3048_v0 }
 0x76d   :  { %v1513_v19 = vpop.f32.mrb[48].mxu0  ;;  %v1558_v20 = vpop.f32.mrb[48].mxu1 }
 0x76e   :  { %v2733_v21 = vpop.f32.mrb[49].mxu0  ;;  %v2753_v22 = vpop.f32.mrb[49].mxu1  ;;  %v1564_v31 = vadd.f32 %v1558_v20, %v1523_v29  ;;  %v1519_v32 = vadd.f32 %v1513_v19, %v1478_v30 }
 0x76f   :  { %v1516_v23 = vpop.f32.mrb[50].mxu0  ;;  %v1561_v24 = vpop.f32.mrb[50].mxu1 }
 0x770   :  { %v2734_v25 = vpop.f32.mrb[51].mxu0  ;;  %v2754_v26 = vpop.f32.mrb[51].mxu1  ;;  %v1656_v33 = vmul.f32 0.5, %v1564_v31  ;;  %v1652_v34 = vmul.f32 0.5, %v1519_v32 }
 0x772   :  { %2972 = vtanh.f32 %v1656_v33 }
 0x773   :  { %2974 = vtanh.f32 %v1652_v34 }
 0x77c   :  { %v2973_v46 = vpop.eup %2972 }
 0x77d   :  { %v2975_v55 = vpop.eup %2974  ;;  %v1658_v56 = vmul.f32 0.5, %v2973_v46 }
 0x77e   :  { %v1654_v58 = vmul.f32 0.5, %v2975_v55 }
 0x77f   :  { %v1659_v59 = vadd.f32 0.5, %v1658_v56 }
 0x780   :  { %v1655_v60 = vadd.f32 0.5, %v1654_v58 }
 0x781   :  { %v1665_v63 = vmul.f32 %v1659_v59, %v3940_v18 }
 0x78d   :  { %v1600_v10 = vpop.f32.mrb[52].mxu0  ;;  %v1645_v39 = vpop.f32.mrb[52].mxu1 }
 0x78e   :  { %v1606_v15 = vadd.f32 %v1600_v10, %v1565_v7  ;;  %v2773_v40 = vpop.f32.mrb[53].mxu0  ;;  %v2793_v41 = vpop.f32.mrb[53].mxu1  ;;  %v1651_v42 = vadd.f32 %v1645_v39, %v1610_v8 }
 0x78f   :  { %v1603_v43 = vpop.f32.mrb[54].mxu0  ;;  %v1648_v44 = vpop.f32.mrb[54].mxu1 }
 0x790   :  { %2976 = vtanh.f32 %v1606_v15  ;;  %v2774_v47 = vpop.f32.mrb[55].mxu0  ;;  %v2794_v54 = vpop.f32.mrb[55].mxu1  ;;  %v1661_v57 = vmul.f32 0.5, %v1651_v42 }
 0x792   :  { %2978 = vtanh.f32 %v1661_v57 }
 0x79a   :  { %v2977_v61 = vpop.eup %2976 }
 0x79b   :  { %v1666_v16 = vmul.f32 %v2977_v61, %v1655_v60 }
 0x79c   :  { %v2979_v36 = vpop.eup %2978 }
 0x79d   :  { %v4022_v35 = vadd.f32 %v1666_v16, %v1665_v63  ;;  %v1663_v37 = vmul.f32 0.5, %v2979_v36 }
 0x79f   :  { %2980 = vtanh.f32 %v4022_v35  ;;  %v1664_v1 = vadd.f32 0.5, %v1663_v37 }
 0x7a9   :  { %v2981_v4 = vpop.eup %2980 }
 0x7aa   :  { %v1669_v5 = vmul.f32 %v2981_v4, %v1664_v1 }
 0x7ac   :  { %1671 = vst [vmem:[#allocation4 + $0x30] sm:$0xff] %v1669_v5  ;;  %v1675_v19 = vpack.c.bf16 %v1669_v5, %v1669_v5 }
 0x7ae   :  { %2812 = vmatmul.mubr.bf16.vlgmr.msra.gmra.mrb[56].mxu0 %v1675_v19  ;;  %2832 = vmatmul.mubr.bf16.vlgmr.msra.gmra.mrb[56].mxu1 %v1675_v19 }
 0x7af   :  { %2836 = vmatpush3.bf16.msra.mxu0 %v3667_v11  ;;  %2856 = vmatpush3.bf16.msra.mxu1 %v3673_v2 }
 0x7b0   :  { %2837 = vmatprep.subr.bf16.mxu0 %v3048_v0  ;;  %2857 = vmatprep.subr.bf16.mxu1 %v3048_v0 }
 0x7b1   :  { %2851 = vmatprep.mubr.msk.bf16.mxu0 %vm3049_vm0, %v3048_v0  ;;  %2871 = vmatprep.mubr.msk.bf16.mxu1 %vm3049_vm0, %v3048_v0 }
 0x7b3   :  { %2838 = vmatpush3.bf16.msra.mxu0 %v3685_v12  ;;  %2858 = vmatpush3.bf16.msra.mxu1 %v3691_v62 }
 0x7b4   :  { %2839 = vmatprep.subr.bf16.mxu0 %v3048_v0  ;;  %2859 = vmatprep.subr.bf16.mxu1 %v3048_v0 }
 0x7b7   :  { %2840 = vmatpush3.bf16.msra.mxu0 %v3699_v9  ;;  %2860 = vmatpush3.bf16.msra.mxu1 %v3705_v13 }
 0x7b8   :  { %2841 = vmatprep.subr.bf16.mxu0 %v3048_v0  ;;  %2861 = vmatprep.subr.bf16.mxu1 %v3048_v0 }
 0x7bb   :  { %2842 = vmatpush3.bf16.msra.mxu0 %v3713_v45  ;;  %2862 = vmatpush3.bf16.msra.mxu1 %v3719_v14 }
 0x7bc   :  { %2843 = vmatprep.subr.bf16.mxu0 %v3048_v0  ;;  %2863 = vmatprep.subr.bf16.mxu1 %v3048_v0 }
 0x7bf   :  { %2844 = vmatpush3.bf16.msra.mxu0 %v3727_v38  ;;  %2864 = vmatpush3.bf16.msra.mxu1 %v3850_v3  ;;  %v1945_v38 = vld [vmem:[%s4084_s0 + $0x70] sm:$0xff] }
 0x7c0   :  { %2845 = vmatprep.subr.bf16.mxu0 %v3048_v0  ;;  %2865 = vmatprep.subr.bf16.mxu1 %v3048_v0  ;;  %v1719_v3 = vrot.slane %v1945_v38, 4 }
 0x7c3   :  { %2846 = vmatpush3.bf16.msra.mxu0 %v3858_v48  ;;  %2866 = vmatpush3.bf16.msra.mxu1 %v3864_v49  ;;  %v1676_v48 = vunpack.c.l.bf16 %v1945_v38 }
 0x7c4   :  { %2847 = vmatprep.subr.bf16.mxu0 %v3048_v0  ;;  %2867 = vmatprep.subr.bf16.mxu1 %v3048_v0 }
 0x7c7   :  { %2848 = vmatpush3.bf16.msra.mxu0 %v3872_v50  ;;  %2868 = vmatpush3.bf16.msra.mxu1 %v3878_v51 }
 0x7c8   :  { %2849 = vmatprep.subr.bf16.mxu0 %v3048_v0  ;;  %2869 = vmatprep.subr.bf16.mxu1 %v3048_v0  ;;  %v1721_v0 = vunpack.c.l.bf16 %v1719_v3 }
 0x7cb   :  { %2850 = vmatpush3.bf16.msra.mxu0 %v3886_v52  ;;  %2870 = vmatpush3.bf16.msra.mxu1 %v3892_v53  ;;  %v1946_v53 = vld [vmem:[%s4084_s0 + $0x78] sm:$0xff] }
 0x7cc   :  { %v1806_v18 = vrot.slane %v1946_v53, 4  ;;  %v1763_v20 = vunpack.c.l.bf16 %v1946_v53 }
 0x7ce   :  { %2852 = vmatmul.mubr.bf16.vlgmr.msra.gmra.mrb[60].mxu0 %v1675_v19  ;;  %2872 = vmatmul.mubr.bf16.vlgmr.msra.gmra.mrb[60].mxu1 %v1675_v19  ;;  %v1808_v21 = vunpack.c.l.bf16 %v1806_v18 }
 0x881   :  { %v1711_v11 = vpop.f32.mrb[56].mxu0  ;;  %v1756_v2 = vpop.f32.mrb[56].mxu1 }
 0x882   :  { %v2813_v12 = vpop.f32.mrb[57].mxu0  ;;  %v2833_v62 = vpop.f32.mrb[57].mxu1  ;;  %v1762_v49 = vadd.f32 %v1756_v2, %v1721_v0  ;;  %v1717_v50 = vadd.f32 %v1711_v11, %v1676_v48 }
 0x883   :  { %v1714_v9 = vpop.f32.mrb[58].mxu0  ;;  %v1759_v13 = vpop.f32.mrb[58].mxu1 }
 0x884   :  { %v2814_v45 = vpop.f32.mrb[59].mxu0  ;;  %v2834_v14 = vpop.f32.mrb[59].mxu1  ;;  %v1854_v51 = vmul.f32 0.5, %v1762_v49  ;;  %v1850_v52 = vmul.f32 0.5, %v1717_v50 }
 0x886   :  { %2982 = vtanh.f32 %v1854_v51 }
 0x887   :  { %2984 = vtanh.f32 %v1850_v52 }
 0x890   :  { %v2983_v30 = vpop.eup %2982 }
 0x891   :  { %v2985_v33 = vpop.eup %2984  ;;  %v1856_v34 = vmul.f32 0.5, %v2983_v30 }
 0x892   :  { %v1852_v6 = vmul.f32 0.5, %v2985_v33 }
 0x893   :  { %v1857_v7 = vadd.f32 0.5, %v1856_v34 }
 0x894   :  { %v1853_v8 = vadd.f32 0.5, %v1852_v6 }
 0x895   :  { %v1863_v39 = vmul.f32 %v1857_v7, %v4022_v35 }
 0x8a1   :  { %v1798_v22 = vpop.f32.mrb[60].mxu0  ;;  %v1843_v23 = vpop.f32.mrb[60].mxu1 }
 0x8a2   :  { %v1804_v24 = vadd.f32 %v1798_v22, %v1763_v20  ;;  %v2853_v25 = vpop.f32.mrb[61].mxu0  ;;  %v2873_v26 = vpop.f32.mrb[61].mxu1  ;;  %v1849_v27 = vadd.f32 %v1843_v23, %v1808_v21 }
 0x8a3   :  { %v1801_v28 = vpop.f32.mrb[62].mxu0  ;;  %v1846_v29 = vpop.f32.mrb[62].mxu1 }
 0x8a4   :  { %2986 = vtanh.f32 %v1804_v24  ;;  %v2854_v31 = vpop.f32.mrb[63].mxu0  ;;  %v2874_v32 = vpop.f32.mrb[63].mxu1  ;;  %v1859_v17 = vmul.f32 0.5, %v1849_v27 }
 0x8a6   :  { %2988 = vtanh.f32 %v1859_v17 }
 0x8ae   :  { %v2987_v10 = vpop.eup %2986 }
 0x8af   :  { %v1864_v15 = vmul.f32 %v2987_v10, %v1853_v8 }
 0x8b0   :  { %v2989_v41 = vpop.eup %2988 }
 0x8b1   :  { %v1865_v40 = vadd.f32 %v1864_v15, %v1863_v39  ;;  %v1861_v42 = vmul.f32 0.5, %v2989_v41 }
 0x8b3   :  { %2990 = vtanh.f32 %v1865_v40  ;;  %1876 = vst [vmem:[%s4090_s6] sm:$0xff] %v1865_v40  ;;  %v1862_v43 = vadd.f32 0.5, %v1861_v42 }
 0x8bd   :  { %v2991_v44 = vpop.eup %2990 }
 0x8be   :  { %v1867_v46 = vmul.f32 %v2991_v44, %v1862_v43 }
 0x8c0   :  { %1869 = vst [vmem:[#allocation4 + $0x38] sm:$0xff] %v1867_v46  ;;  %1875 = vst [vmem:[%s4089_s5] sm:$0xff] %v1867_v46 }
 0x8c1   :  { %3035 = shalt.err (!%p3032_p4)
}
 0x8c2   :  { %s3036_s13 = scalar_lea.hbm %s4088_s4, 1024 }
 0x8c3   :  { %p3037_p5 = scmp.ne.s32.totalorder %s4088_s4, %s3036_s13  ;;  %p3040_p6 = scmp.lt.u32.totalorder %s3036_s13, %s4088_s4 }
 0x8c5   :  { %p3042_p7 = pnand %p3040_p6, %p3037_p5 }
 0x8c7   :  { %3045 = shalt.err (!%p3042_p7)
}
 0x8c8   :  { %s3051_s5 = smov 128   ;;  %s3052_s18 = smov 8  }
 0x8c9   :  { %1888 = dma.vmem_to_hbm [thread:$0]  %s1883_s1, 1024, %s4088_s4, [#allocation5], %s3051_s5, %s3051_s5, %s3052_s18  }
 0x8ca   :  { %3046 = dma.done.wait [#allocation5], 1024  }
 0x8cb   :  { %3047 = vsyncadd [#allocation5], 4294966272 }
 0x8cc   :  { %1900 = vsyncpa [#allocation5], 1 }

// kernel: lstm_layer_pallas.2
= control target key start
LH: loop header
LB: loop body
LE: loop exit
PB: predicated region body
PF: predicated region fallthrough
CT: control target
= control target key end

     0   :  { %8 = vsyncpa [#allocation3], 0  ;;  %s461_s12 = smov [#allocation2]   ;;  %s615_s0 = inlined_call_operand.vmem [shape: bf16[64,16], index: 0, kind: input, shape index: {}]   ;;  %s616_s1 = inlined_call_operand.vmem [shape: bf16[16,512], index: 1, kind: input, shape index: {}]   ;;  %s617_s2 = inlined_call_operand.hbm [shape: f32[1,512], index: 2, kind: input, shape index: {}]   ;;  %s618_s3 = inlined_call_operand.vmem [shape: bf16[64,512], index: 3, kind: output, shape index: {}]  }
   0x1   :  { %s19_s13 = sshll.u32 %s461_s12, 4  ;;  %s437_s16 = scalar_lea.hbm %s617_s2, 64  ;;  %s20_s13 = int_to_ptr.vmem [resolvable:$true] %s19_s13 }
   0x2   :  { %p438_p0 = scmp.ne.s32.totalorder %s617_s2, %s437_s16  ;;  %p441_p1 = scmp.lt.u32.totalorder %s437_s16, %s617_s2 }
   0x4   :  { %p443_p2 = pnand %p441_p1, %p438_p0 }
   0x6   :  { %446 = shalt.err (!%p443_p2)
}
   0x7   :  { %s447_s21 = scalar_lea.vmem %s20_s13, 64  ;;  %p452_p4 = scmp.lt.s32.totalorder %s20_s13, %s20_s13 }
   0x8   :  { %p448_p3 = scmp.ne.s32.totalorder %s20_s13, %s447_s21  ;;  %p453_p5 = scmp.lt.s32.totalorder %s447_s21, %s447_s21 }
   0xa   :  { %p454_p6 = por %p453_p5, %p452_p4 }
   0xc   :  { %p455_p7 = pnand %p454_p6, %p448_p3 }
   0xe   :  { %458 = shalt.err (!%p455_p7)
}
   0xf   :  { %22 = dma.hbm_to_vmem [thread:$0]  %s617_s2, 64, %s20_s13, [#allocation3]  }
  0x10   :  { %459 = dma.done.wait [#allocation3], 64  }
  0x11   :  { %460 = vsyncadd [#allocation3], 4294967232  ;;  %v462_v0 = vmov 0   ;;  %v427_v1 = vld [vmem:[%s616_s1 + $0x4] ss:$16 sps:$4 sm:$0xff]   ;;  %vm101_vm0 = vcmask 130048   ;;  %v41_v9 = vlaneseq }
  0x12   :  { %146 = vmatprep.mubr.bf16.mxu0 %v462_v0  ;;  %219 = vmatprep.mubr.bf16.mxu1 %v462_v0  ;;  %v429_v2 = vld [vmem:[%s616_s1 + $0xc] ss:$16 sps:$4 sm:$0xff]   ;;  %v431_v3 = vld [vmem:[%s616_s1] ss:$16 sps:$4 sm:$0xff]   ;;  %v432_v4 = vld [vmem:[%s616_s1 + $0x8] ss:$16 sps:$4 sm:$0xff]  }
  0x13   :  { %114 = vmatprep.subr.bf16.mxu0 %v427_v1  ;;  %187 = vmatprep.subr.bf16.mxu1 %v429_v2  ;;  %v433_v5 = vld [vmem:[%s615_s0] sm:$0xff]   ;;  %v434_v6 = vld [vmem:[%s615_s0 + $0x8] sm:$0xff]   ;;  %v435_v7 = vld [vmem:[%s615_s0 + $0x10] sm:$0xff]   ;;  %v42_v10 = vshrl.u32 %v41_v9, 7 }
  0x14   :  { %115 = vmatpush1.bf16.msra.mxu0 %v431_v3  ;;  %188 = vmatpush1.bf16.msra.mxu1 %v432_v4  ;;  %v436_v8 = vld [vmem:[%s615_s0 + $0x18] sm:$0xff]   ;;  %v39_v13 = vld [vmem:[#allocation2] sm:$0xf] }
  0x15   :  { %v43_v11 = vsub.s32 0, %v42_v10  ;;  %v51_v12 = vsub.s32 2, %v42_v10  ;;  %v47_v14 = vsub.s32 1, %v42_v10  ;;  %v55_v15 = vsub.s32 3, %v42_v10 }
  0x17   :  { %385 = vmatmul.mubr.msk.bf16.vlgmr.msra.gmra.mrb[0].mxu0 %vm101_vm0, %v433_v5  ;;  %389 = vmatmul.mubr.msk.bf16.vlgmr.msra.gmra.mrb[0].mxu1 %vm101_vm0, %v433_v5  ;;  %v527_v16 = vrot.slane %v39_v13, %v43_v11  ;;  %v529_v17 = vrot.slane %v39_v13, %v51_v12  ;;  %v531_v18 = vrot.slane %v39_v13, %v47_v14 }
  0x18   :  { %156 = vmatprep.mubr.bf16.mxu0 %v462_v0  ;;  %229 = vmatprep.mubr.bf16.mxu1 %v462_v0  ;;  %v533_v19 = vrot.slane %v39_v13, %v55_v15 }
  0x1f   :  { %386 = vmatmul.mubr.msk.bf16.gmra.mrb[4].mxu0 %vm101_vm0, %v434_v6  ;;  %390 = vmatmul.mubr.msk.bf16.gmra.mrb[4].mxu1 %vm101_vm0, %v434_v6 }
  0x20   :  { %166 = vmatprep.mubr.bf16.mxu0 %v462_v0  ;;  %239 = vmatprep.mubr.bf16.mxu1 %v462_v0 }
  0x27   :  { %387 = vmatmul.mubr.msk.bf16.gmra.mrb[8].mxu0 %vm101_vm0, %v435_v7  ;;  %391 = vmatmul.mubr.msk.bf16.gmra.mrb[8].mxu1 %vm101_vm0, %v435_v7 }
  0x28   :  { %176 = vmatprep.mubr.bf16.mxu0 %v462_v0  ;;  %249 = vmatprep.mubr.bf16.mxu1 %v462_v0 }
  0x2f   :  { %388 = vmatmul.mubr.msk.bf16.gmra.mrb[12].mxu0 %vm101_vm0, %v436_v8  ;;  %392 = vmatmul.mubr.msk.bf16.gmra.mrb[12].mxu1 %vm101_vm0, %v436_v8 }
  0xea   :  { %v148_v20 = vpop.f32.mrb[0].mxu0  ;;  %v221_v21 = vpop.f32.mrb[0].mxu1 }
  0xeb   :  { %v149_v22 = vadd.f32 %v148_v20, %v527_v16  ;;  %v222_v23 = vadd.f32 %v221_v21, %v529_v17  ;;  %v150_v24 = vpop.f32.mrb[1].mxu0  ;;  %v223_v25 = vpop.f32.mrb[1].mxu1 }
  0xec   :  { %v151_v26 = vadd.f32 %v150_v24, %v531_v18  ;;  %v224_v27 = vadd.f32 %v223_v25, %v533_v19  ;;  %v152_v28 = vpop.f32.mrb[2].mxu0  ;;  %v225_v29 = vpop.f32.mrb[2].mxu1 }
  0xed   :  { %v153_v30 = vadd.f32 %v152_v28, %v527_v16  ;;  %v226_v31 = vadd.f32 %v225_v29, %v529_v17  ;;  %v154_v32 = vpop.f32.mrb[3].mxu0  ;;  %v227_v33 = vpop.f32.mrb[3].mxu1 }
  0xee   :  { %v409_v34 = vpack.c.bf16 %v151_v26, %v149_v22  ;;  %v410_v35 = vpack.c.bf16 %v224_v27, %v222_v23  ;;  %v155_v36 = vadd.f32 %v154_v32, %v531_v18  ;;  %v228_v37 = vadd.f32 %v227_v33, %v533_v19 }
  0xf0   :  { %356 = vst [vmem:[%s618_s3] sm:$0xff] %v409_v34  ;;  %357 = vst [vmem:[%s618_s3 + $0x8] sm:$0xff] %v410_v35  ;;  %v411_v38 = vpack.c.bf16 %v155_v36, %v153_v30  ;;  %v412_v39 = vpack.c.bf16 %v228_v37, %v226_v31 }
  0xf2   :  { %358 = vst [vmem:[%s618_s3 + $0x10] sm:$0xff] %v411_v38  ;;  %359 = vst [vmem:[%s618_s3 + $0x18] sm:$0xff] %v412_v39  ;;  %v158_v40 = vpop.f32.mrb[4].mxu0  ;;  %v231_v41 = vpop.f32.mrb[4].mxu1 }
  0xf3   :  { %v159_v42 = vadd.f32 %v158_v40, %v527_v16  ;;  %v232_v43 = vadd.f32 %v231_v41, %v529_v17  ;;  %v160_v44 = vpop.f32.mrb[5].mxu0  ;;  %v233_v45 = vpop.f32.mrb[5].mxu1 }
  0xf4   :  { %v161_v46 = vadd.f32 %v160_v44, %v531_v18  ;;  %v234_v47 = vadd.f32 %v233_v45, %v533_v19  ;;  %v162_v48 = vpop.f32.mrb[6].mxu0  ;;  %v235_v49 = vpop.f32.mrb[6].mxu1 }
  0xf5   :  { %v163_v50 = vadd.f32 %v162_v48, %v527_v16  ;;  %v236_v51 = vadd.f32 %v235_v49, %v529_v17  ;;  %v164_v52 = vpop.f32.mrb[7].mxu0  ;;  %v237_v53 = vpop.f32.mrb[7].mxu1 }
  0xf6   :  { %v413_v54 = vpack.c.bf16 %v161_v46, %v159_v42  ;;  %v414_v55 = vpack.c.bf16 %v234_v47, %v232_v43  ;;  %v165_v56 = vadd.f32 %v164_v52, %v531_v18  ;;  %v238_v57 = vadd.f32 %v237_v53, %v533_v19 }
  0xf8   :  { %360 = vst [vmem:[%s618_s3 + $0x20] sm:$0xff] %v413_v54  ;;  %361 = vst [vmem:[%s618_s3 + $0x28] sm:$0xff] %v414_v55  ;;  %v415_v58 = vpack.c.bf16 %v165_v56, %v163_v50  ;;  %v416_v59 = vpack.c.bf16 %v238_v57, %v236_v51 }
  0xfa   :  { %362 = vst [vmem:[%s618_s3 + $0x30] sm:$0xff] %v415_v58  ;;  %363 = vst [vmem:[%s618_s3 + $0x38] sm:$0xff] %v416_v59  ;;  %v168_v60 = vpop.f32.mrb[8].mxu0  ;;  %v241_v61 = vpop.f32.mrb[8].mxu1 }
  0xfb   :  { %v169_v62 = vadd.f32 %v168_v60, %v527_v16  ;;  %v242_v63 = vadd.f32 %v241_v61, %v529_v17  ;;  %v170_v0 = vpop.f32.mrb[9].mxu0  ;;  %v243_v1 = vpop.f32.mrb[9].mxu1 }
  0xfc   :  { %v171_v2 = vadd.f32 %v170_v0, %v531_v18  ;;  %v244_v3 = vadd.f32 %v243_v1, %v533_v19  ;;  %v172_v4 = vpop.f32.mrb[10].mxu0  ;;  %v245_v5 = vpop.f32.mrb[10].mxu1 }
  0xfd   :  { %v173_v6 = vadd.f32 %v172_v4, %v527_v16  ;;  %v246_v7 = vadd.f32 %v245_v5, %v529_v17  ;;  %v174_v8 = vpop.f32.mrb[11].mxu0  ;;  %v247_v9 = vpop.f32.mrb[11].mxu1 }
  0xfe   :  { %v417_v10 = vpack.c.bf16 %v171_v2, %v169_v62  ;;  %v418_v11 = vpack.c.bf16 %v244_v3, %v242_v63  ;;  %v175_v12 = vadd.f32 %v174_v8, %v531_v18  ;;  %v248_v13 = vadd.f32 %v247_v9, %v533_v19 }
 0x100   :  { %364 = vst [vmem:[%s618_s3 + $0x40] sm:$0xff] %v417_v10  ;;  %365 = vst [vmem:[%s618_s3 + $0x48] sm:$0xff] %v418_v11  ;;  %v419_v14 = vpack.c.bf16 %v175_v12, %v173_v6  ;;  %v420_v15 = vpack.c.bf16 %v248_v13, %v246_v7 }
 0x102   :  { %366 = vst [vmem:[%s618_s3 + $0x50] sm:$0xff] %v419_v14  ;;  %367 = vst [vmem:[%s618_s3 + $0x58] sm:$0xff] %v420_v15  ;;  %v178_v20 = vpop.f32.mrb[12].mxu0  ;;  %v251_v21 = vpop.f32.mrb[12].mxu1 }
 0x103   :  { %v179_v22 = vadd.f32 %v178_v20, %v527_v16  ;;  %v252_v23 = vadd.f32 %v251_v21, %v529_v17  ;;  %v180_v24 = vpop.f32.mrb[13].mxu0  ;;  %v253_v25 = vpop.f32.mrb[13].mxu1 }
 0x104   :  { %v181_v26 = vadd.f32 %v180_v24, %v531_v18  ;;  %v254_v27 = vadd.f32 %v253_v25, %v533_v19  ;;  %v182_v28 = vpop.f32.mrb[14].mxu0  ;;  %v255_v29 = vpop.f32.mrb[14].mxu1 }
 0x105   :  { %v183_v30 = vadd.f32 %v182_v28, %v527_v16  ;;  %v256_v31 = vadd.f32 %v255_v29, %v529_v17  ;;  %v184_v32 = vpop.f32.mrb[15].mxu0  ;;  %v257_v33 = vpop.f32.mrb[15].mxu1 }
 0x106   :  { %v421_v34 = vpack.c.bf16 %v181_v26, %v179_v22  ;;  %v422_v35 = vpack.c.bf16 %v254_v27, %v252_v23  ;;  %v185_v36 = vadd.f32 %v184_v32, %v531_v18  ;;  %v258_v37 = vadd.f32 %v257_v33, %v533_v19 }
 0x108   :  { %368 = vst [vmem:[%s618_s3 + $0x60] sm:$0xff] %v421_v34  ;;  %369 = vst [vmem:[%s618_s3 + $0x68] sm:$0xff] %v422_v35  ;;  %v423_v38 = vpack.c.bf16 %v185_v36, %v183_v30  ;;  %v424_v16 = vpack.c.bf16 %v258_v37, %v256_v31 }
 0x10a   :  { %370 = vst [vmem:[%s618_s3 + $0x70] sm:$0xff] %v423_v38  ;;  %371 = vst [vmem:[%s618_s3 + $0x78] sm:$0xff] %v424_v16 }
 0x10b   :  { %376 = vsyncpa [#allocation3], 1 }

// kernel: lstm_layer_pallas.3
= control target key start
LH: loop header
LB: loop body
LE: loop exit
PB: predicated region body
PF: predicated region fallthrough
CT: control target
= control target key end

     0   :  { %v3048_v0 = vmov 0.0   ;;  %vm3049_vm0 = vmmov 0   ;;  %s4084_s0 = inlined_call_operand.vmem [shape: bf16[8,8,512], index: 0, kind: input, shape index: {}]   ;;  %s4085_s1 = inlined_call_operand.vmem [shape: f32[8,128], index: 1, kind: input, shape index: {}]   ;;  %s4086_s2 = inlined_call_operand.vmem [shape: f32[8,128], index: 2, kind: input, shape index: {}]   ;;  %s4087_s3 = inlined_call_operand.vmem [shape: bf16[128,512], index: 3, kind: input, shape index: {}]   ;;  %s4088_s4 = inlined_call_operand.hbm [shape: f32[8,8,128], index: 4, kind: output, shape index: {0}]   ;;  %s4089_s5 = inlined_call_operand.vmem [shape: f32[8,128], index: 5, kind: output, shape index: {1}]   ;;  %s4090_s6 = inlined_call_operand.vmem [shape: f32[8,128], index: 6, kind: output, shape index: {2}]  }
   0x1   :  { %2235 = vmatprep.subr.bf16.mxu0 %v3048_v0  ;;  %v3092_v1 = vld [vmem:[%s4087_s3] ss:$16 sps:$4 sm:$0xff]   ;;  %2255 = vmatprep.subr.bf16.mxu1 %v3048_v0  ;;  %v3108_v3 = vld [vmem:[%s4087_s3 + $0x4] ss:$16 sps:$4 sm:$0xff]   ;;  %v3209_v19 = vld [vmem:[%s4087_s3 + $0x8] ss:$16 sps:$4 sm:$0xff]  }
   0x2   :  { %v3098_v2 = vld [vmem:[%s4087_s3 + $0x20] ss:$16 sps:$4 sm:$0xff]   ;;  %2251 = vmatprep.mubr.msk.bf16.mxu0 %vm3049_vm0, %v3048_v0  ;;  %2271 = vmatprep.mubr.msk.bf16.mxu1 %vm3049_vm0, %v3048_v0  ;;  %v3115_v4 = vld [vmem:[%s4087_s3 + $0x24] ss:$16 sps:$4 sm:$0xff]   ;;  %v3216_v20 = vld [vmem:[%s4087_s3 + $0xc] ss:$16 sps:$4 sm:$0xff]  }
   0x3   :  { %2236 = vmatpush3.bf16.msra.mxu0 %v3092_v1  ;;  %2256 = vmatpush3.bf16.msra.mxu1 %v3108_v3  ;;  %v3122_v5 = vld [vmem:[%s4087_s3 + $0x40] ss:$16 sps:$4 sm:$0xff]   ;;  %v3129_v6 = vld [vmem:[%s4087_s3 + $0x44] ss:$16 sps:$4 sm:$0xff]  }
   0x4   :  { %2237 = vmatprep.subr.bf16.mxu0 %v3048_v0  ;;  %2257 = vmatprep.subr.bf16.mxu1 %v3048_v0  ;;  %v3136_v7 = vld [vmem:[%s4087_s3 + $0x60] ss:$16 sps:$4 sm:$0xff]   ;;  %v3143_v8 = vld [vmem:[%s4087_s3 + $0x64] ss:$16 sps:$4 sm:$0xff]  }
   0x5   :  { %v3150_v9 = vld [vmem:[%s4087_s3 + $0x80] ss:$16 sps:$4 sm:$0xff]   ;;  %v3157_v10 = vld [vmem:[%s4087_s3 + $0x84] ss:$16 sps:$4 sm:$0xff]  }
   0x6   :  { %v3164_v11 = vld [vmem:[%s4087_s3 + $0xa0] ss:$16 sps:$4 sm:$0xff]   ;;  %v3171_v12 = vld [vmem:[%s4087_s3 + $0xa4] ss:$16 sps:$4 sm:$0xff]  }
   0x7   :  { %2238 = vmatpush3.bf16.msra.mxu0 %v3098_v2  ;;  %2258 = vmatpush3.bf16.msra.mxu1 %v3115_v4  ;;  %v3178_v13 = vld [vmem:[%s4087_s3 + $0xc0] ss:$16 sps:$4 sm:$0xff]   ;;  %v3185_v14 = vld [vmem:[%s4087_s3 + $0xc4] ss:$16 sps:$4 sm:$0xff]  }
   0x8   :  { %2239 = vmatprep.subr.bf16.mxu0 %v3048_v0  ;;  %2259 = vmatprep.subr.bf16.mxu1 %v3048_v0  ;;  %v3190_v15 = vld [vmem:[%s4087_s3 + $0xe0] ss:$16 sps:$4 sm:$0xff]   ;;  %v3202_v17 = vld [vmem:[%s4087_s3 + $0xe4] ss:$16 sps:$4 sm:$0xff]  }
   0x9   :  { %v26_v16 = vld [vmem:[%s4085_s1] sm:$0xff] }
   0xa   :  { %v98_v18 = vpack.c.bf16 %v26_v16, %v26_v16 }
   0xb   :  { %2240 = vmatpush3.bf16.msra.mxu0 %v3122_v5  ;;  %2260 = vmatpush3.bf16.msra.mxu1 %v3129_v6 }
   0xc   :  { %2241 = vmatprep.subr.bf16.mxu0 %v3048_v0  ;;  %2261 = vmatprep.subr.bf16.mxu1 %v3048_v0 }
   0xf   :  { %2242 = vmatpush3.bf16.msra.mxu0 %v3136_v7  ;;  %2262 = vmatpush3.bf16.msra.mxu1 %v3143_v8 }
  0x10   :  { %2243 = vmatprep.subr.bf16.mxu0 %v3048_v0  ;;  %2263 = vmatprep.subr.bf16.mxu1 %v3048_v0 }
  0x13   :  { %2244 = vmatpush3.bf16.msra.mxu0 %v3150_v9  ;;  %2264 = vmatpush3.bf16.msra.mxu1 %v3157_v10 }
  0x14   :  { %2245 = vmatprep.subr.bf16.mxu0 %v3048_v0  ;;  %2265 = vmatprep.subr.bf16.mxu1 %v3048_v0 }
  0x17   :  { %2246 = vmatpush3.bf16.msra.mxu0 %v3164_v11  ;;  %2266 = vmatpush3.bf16.msra.mxu1 %v3171_v12 }
  0x18   :  { %2247 = vmatprep.subr.bf16.mxu0 %v3048_v0  ;;  %2267 = vmatprep.subr.bf16.mxu1 %v3048_v0 }
  0x1b   :  { %2248 = vmatpush3.bf16.msra.mxu0 %v3178_v13  ;;  %2268 = vmatpush3.bf16.msra.mxu1 %v3185_v14 }
  0x1c   :  { %2249 = vmatprep.subr.bf16.mxu0 %v3048_v0  ;;  %2269 = vmatprep.subr.bf16.mxu1 %v3048_v0 }
  0x1f   :  { %2250 = vmatpush3.bf16.msra.mxu0 %v3190_v15  ;;  %2270 = vmatpush3.bf16.msra.mxu1 %v3202_v17 }
  0x20   :  { %2275 = vmatprep.subr.bf16.mxu0 %v3048_v0 }
  0x21   :  { %12 = vsyncpa [#allocation5], 0  ;;  %2295 = vmatprep.subr.bf16.mxu1 %v3048_v0  ;;  %v3223_v21 = vld [vmem:[%s4087_s3 + $0x28] ss:$16 sps:$4 sm:$0xff]   ;;  %v3232_v22 = vld [vmem:[%s4087_s3 + $0x2c] ss:$16 sps:$4 sm:$0xff]  }
  0x22   :  { %2252 = vmatmul.mubr.bf16.vlgmr.msra.gmra.mrb[0].mxu0 %v98_v18  ;;  %2272 = vmatmul.mubr.bf16.vlgmr.msra.gmra.mrb[0].mxu1 %v98_v18  ;;  %v3241_v23 = vld [vmem:[%s4087_s3 + $0x48] ss:$16 sps:$4 sm:$0xff]   ;;  %v3248_v24 = vld [vmem:[%s4087_s3 + $0x4c] ss:$16 sps:$4 sm:$0xff]   ;;  %v96_v43 = vld [vmem:[%s4084_s0] sm:$0xff]  ;;  %s3050_s8 = smov [#allocation4]  }
  0x23   :  { %2276 = vmatpush3.bf16.msra.mxu0 %v3209_v19  ;;  %2291 = vmatprep.mubr.msk.bf16.mxu0 %vm3049_vm0, %v3048_v0  ;;  %v3255_v25 = vld [vmem:[%s4087_s3 + $0x68] ss:$16 sps:$4 sm:$0xff]   ;;  %v3262_v26 = vld [vmem:[%s4087_s3 + $0x6c] ss:$16 sps:$4 sm:$0xff]   ;;  %v190_v44 = vrot.slane %v96_v43, 4  ;;  %v99_v46 = vunpack.c.l.bf16 %v96_v43  ;;  %s1882_s1 = sshll.u32 %s3050_s8, 4  ;;  %s1883_s1 = int_to_ptr.vmem [resolvable:$true] %s1882_s1 }
  0x24   :  { %2277 = vmatprep.subr.bf16.mxu0 %v3048_v0  ;;  %2296 = vmatpush3.bf16.msra.mxu1 %v3216_v20  ;;  %v3269_v27 = vld [vmem:[%s4087_s3 + $0x88] ss:$16 sps:$4 sm:$0xff]   ;;  %v3276_v28 = vld [vmem:[%s4087_s3 + $0x8c] ss:$16 sps:$4 sm:$0xff]   ;;  %s3024_s11 = scalar_lea.vmem %s1883_s1, 1024  ;;  %p3029_p1 = scmp.lt.s32.totalorder %s1883_s1, %s1883_s1 }
  0x25   :  { %2311 = vmatprep.mubr.msk.bf16.mxu1 %vm3049_vm0, %v3048_v0  ;;  %2297 = vmatprep.subr.bf16.mxu1 %v3048_v0  ;;  %v3283_v29 = vld [vmem:[%s4087_s3 + $0xa8] ss:$16 sps:$4 sm:$0xff]   ;;  %v3290_v30 = vld [vmem:[%s4087_s3 + $0xac] ss:$16 sps:$4 sm:$0xff]   ;;  %v192_v45 = vunpack.c.l.bf16 %v190_v44  ;;  %p3025_p0 = scmp.ne.s32.totalorder %s1883_s1, %s3024_s11  ;;  %p3030_p2 = scmp.lt.s32.totalorder %s3024_s11, %s3024_s11 }
  0x26   :  { %v3297_v31 = vld [vmem:[%s4087_s3 + $0xc8] ss:$16 sps:$4 sm:$0xff]   ;;  %v3304_v32 = vld [vmem:[%s4087_s3 + $0xcc] ss:$16 sps:$4 sm:$0xff]  }
  0x27   :  { %2278 = vmatpush3.bf16.msra.mxu0 %v3223_v21  ;;  %v3311_v33 = vld [vmem:[%s4087_s3 + $0xe8] ss:$16 sps:$4 sm:$0xff]   ;;  %v3318_v34 = vld [vmem:[%s4087_s3 + $0xec] ss:$16 sps:$4 sm:$0xff]   ;;  %p3031_p3 = por %p3030_p2, %p3029_p1 }
  0x28   :  { %2279 = vmatprep.subr.bf16.mxu0 %v3048_v0  ;;  %2298 = vmatpush3.bf16.msra.mxu1 %v3232_v22  ;;  %v97_v51 = vld [vmem:[%s4084_s0 + $0x8] sm:$0xff] }
  0x29   :  { %2299 = vmatprep.subr.bf16.mxu1 %v3048_v0  ;;  %v373_v52 = vrot.slane %v97_v51, 4  ;;  %v282_v53 = vunpack.c.l.bf16 %v97_v51  ;;  %p3032_p4 = pnand %p3031_p3, %p3025_p0 }
  0x2b   :  { %2280 = vmatpush3.bf16.msra.mxu0 %v3241_v23  ;;  %v375_v54 = vunpack.c.l.bf16 %v373_v52 }
  0x2c   :  { %2281 = vmatprep.subr.bf16.mxu0 %v3048_v0  ;;  %2300 = vmatpush3.bf16.msra.mxu1 %v3248_v24 }
  0x2d   :  { %2301 = vmatprep.subr.bf16.mxu1 %v3048_v0 }
  0x2f   :  { %2282 = vmatpush3.bf16.msra.mxu0 %v3255_v25 }
  0x30   :  { %2283 = vmatprep.subr.bf16.mxu0 %v3048_v0  ;;  %2302 = vmatpush3.bf16.msra.mxu1 %v3262_v26 }
  0x31   :  { %2303 = vmatprep.subr.bf16.mxu1 %v3048_v0 }
  0x33   :  { %2284 = vmatpush3.bf16.msra.mxu0 %v3269_v27 }
  0x34   :  { %2285 = vmatprep.subr.bf16.mxu0 %v3048_v0  ;;  %2304 = vmatpush3.bf16.msra.mxu1 %v3276_v28 }
  0x35   :  { %2305 = vmatprep.subr.bf16.mxu1 %v3048_v0 }
  0x37   :  { %2286 = vmatpush3.bf16.msra.mxu0 %v3283_v29 }
  0x38   :  { %2287 = vmatprep.subr.bf16.mxu0 %v3048_v0  ;;  %2306 = vmatpush3.bf16.msra.mxu1 %v3290_v30 }
  0x39   :  { %2307 = vmatprep.subr.bf16.mxu1 %v3048_v0 }
  0x3b   :  { %2288 = vmatpush3.bf16.msra.mxu0 %v3297_v31 }
  0x3c   :  { %2289 = vmatprep.subr.bf16.mxu0 %v3048_v0  ;;  %2308 = vmatpush3.bf16.msra.mxu1 %v3304_v32 }
  0x3d   :  { %2309 = vmatprep.subr.bf16.mxu1 %v3048_v0 }
  0x3f   :  { %2290 = vmatpush3.bf16.msra.mxu0 %v3311_v33 }
  0x40   :  { %2315 = vmatprep.subr.bf16.mxu0 %v3048_v0  ;;  %2310 = vmatpush3.bf16.msra.mxu1 %v3318_v34 }
  0x41   :  { %2335 = vmatprep.subr.bf16.mxu1 %v3048_v0 }
  0x42   :  { %2292 = vmatmul.mubr.bf16.vlgmr.msra.gmra.mrb[4].mxu0 %v98_v18 }
  0x43   :  { %2316 = vmatpush3.bf16.msra.mxu0 %v3092_v1  ;;  %2331 = vmatprep.mubr.msk.bf16.mxu0 %vm3049_vm0, %v3048_v0 }
  0x44   :  { %2312 = vmatmul.mubr.bf16.vlgmr.msra.gmra.mrb[4].mxu1 %v98_v18  ;;  %2317 = vmatprep.subr.bf16.mxu0 %v3048_v0 }
  0x45   :  { %2336 = vmatpush3.bf16.msra.mxu1 %v3108_v3  ;;  %2351 = vmatprep.mubr.msk.bf16.mxu1 %vm3049_vm0, %v3048_v0 }
  0x46   :  { %2337 = vmatprep.subr.bf16.mxu1 %v3048_v0 }
  0x47   :  { %2318 = vmatpush3.bf16.msra.mxu0 %v3098_v2 }
  0x48   :  { %2319 = vmatprep.subr.bf16.mxu0 %v3048_v0 }
  0x49   :  { %2338 = vmatpush3.bf16.msra.mxu1 %v3115_v4 }
  0x4a   :  { %2339 = vmatprep.subr.bf16.mxu1 %v3048_v0 }
  0x4b   :  { %2320 = vmatpush3.bf16.msra.mxu0 %v3122_v5 }
  0x4c   :  { %2321 = vmatprep.subr.bf16.mxu0 %v3048_v0 }
  0x4d   :  { %2340 = vmatpush3.bf16.msra.mxu1 %v3129_v6 }
  0x4e   :  { %2341 = vmatprep.subr.bf16.mxu1 %v3048_v0 }
  0x4f   :  { %2322 = vmatpush3.bf16.msra.mxu0 %v3136_v7 }
  0x50   :  { %2323 = vmatprep.subr.bf16.mxu0 %v3048_v0 }
  0x51   :  { %2342 = vmatpush3.bf16.msra.mxu1 %v3143_v8 }
  0x52   :  { %2343 = vmatprep.subr.bf16.mxu1 %v3048_v0 }
  0x53   :  { %2324 = vmatpush3.bf16.msra.mxu0 %v3150_v9 }
  0x54   :  { %2325 = vmatprep.subr.bf16.mxu0 %v3048_v0 }
  0x55   :  { %2344 = vmatpush3.bf16.msra.mxu1 %v3157_v10 }
  0x56   :  { %2345 = vmatprep.subr.bf16.mxu1 %v3048_v0 }
  0x57   :  { %2326 = vmatpush3.bf16.msra.mxu0 %v3164_v11 }
  0x58   :  { %2327 = vmatprep.subr.bf16.mxu0 %v3048_v0 }
  0x59   :  { %2346 = vmatpush3.bf16.msra.mxu1 %v3171_v12 }
  0x5a   :  { %2347 = vmatprep.subr.bf16.mxu1 %v3048_v0 }
  0x5b   :  { %2328 = vmatpush3.bf16.msra.mxu0 %v3178_v13 }
  0x5c   :  { %2329 = vmatprep.subr.bf16.mxu0 %v3048_v0 }
  0x5d   :  { %2348 = vmatpush3.bf16.msra.mxu1 %v3185_v14 }
  0x5e   :  { %2349 = vmatprep.subr.bf16.mxu1 %v3048_v0 }
  0x5f   :  { %2330 = vmatpush3.bf16.msra.mxu0 %v3190_v15 }
  0x60   :  { %2355 = vmatprep.subr.bf16.mxu0 %v3048_v0 }
  0x61   :  { %2350 = vmatpush3.bf16.msra.mxu1 %v3202_v17 }
  0x62   :  { %2375 = vmatprep.subr.bf16.mxu1 %v3048_v0 }
  0xf5   :  { %v182_v35 = vpop.f32.mrb[0].mxu0  ;;  %v275_v38 = vpop.f32.mrb[0].mxu1 }
  0xf6   :  { %v2253_v36 = vpop.f32.mrb[1].mxu0  ;;  %v2273_v40 = vpop.f32.mrb[1].mxu1  ;;  %v281_v47 = vadd.f32 %v275_v38, %v192_v45  ;;  %v188_v48 = vadd.f32 %v182_v35, %v99_v46 }
  0xf7   :  { %v185_v37 = vpop.f32.mrb[2].mxu0  ;;  %v278_v41 = vpop.f32.mrb[2].mxu1  ;;  %v28_v40 = vld [vmem:[%s4086_s2] sm:$0xff] }
  0xf8   :  { %v2254_v39 = vpop.f32.mrb[3].mxu0  ;;  %v2274_v42 = vpop.f32.mrb[3].mxu1  ;;  %v469_v49 = vmul.f32 0.5, %v281_v47  ;;  %v465_v50 = vmul.f32 0.5, %v188_v48 }
  0xfa   :  { %2912 = vtanh.f32 %v469_v49 }
  0xfb   :  { %2914 = vtanh.f32 %v465_v50 }
 0x104   :  { %v2913_v60 = vpop.eup %2912 }
 0x105   :  { %v2915_v18 = vpop.eup %2914  ;;  %v471_v37 = vmul.f32 0.5, %v2913_v60  ;;  %v1933_v60 = vld [vmem:[%s4084_s0 + $0x10] sm:$0xff] }
 0x106   :  { %v467_v38 = vmul.f32 0.5, %v2915_v18 }
 0x107   :  { %v472_v39 = vadd.f32 0.5, %v471_v37  ;;  %v1934_v37 = vld [vmem:[%s4084_s0 + $0x18] sm:$0xff] }
 0x108   :  { %v468_v41 = vadd.f32 0.5, %v467_v38  ;;  %v618_v38 = vrot.slane %v1934_v37, 4 }
 0x109   :  { %v478_v43 = vmul.f32 %v472_v39, %v28_v40  ;;  %v575_v39 = vunpack.c.l.bf16 %v1934_v37 }
 0x10a   :  { %v620_v40 = vunpack.c.l.bf16 %v618_v38 }
 0x115   :  { %v365_v55 = vpop.f32.mrb[4].mxu0 }
 0x116   :  { %v371_v56 = vadd.f32 %v365_v55, %v282_v53  ;;  %v2293_v57 = vpop.f32.mrb[5].mxu0 }
 0x117   :  { %v368_v58 = vpop.f32.mrb[6].mxu0  ;;  %v458_v59 = vpop.f32.mrb[4].mxu1 }
 0x118   :  { %2916 = vtanh.f32 %v371_v56  ;;  %v2294_v61 = vpop.f32.mrb[7].mxu0  ;;  %v464_v62 = vadd.f32 %v458_v59, %v375_v54  ;;  %v2313_v63 = vpop.f32.mrb[5].mxu1 }
 0x119   :  { %v461_v16 = vpop.f32.mrb[6].mxu1  ;;  %v531_v61 = vrot.slane %v1933_v60, 4  ;;  %v488_v63 = vunpack.c.l.bf16 %v1933_v60 }
 0x11a   :  { %v474_v35 = vmul.f32 0.5, %v464_v62  ;;  %v2314_v36 = vpop.f32.mrb[7].mxu1 }
 0x11b   :  { %v533_v62 = vunpack.c.l.bf16 %v531_v61 }
 0x11c   :  { %2918 = vtanh.f32 %v474_v35 }
 0x122   :  { %v2917_v42 = vpop.eup %2916 }
 0x123   :  { %v479_v44 = vmul.f32 %v2917_v42, %v468_v41 }
 0x125   :  { %v3370_v45 = vadd.f32 %v479_v44, %v478_v43 }
 0x126   :  { %v2919_v46 = vpop.eup %2918 }
 0x127   :  { %2920 = vtanh.f32 %v3370_v45  ;;  %v476_v47 = vmul.f32 0.5, %v2919_v46 }
 0x129   :  { %v477_v48 = vadd.f32 0.5, %v476_v47 }
 0x131   :  { %v2921_v49 = vpop.eup %2920 }
 0x132   :  { %v482_v50 = vmul.f32 %v2921_v49, %v477_v48 }
 0x134   :  { %483 = vst [vmem:[#allocation4] sm:$0xff] %v482_v50  ;;  %v487_v51 = vpack.c.bf16 %v482_v50, %v482_v50 }
 0x136   :  { %2332 = vmatmul.mubr.bf16.vlgmr.msra.gmra.mrb[8].mxu0 %v487_v51  ;;  %2352 = vmatmul.mubr.bf16.vlgmr.msra.gmra.mrb[8].mxu1 %v487_v51 }
 0x137   :  { %2356 = vmatpush3.bf16.msra.mxu0 %v3209_v19  ;;  %2376 = vmatpush3.bf16.msra.mxu1 %v3216_v20 }
 0x138   :  { %2357 = vmatprep.subr.bf16.mxu0 %v3048_v0  ;;  %2377 = vmatprep.subr.bf16.mxu1 %v3048_v0 }
 0x139   :  { %2371 = vmatprep.mubr.msk.bf16.mxu0 %vm3049_vm0, %v3048_v0  ;;  %2391 = vmatprep.mubr.msk.bf16.mxu1 %vm3049_vm0, %v3048_v0 }
 0x13b   :  { %2358 = vmatpush3.bf16.msra.mxu0 %v3223_v21  ;;  %2378 = vmatpush3.bf16.msra.mxu1 %v3232_v22 }
 0x13c   :  { %2359 = vmatprep.subr.bf16.mxu0 %v3048_v0  ;;  %2379 = vmatprep.subr.bf16.mxu1 %v3048_v0 }
 0x13f   :  { %2360 = vmatpush3.bf16.msra.mxu0 %v3241_v23  ;;  %2380 = vmatpush3.bf16.msra.mxu1 %v3248_v24 }
 0x140   :  { %2361 = vmatprep.subr.bf16.mxu0 %v3048_v0  ;;  %2381 = vmatprep.subr.bf16.mxu1 %v3048_v0 }
 0x143   :  { %2362 = vmatpush3.bf16.msra.mxu0 %v3255_v25  ;;  %2382 = vmatpush3.bf16.msra.mxu1 %v3262_v26 }
 0x144   :  { %2363 = vmatprep.subr.bf16.mxu0 %v3048_v0  ;;  %2383 = vmatprep.subr.bf16.mxu1 %v3048_v0 }
 0x147   :  { %2364 = vmatpush3.bf16.msra.mxu0 %v3269_v27  ;;  %2384 = vmatpush3.bf16.msra.mxu1 %v3276_v28 }
 0x148   :  { %2365 = vmatprep.subr.bf16.mxu0 %v3048_v0  ;;  %2385 = vmatprep.subr.bf16.mxu1 %v3048_v0 }
 0x14b   :  { %2366 = vmatpush3.bf16.msra.mxu0 %v3283_v29  ;;  %2386 = vmatpush3.bf16.msra.mxu1 %v3290_v30 }
 0x14c   :  { %2367 = vmatprep.subr.bf16.mxu0 %v3048_v0  ;;  %2387 = vmatprep.subr.bf16.mxu1 %v3048_v0 }
 0x14f   :  { %2368 = vmatpush3.bf16.msra.mxu0 %v3297_v31  ;;  %2388 = vmatpush3.bf16.msra.mxu1 %v3304_v32 }
 0x150   :  { %2369 = vmatprep.subr.bf16.mxu0 %v3048_v0  ;;  %2389 = vmatprep.subr.bf16.mxu1 %v3048_v0 }
 0x153   :  { %2370 = vmatpush3.bf16.msra.mxu0 %v3311_v33  ;;  %2390 = vmatpush3.bf16.msra.mxu1 %v3318_v34 }
 0x154   :  { %2395 = vmatprep.subr.bf16.mxu0 %v3048_v0  ;;  %2415 = vmatprep.subr.bf16.mxu1 %v3048_v0 }
 0x156   :  { %2372 = vmatmul.mubr.bf16.vlgmr.msra.gmra.mrb[12].mxu0 %v487_v51  ;;  %2392 = vmatmul.mubr.bf16.vlgmr.msra.gmra.mrb[12].mxu1 %v487_v51 }
 0x157   :  { %2396 = vmatpush3.bf16.msra.mxu0 %v3092_v1  ;;  %2416 = vmatpush3.bf16.msra.mxu1 %v3108_v3 }
 0x158   :  { %2397 = vmatprep.subr.bf16.mxu0 %v3048_v0  ;;  %2417 = vmatprep.subr.bf16.mxu1 %v3048_v0 }
 0x159   :  { %2411 = vmatprep.mubr.msk.bf16.mxu0 %vm3049_vm0, %v3048_v0  ;;  %2431 = vmatprep.mubr.msk.bf16.mxu1 %vm3049_vm0, %v3048_v0 }
 0x15b   :  { %2398 = vmatpush3.bf16.msra.mxu0 %v3098_v2  ;;  %2418 = vmatpush3.bf16.msra.mxu1 %v3115_v4 }
 0x15c   :  { %2399 = vmatprep.subr.bf16.mxu0 %v3048_v0  ;;  %2419 = vmatprep.subr.bf16.mxu1 %v3048_v0 }
 0x15f   :  { %2400 = vmatpush3.bf16.msra.mxu0 %v3122_v5  ;;  %2420 = vmatpush3.bf16.msra.mxu1 %v3129_v6 }
 0x160   :  { %2401 = vmatprep.subr.bf16.mxu0 %v3048_v0  ;;  %2421 = vmatprep.subr.bf16.mxu1 %v3048_v0 }
 0x163   :  { %2402 = vmatpush3.bf16.msra.mxu0 %v3136_v7  ;;  %2422 = vmatpush3.bf16.msra.mxu1 %v3143_v8 }
 0x164   :  { %2403 = vmatprep.subr.bf16.mxu0 %v3048_v0  ;;  %2423 = vmatprep.subr.bf16.mxu1 %v3048_v0 }
 0x167   :  { %2404 = vmatpush3.bf16.msra.mxu0 %v3150_v9  ;;  %2424 = vmatpush3.bf16.msra.mxu1 %v3157_v10 }
 0x168   :  { %2405 = vmatprep.subr.bf16.mxu0 %v3048_v0  ;;  %2425 = vmatprep.subr.bf16.mxu1 %v3048_v0 }
 0x16b   :  { %2406 = vmatpush3.bf16.msra.mxu0 %v3164_v11  ;;  %2426 = vmatpush3.bf16.msra.mxu1 %v3171_v12 }
 0x16c   :  { %2407 = vmatprep.subr.bf16.mxu0 %v3048_v0  ;;  %2427 = vmatprep.subr.bf16.mxu1 %v3048_v0 }
 0x16f   :  { %2408 = vmatpush3.bf16.msra.mxu0 %v3178_v13  ;;  %2428 = vmatpush3.bf16.msra.mxu1 %v3185_v14 }
 0x170   :  { %2409 = vmatprep.subr.bf16.mxu0 %v3048_v0  ;;  %2429 = vmatprep.subr.bf16.mxu1 %v3048_v0 }
 0x173   :  { %2410 = vmatpush3.bf16.msra.mxu0 %v3190_v15  ;;  %2430 = vmatpush3.bf16.msra.mxu1 %v3202_v17 }
 0x174   :  { %2435 = vmatprep.subr.bf16.mxu0 %v3048_v0  ;;  %2455 = vmatprep.subr.bf16.mxu1 %v3048_v0 }
 0x209   :  { %v523_v52 = vpop.f32.mrb[8].mxu0  ;;  %v568_v53 = vpop.f32.mrb[8].mxu1 }
 0x20a   :  { %v2333_v54 = vpop.f32.mrb[9].mxu0  ;;  %v2353_v55 = vpop.f32.mrb[9].mxu1  ;;  %v574_v16 = vadd.f32 %v568_v53, %v533_v62  ;;  %v529_v18 = vadd.f32 %v523_v52, %v488_v63 }
 0x20b   :  { %v526_v56 = vpop.f32.mrb[10].mxu0  ;;  %v571_v57 = vpop.f32.mrb[10].mxu1 }
 0x20c   :  { %v2334_v58 = vpop.f32.mrb[11].mxu0  ;;  %v2354_v59 = vpop.f32.mrb[11].mxu1  ;;  %v666_v35 = vmul.f32 0.5, %v574_v16  ;;  %v662_v36 = vmul.f32 0.5, %v529_v18 }
 0x20e   :  { %2922 = vtanh.f32 %v666_v35 }
 0x20f   :  { %2924 = vtanh.f32 %v662_v36 }
 0x218   :  { %v2923_v50 = vpop.eup %2922 }
 0x219   :  { %v2925_v53 = vpop.eup %2924  ;;  %v668_v54 = vmul.f32 0.5, %v2923_v50 }
 0x21a   :  { %v664_v56 = vmul.f32 0.5, %v2925_v53 }
 0x21b   :  { %v669_v57 = vadd.f32 0.5, %v668_v54 }
 0x21c   :  { %v665_v58 = vadd.f32 0.5, %v664_v56 }
 0x21d   :  { %v675_v60 = vmul.f32 %v669_v57, %v3370_v45 }
 0x229   :  { %v610_v41 = vpop.f32.mrb[12].mxu0  ;;  %v655_v42 = vpop.f32.mrb[12].mxu1 }
 0x22a   :  { %v616_v43 = vadd.f32 %v610_v41, %v575_v39  ;;  %v2373_v44 = vpop.f32.mrb[13].mxu0  ;;  %v2393_v46 = vpop.f32.mrb[13].mxu1  ;;  %v661_v47 = vadd.f32 %v655_v42, %v620_v40 }
 0x22b   :  { %v613_v48 = vpop.f32.mrb[14].mxu0  ;;  %v658_v49 = vpop.f32.mrb[14].mxu1  ;;  %v1936_v44 = vld [vmem:[%s4084_s0 + $0x28] sm:$0xff] }
 0x22c   :  { %2926 = vtanh.f32 %v616_v43  ;;  %v2374_v51 = vpop.f32.mrb[15].mxu0  ;;  %v2394_v52 = vpop.f32.mrb[15].mxu1  ;;  %v671_v55 = vmul.f32 0.5, %v661_v47  ;;  %v816_v46 = vrot.slane %v1936_v44, 4  ;;  %v773_v47 = vunpack.c.l.bf16 %v1936_v44  ;;  %v1938_v44 = vld [vmem:[%s4084_s0 + $0x38] sm:$0xff] }
 0x22e   :  { %2928 = vtanh.f32 %v671_v55  ;;  %v818_v48 = vunpack.c.l.bf16 %v816_v46  ;;  %v1014_v46 = vrot.slane %v1938_v44, 4 }
 0x236   :  { %v2927_v59 = vpop.eup %2926 }
 0x237   :  { %v676_v61 = vmul.f32 %v2927_v59, %v665_v58 }
 0x238   :  { %v2929_v63 = vpop.eup %2928 }
 0x239   :  { %v3452_v62 = vadd.f32 %v676_v61, %v675_v60  ;;  %v673_v16 = vmul.f32 0.5, %v2929_v63 }
 0x23b   :  { %2930 = vtanh.f32 %v3452_v62  ;;  %v674_v18 = vadd.f32 0.5, %v673_v16 }
 0x245   :  { %v2931_v35 = vpop.eup %2930 }
 0x246   :  { %v679_v36 = vmul.f32 %v2931_v35, %v674_v18 }
 0x248   :  { %681 = vst [vmem:[#allocation4 + $0x8] sm:$0xff] %v679_v36  ;;  %v685_v37 = vpack.c.bf16 %v679_v36, %v679_v36 }
 0x24a   :  { %2412 = vmatmul.mubr.bf16.vlgmr.msra.gmra.mrb[16].mxu0 %v685_v37  ;;  %2432 = vmatmul.mubr.bf16.vlgmr.msra.gmra.mrb[16].mxu1 %v685_v37 }
 0x24b   :  { %2436 = vmatpush3.bf16.msra.mxu0 %v3209_v19  ;;  %2456 = vmatpush3.bf16.msra.mxu1 %v3216_v20 }
 0x24c   :  { %2437 = vmatprep.subr.bf16.mxu0 %v3048_v0  ;;  %2457 = vmatprep.subr.bf16.mxu1 %v3048_v0 }
 0x24d   :  { %2451 = vmatprep.mubr.msk.bf16.mxu0 %vm3049_vm0, %v3048_v0  ;;  %2471 = vmatprep.mubr.msk.bf16.mxu1 %vm3049_vm0, %v3048_v0 }
 0x24f   :  { %2438 = vmatpush3.bf16.msra.mxu0 %v3223_v21  ;;  %2458 = vmatpush3.bf16.msra.mxu1 %v3232_v22 }
 0x250   :  { %2439 = vmatprep.subr.bf16.mxu0 %v3048_v0  ;;  %2459 = vmatprep.subr.bf16.mxu1 %v3048_v0 }
 0x253   :  { %2440 = vmatpush3.bf16.msra.mxu0 %v3241_v23  ;;  %2460 = vmatpush3.bf16.msra.mxu1 %v3248_v24 }
 0x254   :  { %2441 = vmatprep.subr.bf16.mxu0 %v3048_v0  ;;  %2461 = vmatprep.subr.bf16.mxu1 %v3048_v0 }
 0x257   :  { %2442 = vmatpush3.bf16.msra.mxu0 %v3255_v25  ;;  %2462 = vmatpush3.bf16.msra.mxu1 %v3262_v26 }
 0x258   :  { %2443 = vmatprep.subr.bf16.mxu0 %v3048_v0  ;;  %2463 = vmatprep.subr.bf16.mxu1 %v3048_v0 }
 0x25b   :  { %2444 = vmatpush3.bf16.msra.mxu0 %v3269_v27  ;;  %2464 = vmatpush3.bf16.msra.mxu1 %v3276_v28 }
 0x25c   :  { %2445 = vmatprep.subr.bf16.mxu0 %v3048_v0  ;;  %2465 = vmatprep.subr.bf16.mxu1 %v3048_v0 }
 0x25f   :  { %2446 = vmatpush3.bf16.msra.mxu0 %v3283_v29  ;;  %2466 = vmatpush3.bf16.msra.mxu1 %v3290_v30 }
 0x260   :  { %2447 = vmatprep.subr.bf16.mxu0 %v3048_v0  ;;  %2467 = vmatprep.subr.bf16.mxu1 %v3048_v0 }
 0x263   :  { %2448 = vmatpush3.bf16.msra.mxu0 %v3297_v31  ;;  %2468 = vmatpush3.bf16.msra.mxu1 %v3304_v32 }
 0x264   :  { %2449 = vmatprep.subr.bf16.mxu0 %v3048_v0  ;;  %2469 = vmatprep.subr.bf16.mxu1 %v3048_v0 }
 0x267   :  { %2450 = vmatpush3.bf16.msra.mxu0 %v3311_v33  ;;  %2470 = vmatpush3.bf16.msra.mxu1 %v3318_v34 }
 0x268   :  { %2475 = vmatprep.subr.bf16.mxu0 %v3048_v0  ;;  %2495 = vmatprep.subr.bf16.mxu1 %v3048_v0 }
 0x26a   :  { %2452 = vmatmul.mubr.bf16.vlgmr.msra.gmra.mrb[20].mxu0 %v685_v37  ;;  %2472 = vmatmul.mubr.bf16.vlgmr.msra.gmra.mrb[20].mxu1 %v685_v37 }
 0x26b   :  { %2476 = vmatpush3.bf16.msra.mxu0 %v3092_v1  ;;  %2496 = vmatpush3.bf16.msra.mxu1 %v3108_v3 }
 0x26c   :  { %2477 = vmatprep.subr.bf16.mxu0 %v3048_v0  ;;  %2497 = vmatprep.subr.bf16.mxu1 %v3048_v0 }
 0x26d   :  { %2491 = vmatprep.mubr.msk.bf16.mxu0 %vm3049_vm0, %v3048_v0  ;;  %2511 = vmatprep.mubr.msk.bf16.mxu1 %vm3049_vm0, %v3048_v0 }
 0x26f   :  { %2478 = vmatpush3.bf16.msra.mxu0 %v3098_v2  ;;  %2498 = vmatpush3.bf16.msra.mxu1 %v3115_v4 }
 0x270   :  { %2479 = vmatprep.subr.bf16.mxu0 %v3048_v0  ;;  %2499 = vmatprep.subr.bf16.mxu1 %v3048_v0 }
 0x273   :  { %2480 = vmatpush3.bf16.msra.mxu0 %v3122_v5  ;;  %2500 = vmatpush3.bf16.msra.mxu1 %v3129_v6 }
 0x274   :  { %2481 = vmatprep.subr.bf16.mxu0 %v3048_v0  ;;  %2501 = vmatprep.subr.bf16.mxu1 %v3048_v0 }
 0x277   :  { %2482 = vmatpush3.bf16.msra.mxu0 %v3136_v7  ;;  %2502 = vmatpush3.bf16.msra.mxu1 %v3143_v8 }
 0x278   :  { %2483 = vmatprep.subr.bf16.mxu0 %v3048_v0  ;;  %2503 = vmatprep.subr.bf16.mxu1 %v3048_v0 }
 0x27b   :  { %2484 = vmatpush3.bf16.msra.mxu0 %v3150_v9  ;;  %2504 = vmatpush3.bf16.msra.mxu1 %v3157_v10  ;;  %v1935_v9 = vld [vmem:[%s4084_s0 + $0x20] sm:$0xff] }
 0x27c   :  { %2485 = vmatprep.subr.bf16.mxu0 %v3048_v0  ;;  %2505 = vmatprep.subr.bf16.mxu1 %v3048_v0  ;;  %v729_v45 = vrot.slane %v1935_v9, 4  ;;  %v686_v39 = vunpack.c.l.bf16 %v1935_v9 }
 0x27e   :  { %v731_v38 = vunpack.c.l.bf16 %v729_v45 }
 0x27f   :  { %2486 = vmatpush3.bf16.msra.mxu0 %v3164_v11  ;;  %2506 = vmatpush3.bf16.msra.mxu1 %v3171_v12 }
 0x280   :  { %2487 = vmatprep.subr.bf16.mxu0 %v3048_v0  ;;  %2507 = vmatprep.subr.bf16.mxu1 %v3048_v0 }
 0x283   :  { %2488 = vmatpush3.bf16.msra.mxu0 %v3178_v13  ;;  %2508 = vmatpush3.bf16.msra.mxu1 %v3185_v14 }
 0x284   :  { %2489 = vmatprep.subr.bf16.mxu0 %v3048_v0  ;;  %2509 = vmatprep.subr.bf16.mxu1 %v3048_v0 }
 0x287   :  { %2490 = vmatpush3.bf16.msra.mxu0 %v3190_v15  ;;  %2510 = vmatpush3.bf16.msra.mxu1 %v3202_v17 }
 0x288   :  { %2515 = vmatprep.subr.bf16.mxu0 %v3048_v0  ;;  %2535 = vmatprep.subr.bf16.mxu1 %v3048_v0 }
 0x31d   :  { %v721_v1 = vpop.f32.mrb[16].mxu0  ;;  %v766_v2 = vpop.f32.mrb[16].mxu1 }
 0x31e   :  { %v2413_v3 = vpop.f32.mrb[17].mxu0  ;;  %v2433_v4 = vpop.f32.mrb[17].mxu1  ;;  %v772_v40 = vadd.f32 %v766_v2, %v731_v38  ;;  %v727_v41 = vadd.f32 %v721_v1, %v686_v39  ;;  %v1937_v38 = vld [vmem:[%s4084_s0 + $0x30] sm:$0xff] }
 0x31f   :  { %v724_v5 = vpop.f32.mrb[18].mxu0  ;;  %v769_v6 = vpop.f32.mrb[18].mxu1  ;;  %v927_v39 = vrot.slane %v1937_v38, 4 }
 0x320   :  { %v2414_v7 = vpop.f32.mrb[19].mxu0  ;;  %v2434_v8 = vpop.f32.mrb[19].mxu1  ;;  %v864_v42 = vmul.f32 0.5, %v772_v40  ;;  %v860_v43 = vmul.f32 0.5, %v727_v41  ;;  %v884_v40 = vunpack.c.l.bf16 %v1937_v38  ;;  %v3727_v38 = vld [vmem:[%s4087_s3 + $0x88] ss:$16 sps:$4 sm:$0xff]  }
 0x322   :  { %2932 = vtanh.f32 %v864_v42 }
 0x323   :  { %2934 = vtanh.f32 %v860_v43 }
 0x32c   :  { %v2933_v57 = vpop.eup %2932 }
 0x32d   :  { %v2935_v60 = vpop.eup %2934  ;;  %v866_v61 = vmul.f32 0.5, %v2933_v57 }
 0x32e   :  { %v862_v16 = vmul.f32 0.5, %v2935_v60 }
 0x32f   :  { %v867_v18 = vadd.f32 0.5, %v866_v61 }
 0x330   :  { %v863_v35 = vadd.f32 0.5, %v862_v16 }
 0x331   :  { %v873_v37 = vmul.f32 %v867_v18, %v3452_v62 }
 0x33d   :  { %v808_v49 = vpop.f32.mrb[20].mxu0  ;;  %v853_v50 = vpop.f32.mrb[20].mxu1 }
 0x33e   :  { %v814_v51 = vadd.f32 %v808_v49, %v773_v47  ;;  %v2453_v52 = vpop.f32.mrb[21].mxu0  ;;  %v2473_v53 = vpop.f32.mrb[21].mxu1  ;;  %v859_v54 = vadd.f32 %v853_v50, %v818_v48  ;;  %v971_v47 = vunpack.c.l.bf16 %v1938_v44  ;;  %v1016_v48 = vunpack.c.l.bf16 %v1014_v46  ;;  %v1939_v46 = vld [vmem:[%s4084_s0 + $0x40] sm:$0xff] }
 0x33f   :  { %v811_v55 = vpop.f32.mrb[22].mxu0  ;;  %v856_v56 = vpop.f32.mrb[22].mxu1 }
 0x340   :  { %2936 = vtanh.f32 %v814_v51  ;;  %v2454_v58 = vpop.f32.mrb[23].mxu0  ;;  %v2474_v59 = vpop.f32.mrb[23].mxu1  ;;  %v869_v63 = vmul.f32 0.5, %v859_v54 }
 0x342   :  { %2938 = vtanh.f32 %v869_v63 }
 0x34a   :  { %v2937_v36 = vpop.eup %2936 }
 0x34b   :  { %v874_v1 = vmul.f32 %v2937_v36, %v863_v35 }
 0x34c   :  { %v2939_v3 = vpop.eup %2938 }
 0x34d   :  { %v3534_v2 = vadd.f32 %v874_v1, %v873_v37  ;;  %v871_v4 = vmul.f32 0.5, %v2939_v3 }
 0x34f   :  { %2940 = vtanh.f32 %v3534_v2  ;;  %v872_v5 = vadd.f32 0.5, %v871_v4 }
 0x359   :  { %v2941_v6 = vpop.eup %2940 }
 0x35a   :  { %v877_v7 = vmul.f32 %v2941_v6, %v872_v5 }
 0x35c   :  { %879 = vst [vmem:[#allocation4 + $0x10] sm:$0xff] %v877_v7  ;;  %v883_v8 = vpack.c.bf16 %v877_v7, %v877_v7 }
 0x35e   :  { %2492 = vmatmul.mubr.bf16.vlgmr.msra.gmra.mrb[24].mxu0 %v883_v8  ;;  %2512 = vmatmul.mubr.bf16.vlgmr.msra.gmra.mrb[24].mxu1 %v883_v8 }
 0x35f   :  { %2516 = vmatpush3.bf16.msra.mxu0 %v3209_v19  ;;  %2536 = vmatpush3.bf16.msra.mxu1 %v3216_v20  ;;  %v3576_v19 = vld [vmem:[%s4087_s3] ss:$16 sps:$4 sm:$0xff]   ;;  %v3582_v20 = vld [vmem:[%s4087_s3 + $0x4] ss:$16 sps:$4 sm:$0xff]  }
 0x360   :  { %2517 = vmatprep.subr.bf16.mxu0 %v3048_v0  ;;  %2537 = vmatprep.subr.bf16.mxu1 %v3048_v0 }
 0x361   :  { %2531 = vmatprep.mubr.msk.bf16.mxu0 %vm3049_vm0, %v3048_v0  ;;  %2551 = vmatprep.mubr.msk.bf16.mxu1 %vm3049_vm0, %v3048_v0 }
 0x363   :  { %2518 = vmatpush3.bf16.msra.mxu0 %v3223_v21  ;;  %2538 = vmatpush3.bf16.msra.mxu1 %v3232_v22  ;;  %v3594_v21 = vld [vmem:[%s4087_s3 + $0x20] ss:$16 sps:$4 sm:$0xff]   ;;  %v3600_v22 = vld [vmem:[%s4087_s3 + $0x24] ss:$16 sps:$4 sm:$0xff]  }
 0x364   :  { %2519 = vmatprep.subr.bf16.mxu0 %v3048_v0  ;;  %2539 = vmatprep.subr.bf16.mxu1 %v3048_v0 }
 0x367   :  { %2520 = vmatpush3.bf16.msra.mxu0 %v3241_v23  ;;  %2540 = vmatpush3.bf16.msra.mxu1 %v3248_v24  ;;  %v3608_v23 = vld [vmem:[%s4087_s3 + $0x40] ss:$16 sps:$4 sm:$0xff]   ;;  %v3614_v24 = vld [vmem:[%s4087_s3 + $0x44] ss:$16 sps:$4 sm:$0xff]  }
 0x368   :  { %2521 = vmatprep.subr.bf16.mxu0 %v3048_v0  ;;  %2541 = vmatprep.subr.bf16.mxu1 %v3048_v0 }
 0x36b   :  { %2522 = vmatpush3.bf16.msra.mxu0 %v3255_v25  ;;  %2542 = vmatpush3.bf16.msra.mxu1 %v3262_v26  ;;  %v3622_v25 = vld [vmem:[%s4087_s3 + $0x60] ss:$16 sps:$4 sm:$0xff]   ;;  %v3628_v26 = vld [vmem:[%s4087_s3 + $0x64] ss:$16 sps:$4 sm:$0xff]  }
 0x36c   :  { %2523 = vmatprep.subr.bf16.mxu0 %v3048_v0  ;;  %2543 = vmatprep.subr.bf16.mxu1 %v3048_v0 }
 0x36f   :  { %2524 = vmatpush3.bf16.msra.mxu0 %v3269_v27  ;;  %2544 = vmatpush3.bf16.msra.mxu1 %v3276_v28  ;;  %v3636_v27 = vld [vmem:[%s4087_s3 + $0x80] ss:$16 sps:$4 sm:$0xff]  }
 0x370   :  { %2525 = vmatprep.subr.bf16.mxu0 %v3048_v0  ;;  %2545 = vmatprep.subr.bf16.mxu1 %v3048_v0 }
 0x373   :  { %2526 = vmatpush3.bf16.msra.mxu0 %v3283_v29  ;;  %2546 = vmatpush3.bf16.msra.mxu1 %v3290_v30 }
 0x374   :  { %2527 = vmatprep.subr.bf16.mxu0 %v3048_v0  ;;  %2547 = vmatprep.subr.bf16.mxu1 %v3048_v0 }
 0x377   :  { %2528 = vmatpush3.bf16.msra.mxu0 %v3297_v31  ;;  %2548 = vmatpush3.bf16.msra.mxu1 %v3304_v32 }
 0x378   :  { %2529 = vmatprep.subr.bf16.mxu0 %v3048_v0  ;;  %2549 = vmatprep.subr.bf16.mxu1 %v3048_v0 }
 0x37b   :  { %2530 = vmatpush3.bf16.msra.mxu0 %v3311_v33  ;;  %2550 = vmatpush3.bf16.msra.mxu1 %v3318_v34 }
 0x37c   :  { %2555 = vmatprep.subr.bf16.mxu0 %v3048_v0  ;;  %2575 = vmatprep.subr.bf16.mxu1 %v3048_v0 }
 0x37e   :  { %2532 = vmatmul.mubr.bf16.vlgmr.msra.gmra.mrb[28].mxu0 %v883_v8  ;;  %2552 = vmatmul.mubr.bf16.vlgmr.msra.gmra.mrb[28].mxu1 %v883_v8 }
 0x37f   :  { %2556 = vmatpush3.bf16.msra.mxu0 %v3576_v19  ;;  %2576 = vmatpush3.bf16.msra.mxu1 %v3582_v20 }
 0x380   :  { %2557 = vmatprep.subr.bf16.mxu0 %v3048_v0  ;;  %2577 = vmatprep.subr.bf16.mxu1 %v3048_v0 }
 0x381   :  { %2571 = vmatprep.mubr.msk.bf16.mxu0 %vm3049_vm0, %v3048_v0  ;;  %2591 = vmatprep.mubr.msk.bf16.mxu1 %vm3049_vm0, %v3048_v0 }
 0x383   :  { %2558 = vmatpush3.bf16.msra.mxu0 %v3594_v21  ;;  %2578 = vmatpush3.bf16.msra.mxu1 %v3600_v22 }
 0x384   :  { %2559 = vmatprep.subr.bf16.mxu0 %v3048_v0  ;;  %2579 = vmatprep.subr.bf16.mxu1 %v3048_v0 }
 0x387   :  { %2560 = vmatpush3.bf16.msra.mxu0 %v3608_v23  ;;  %2580 = vmatpush3.bf16.msra.mxu1 %v3614_v24 }
 0x388   :  { %2561 = vmatprep.subr.bf16.mxu0 %v3048_v0  ;;  %2581 = vmatprep.subr.bf16.mxu1 %v3048_v0 }
 0x38b   :  { %2562 = vmatpush3.bf16.msra.mxu0 %v3622_v25  ;;  %2582 = vmatpush3.bf16.msra.mxu1 %v3628_v26 }
 0x38c   :  { %2563 = vmatprep.subr.bf16.mxu0 %v3048_v0  ;;  %2583 = vmatprep.subr.bf16.mxu1 %v3048_v0 }
 0x38f   :  { %2564 = vmatpush3.bf16.msra.mxu0 %v3636_v27  ;;  %2584 = vmatpush3.bf16.msra.mxu1 %v3157_v10 }
 0x390   :  { %2565 = vmatprep.subr.bf16.mxu0 %v3048_v0  ;;  %2585 = vmatprep.subr.bf16.mxu1 %v3048_v0 }
 0x393   :  { %2566 = vmatpush3.bf16.msra.mxu0 %v3164_v11  ;;  %2586 = vmatpush3.bf16.msra.mxu1 %v3171_v12 }
 0x394   :  { %2567 = vmatprep.subr.bf16.mxu0 %v3048_v0  ;;  %2587 = vmatprep.subr.bf16.mxu1 %v3048_v0 }
 0x397   :  { %2568 = vmatpush3.bf16.msra.mxu0 %v3178_v13  ;;  %2588 = vmatpush3.bf16.msra.mxu1 %v3185_v14 }
 0x398   :  { %2569 = vmatprep.subr.bf16.mxu0 %v3048_v0  ;;  %2589 = vmatprep.subr.bf16.mxu1 %v3048_v0 }
 0x39b   :  { %2570 = vmatpush3.bf16.msra.mxu0 %v3190_v15  ;;  %2590 = vmatpush3.bf16.msra.mxu1 %v3202_v17  ;;  %v929_v15 = vunpack.c.l.bf16 %v927_v39 }
 0x39c   :  { %2595 = vmatprep.subr.bf16.mxu0 %v3048_v0  ;;  %2615 = vmatprep.subr.bf16.mxu1 %v3048_v0 }
 0x431   :  { %v919_v10 = vpop.f32.mrb[24].mxu0  ;;  %v964_v11 = vpop.f32.mrb[24].mxu1 }
 0x432   :  { %v2493_v12 = vpop.f32.mrb[25].mxu0  ;;  %v2513_v62 = vpop.f32.mrb[25].mxu1  ;;  %v970_v17 = vadd.f32 %v964_v11, %v929_v15  ;;  %v925_v41 = vadd.f32 %v919_v10, %v884_v40  ;;  %v3667_v11 = vld [vmem:[%s4087_s3 + $0x8] ss:$16 sps:$4 sm:$0xff]  }
 0x433   :  { %v922_v9 = vpop.f32.mrb[26].mxu0  ;;  %v967_v13 = vpop.f32.mrb[26].mxu1  ;;  %v3685_v12 = vld [vmem:[%s4087_s3 + $0x28] ss:$16 sps:$4 sm:$0xff]   ;;  %v3691_v62 = vld [vmem:[%s4087_s3 + $0x2c] ss:$16 sps:$4 sm:$0xff]  }
 0x434   :  { %v2494_v45 = vpop.f32.mrb[27].mxu0  ;;  %v2514_v14 = vpop.f32.mrb[27].mxu1  ;;  %v1062_v42 = vmul.f32 0.5, %v970_v17  ;;  %v1058_v43 = vmul.f32 0.5, %v925_v41  ;;  %v3699_v9 = vld [vmem:[%s4087_s3 + $0x48] ss:$16 sps:$4 sm:$0xff]  }
 0x435   :  { %v3705_v13 = vld [vmem:[%s4087_s3 + $0x4c] ss:$16 sps:$4 sm:$0xff]   ;;  %v3713_v45 = vld [vmem:[%s4087_s3 + $0x68] ss:$16 sps:$4 sm:$0xff]  }
 0x436   :  { %2942 = vtanh.f32 %v1062_v42  ;;  %v3719_v14 = vld [vmem:[%s4087_s3 + $0x6c] ss:$16 sps:$4 sm:$0xff]  }
 0x437   :  { %2944 = vtanh.f32 %v1058_v43 }
 0x440   :  { %v2943_v57 = vpop.eup %2942 }
 0x441   :  { %v2945_v60 = vpop.eup %2944  ;;  %v1064_v61 = vmul.f32 0.5, %v2943_v57 }
 0x442   :  { %v1060_v16 = vmul.f32 0.5, %v2945_v60 }
 0x443   :  { %v1065_v18 = vadd.f32 0.5, %v1064_v61 }
 0x444   :  { %v1061_v35 = vadd.f32 0.5, %v1060_v16 }
 0x445   :  { %v1071_v37 = vmul.f32 %v1065_v18, %v3534_v2  ;;  %v3673_v2 = vld [vmem:[%s4087_s3 + $0xc] ss:$16 sps:$4 sm:$0xff]  }
 0x451   :  { %v1006_v49 = vpop.f32.mrb[28].mxu0  ;;  %v1051_v50 = vpop.f32.mrb[28].mxu1 }
 0x452   :  { %v1012_v51 = vadd.f32 %v1006_v49, %v971_v47  ;;  %v2533_v52 = vpop.f32.mrb[29].mxu0  ;;  %v2553_v53 = vpop.f32.mrb[29].mxu1  ;;  %v1057_v54 = vadd.f32 %v1051_v50, %v1016_v48  ;;  %v1125_v47 = vrot.slane %v1939_v46, 4  ;;  %v1082_v49 = vunpack.c.l.bf16 %v1939_v46 }
 0x453   :  { %v1009_v55 = vpop.f32.mrb[30].mxu0  ;;  %v1054_v56 = vpop.f32.mrb[30].mxu1 }
 0x454   :  { %2946 = vtanh.f32 %v1012_v51  ;;  %v2534_v58 = vpop.f32.mrb[31].mxu0  ;;  %v2554_v59 = vpop.f32.mrb[31].mxu1  ;;  %v1067_v63 = vmul.f32 0.5, %v1057_v54  ;;  %v1127_v48 = vunpack.c.l.bf16 %v1125_v47  ;;  %v1940_v54 = vld [vmem:[%s4084_s0 + $0x48] sm:$0xff] }
 0x455   :  { %v1212_v55 = vrot.slane %v1940_v54, 4  ;;  %v1169_v56 = vunpack.c.l.bf16 %v1940_v54 }
 0x456   :  { %2948 = vtanh.f32 %v1067_v63 }
 0x457   :  { %v1214_v57 = vunpack.c.l.bf16 %v1212_v55 }
 0x45e   :  { %v2947_v36 = vpop.eup %2946 }
 0x45f   :  { %v1072_v1 = vmul.f32 %v2947_v36, %v1061_v35 }
 0x460   :  { %v2949_v4 = vpop.eup %2948 }
 0x461   :  { %v3661_v3 = vadd.f32 %v1072_v1, %v1071_v37  ;;  %v1069_v5 = vmul.f32 0.5, %v2949_v4 }
 0x463   :  { %2950 = vtanh.f32 %v3661_v3  ;;  %v1070_v6 = vadd.f32 0.5, %v1069_v5 }
 0x46d   :  { %v2951_v7 = vpop.eup %2950 }
 0x46e   :  { %v1075_v8 = vmul.f32 %v2951_v7, %v1070_v6 }
 0x470   :  { %1077 = vst [vmem:[#allocation4 + $0x18] sm:$0xff] %v1075_v8  ;;  %v1081_v10 = vpack.c.bf16 %v1075_v8, %v1075_v8 }
 0x472   :  { %2572 = vmatmul.mubr.bf16.vlgmr.msra.gmra.mrb[32].mxu0 %v1081_v10  ;;  %2592 = vmatmul.mubr.bf16.vlgmr.msra.gmra.mrb[32].mxu1 %v1081_v10 }
 0x473   :  { %2596 = vmatpush3.bf16.msra.mxu0 %v3667_v11  ;;  %2616 = vmatpush3.bf16.msra.mxu1 %v3673_v2 }
 0x474   :  { %2597 = vmatprep.subr.bf16.mxu0 %v3048_v0  ;;  %2617 = vmatprep.subr.bf16.mxu1 %v3048_v0 }
 0x475   :  { %2611 = vmatprep.mubr.msk.bf16.mxu0 %vm3049_vm0, %v3048_v0  ;;  %2631 = vmatprep.mubr.msk.bf16.mxu1 %vm3049_vm0, %v3048_v0 }
 0x477   :  { %2598 = vmatpush3.bf16.msra.mxu0 %v3685_v12  ;;  %2618 = vmatpush3.bf16.msra.mxu1 %v3691_v62 }
 0x478   :  { %2599 = vmatprep.subr.bf16.mxu0 %v3048_v0  ;;  %2619 = vmatprep.subr.bf16.mxu1 %v3048_v0 }
 0x47b   :  { %2600 = vmatpush3.bf16.msra.mxu0 %v3699_v9  ;;  %2620 = vmatpush3.bf16.msra.mxu1 %v3705_v13 }
 0x47c   :  { %2601 = vmatprep.subr.bf16.mxu0 %v3048_v0  ;;  %2621 = vmatprep.subr.bf16.mxu1 %v3048_v0 }
 0x47f   :  { %2602 = vmatpush3.bf16.msra.mxu0 %v3713_v45  ;;  %2622 = vmatpush3.bf16.msra.mxu1 %v3719_v14 }
 0x480   :  { %2603 = vmatprep.subr.bf16.mxu0 %v3048_v0  ;;  %2623 = vmatprep.subr.bf16.mxu1 %v3048_v0 }
 0x483   :  { %2604 = vmatpush3.bf16.msra.mxu0 %v3727_v38  ;;  %2624 = vmatpush3.bf16.msra.mxu1 %v3276_v28  ;;  %v3769_v28 = vld [vmem:[%s4087_s3 + $0x84] ss:$16 sps:$4 sm:$0xff]  }
 0x484   :  { %2605 = vmatprep.subr.bf16.mxu0 %v3048_v0  ;;  %2625 = vmatprep.subr.bf16.mxu1 %v3048_v0 }
 0x487   :  { %2606 = vmatpush3.bf16.msra.mxu0 %v3283_v29  ;;  %2626 = vmatpush3.bf16.msra.mxu1 %v3290_v30  ;;  %v3777_v29 = vld [vmem:[%s4087_s3 + $0xa0] ss:$16 sps:$4 sm:$0xff]   ;;  %v3783_v30 = vld [vmem:[%s4087_s3 + $0xa4] ss:$16 sps:$4 sm:$0xff]  }
 0x488   :  { %2607 = vmatprep.subr.bf16.mxu0 %v3048_v0  ;;  %2627 = vmatprep.subr.bf16.mxu1 %v3048_v0 }
 0x48b   :  { %2608 = vmatpush3.bf16.msra.mxu0 %v3297_v31  ;;  %2628 = vmatpush3.bf16.msra.mxu1 %v3304_v32  ;;  %v3791_v31 = vld [vmem:[%s4087_s3 + $0xc0] ss:$16 sps:$4 sm:$0xff]   ;;  %v3797_v32 = vld [vmem:[%s4087_s3 + $0xc4] ss:$16 sps:$4 sm:$0xff]  }
 0x48c   :  { %2609 = vmatprep.subr.bf16.mxu0 %v3048_v0  ;;  %2629 = vmatprep.subr.bf16.mxu1 %v3048_v0 }
 0x48f   :  { %2610 = vmatpush3.bf16.msra.mxu0 %v3311_v33  ;;  %2630 = vmatpush3.bf16.msra.mxu1 %v3318_v34  ;;  %v3805_v33 = vld [vmem:[%s4087_s3 + $0xe0] ss:$16 sps:$4 sm:$0xff]   ;;  %v3811_v34 = vld [vmem:[%s4087_s3 + $0xe4] ss:$16 sps:$4 sm:$0xff]  }
 0x490   :  { %2635 = vmatprep.subr.bf16.mxu0 %v3048_v0  ;;  %2655 = vmatprep.subr.bf16.mxu1 %v3048_v0 }
 0x492   :  { %2612 = vmatmul.mubr.bf16.vlgmr.msra.gmra.mrb[36].mxu0 %v1081_v10  ;;  %2632 = vmatmul.mubr.bf16.vlgmr.msra.gmra.mrb[36].mxu1 %v1081_v10 }
 0x493   :  { %2636 = vmatpush3.bf16.msra.mxu0 %v3576_v19  ;;  %2656 = vmatpush3.bf16.msra.mxu1 %v3582_v20 }
 0x494   :  { %2637 = vmatprep.subr.bf16.mxu0 %v3048_v0  ;;  %2657 = vmatprep.subr.bf16.mxu1 %v3048_v0 }
 0x495   :  { %2651 = vmatprep.mubr.msk.bf16.mxu0 %vm3049_vm0, %v3048_v0  ;;  %2671 = vmatprep.mubr.msk.bf16.mxu1 %vm3049_vm0, %v3048_v0 }
 0x497   :  { %2638 = vmatpush3.bf16.msra.mxu0 %v3594_v21  ;;  %2658 = vmatpush3.bf16.msra.mxu1 %v3600_v22 }
 0x498   :  { %2639 = vmatprep.subr.bf16.mxu0 %v3048_v0  ;;  %2659 = vmatprep.subr.bf16.mxu1 %v3048_v0 }
 0x49b   :  { %2640 = vmatpush3.bf16.msra.mxu0 %v3608_v23  ;;  %2660 = vmatpush3.bf16.msra.mxu1 %v3614_v24 }
 0x49c   :  { %2641 = vmatprep.subr.bf16.mxu0 %v3048_v0  ;;  %2661 = vmatprep.subr.bf16.mxu1 %v3048_v0 }
 0x49f   :  { %2642 = vmatpush3.bf16.msra.mxu0 %v3622_v25  ;;  %2662 = vmatpush3.bf16.msra.mxu1 %v3628_v26 }
 0x4a0   :  { %2643 = vmatprep.subr.bf16.mxu0 %v3048_v0  ;;  %2663 = vmatprep.subr.bf16.mxu1 %v3048_v0 }
 0x4a3   :  { %2644 = vmatpush3.bf16.msra.mxu0 %v3636_v27  ;;  %2664 = vmatpush3.bf16.msra.mxu1 %v3769_v28 }
 0x4a4   :  { %2645 = vmatprep.subr.bf16.mxu0 %v3048_v0  ;;  %2665 = vmatprep.subr.bf16.mxu1 %v3048_v0 }
 0x4a7   :  { %2646 = vmatpush3.bf16.msra.mxu0 %v3777_v29  ;;  %2666 = vmatpush3.bf16.msra.mxu1 %v3783_v30 }
 0x4a8   :  { %2647 = vmatprep.subr.bf16.mxu0 %v3048_v0  ;;  %2667 = vmatprep.subr.bf16.mxu1 %v3048_v0 }
 0x4ab   :  { %2648 = vmatpush3.bf16.msra.mxu0 %v3791_v31  ;;  %2668 = vmatpush3.bf16.msra.mxu1 %v3797_v32 }
 0x4ac   :  { %2649 = vmatprep.subr.bf16.mxu0 %v3048_v0  ;;  %2669 = vmatprep.subr.bf16.mxu1 %v3048_v0 }
 0x4af   :  { %2650 = vmatpush3.bf16.msra.mxu0 %v3805_v33  ;;  %2670 = vmatpush3.bf16.msra.mxu1 %v3811_v34 }
 0x4b0   :  { %2675 = vmatprep.subr.bf16.mxu0 %v3048_v0  ;;  %2695 = vmatprep.subr.bf16.mxu1 %v3048_v0 }
 0x545   :  { %v1117_v39 = vpop.f32.mrb[32].mxu0  ;;  %v1162_v15 = vpop.f32.mrb[32].mxu1 }
 0x546   :  { %v2573_v40 = vpop.f32.mrb[33].mxu0  ;;  %v2593_v17 = vpop.f32.mrb[33].mxu1  ;;  %v1168_v50 = vadd.f32 %v1162_v15, %v1127_v48  ;;  %v1123_v51 = vadd.f32 %v1117_v39, %v1082_v49  ;;  %v3858_v48 = vld [vmem:[%s4087_s3 + $0xa8] ss:$16 sps:$4 sm:$0xff]   ;;  %v3864_v49 = vld [vmem:[%s4087_s3 + $0xac] ss:$16 sps:$4 sm:$0xff]  }
 0x547   :  { %v1120_v41 = vpop.f32.mrb[34].mxu0  ;;  %v1165_v42 = vpop.f32.mrb[34].mxu1 }
 0x548   :  { %v2574_v43 = vpop.f32.mrb[35].mxu0  ;;  %v2594_v44 = vpop.f32.mrb[35].mxu1  ;;  %v1260_v52 = vmul.f32 0.5, %v1168_v50  ;;  %v1256_v53 = vmul.f32 0.5, %v1123_v51  ;;  %v3872_v50 = vld [vmem:[%s4087_s3 + $0xc8] ss:$16 sps:$4 sm:$0xff]  }
 0x549   :  { %v3878_v51 = vld [vmem:[%s4087_s3 + $0xcc] ss:$16 sps:$4 sm:$0xff]  }
 0x54a   :  { %2952 = vtanh.f32 %v1260_v52  ;;  %v3886_v52 = vld [vmem:[%s4087_s3 + $0xe8] ss:$16 sps:$4 sm:$0xff]  }
 0x54b   :  { %2954 = vtanh.f32 %v1256_v53  ;;  %v3892_v53 = vld [vmem:[%s4087_s3 + $0xec] ss:$16 sps:$4 sm:$0xff]  }
 0x554   :  { %v2953_v36 = vpop.eup %2952 }
 0x555   :  { %v2955_v4 = vpop.eup %2954  ;;  %v1262_v5 = vmul.f32 0.5, %v2953_v36 }
 0x556   :  { %v1258_v7 = vmul.f32 0.5, %v2955_v4 }
 0x557   :  { %v1263_v8 = vadd.f32 0.5, %v1262_v5  ;;  %v1942_v5 = vld [vmem:[%s4084_s0 + $0x58] sm:$0xff] }
 0x558   :  { %v1259_v10 = vadd.f32 0.5, %v1258_v7  ;;  %v1367_v7 = vunpack.c.l.bf16 %v1942_v5 }
 0x559   :  { %v1269_v15 = vmul.f32 %v1263_v8, %v3661_v3  ;;  %v3850_v3 = vld [vmem:[%s4087_s3 + $0x8c] ss:$16 sps:$4 sm:$0xff]  }
 0x565   :  { %v1204_v58 = vpop.f32.mrb[36].mxu0  ;;  %v1249_v59 = vpop.f32.mrb[36].mxu1 }
 0x566   :  { %v1210_v60 = vadd.f32 %v1204_v58, %v1169_v56  ;;  %v2613_v61 = vpop.f32.mrb[37].mxu0  ;;  %v2633_v63 = vpop.f32.mrb[37].mxu1  ;;  %v1255_v16 = vadd.f32 %v1249_v59, %v1214_v57 }
 0x567   :  { %v1207_v18 = vpop.f32.mrb[38].mxu0  ;;  %v1252_v35 = vpop.f32.mrb[38].mxu1  ;;  %v1941_v63 = vld [vmem:[%s4084_s0 + $0x50] sm:$0xff] }
 0x568   :  { %2956 = vtanh.f32 %v1210_v60  ;;  %v2614_v37 = vpop.f32.mrb[39].mxu0  ;;  %v2634_v1 = vpop.f32.mrb[39].mxu1  ;;  %v1265_v6 = vmul.f32 0.5, %v1255_v16  ;;  %v1323_v16 = vrot.slane %v1941_v63, 4  ;;  %v1280_v35 = vunpack.c.l.bf16 %v1941_v63 }
 0x56a   :  { %2958 = vtanh.f32 %v1265_v6  ;;  %v1325_v18 = vunpack.c.l.bf16 %v1323_v16  ;;  %v1410_v6 = vrot.slane %v1942_v5, 4 }
 0x56c   :  { %v1412_v8 = vunpack.c.l.bf16 %v1410_v6 }
 0x572   :  { %v2957_v39 = vpop.eup %2956 }
 0x573   :  { %v1270_v40 = vmul.f32 %v2957_v39, %v1259_v10 }
 0x574   :  { %v2959_v41 = vpop.eup %2958 }
 0x575   :  { %v3823_v17 = vadd.f32 %v1270_v40, %v1269_v15  ;;  %v1267_v42 = vmul.f32 0.5, %v2959_v41 }
 0x577   :  { %2960 = vtanh.f32 %v3823_v17  ;;  %v1268_v43 = vadd.f32 0.5, %v1267_v42 }
 0x581   :  { %v2961_v44 = vpop.eup %2960 }
 0x582   :  { %v1273_v46 = vmul.f32 %v2961_v44, %v1268_v43 }
 0x584   :  { %1275 = vst [vmem:[#allocation4 + $0x20] sm:$0xff] %v1273_v46  ;;  %v1279_v47 = vpack.c.bf16 %v1273_v46, %v1273_v46 }
 0x586   :  { %2652 = vmatmul.mubr.bf16.vlgmr.msra.gmra.mrb[40].mxu0 %v1279_v47  ;;  %2672 = vmatmul.mubr.bf16.vlgmr.msra.gmra.mrb[40].mxu1 %v1279_v47 }
 0x587   :  { %2676 = vmatpush3.bf16.msra.mxu0 %v3667_v11  ;;  %2696 = vmatpush3.bf16.msra.mxu1 %v3673_v2 }
 0x588   :  { %2677 = vmatprep.subr.bf16.mxu0 %v3048_v0  ;;  %2697 = vmatprep.subr.bf16.mxu1 %v3048_v0 }
 0x589   :  { %2691 = vmatprep.mubr.msk.bf16.mxu0 %vm3049_vm0, %v3048_v0  ;;  %2711 = vmatprep.mubr.msk.bf16.mxu1 %vm3049_vm0, %v3048_v0 }
 0x58b   :  { %2678 = vmatpush3.bf16.msra.mxu0 %v3685_v12  ;;  %2698 = vmatpush3.bf16.msra.mxu1 %v3691_v62 }
 0x58c   :  { %2679 = vmatprep.subr.bf16.mxu0 %v3048_v0  ;;  %2699 = vmatprep.subr.bf16.mxu1 %v3048_v0 }
 0x58f   :  { %2680 = vmatpush3.bf16.msra.mxu0 %v3699_v9  ;;  %2700 = vmatpush3.bf16.msra.mxu1 %v3705_v13 }
 0x590   :  { %2681 = vmatprep.subr.bf16.mxu0 %v3048_v0  ;;  %2701 = vmatprep.subr.bf16.mxu1 %v3048_v0 }
 0x593   :  { %2682 = vmatpush3.bf16.msra.mxu0 %v3713_v45  ;;  %2702 = vmatpush3.bf16.msra.mxu1 %v3719_v14 }
 0x594   :  { %2683 = vmatprep.subr.bf16.mxu0 %v3048_v0  ;;  %2703 = vmatprep.subr.bf16.mxu1 %v3048_v0 }
 0x597   :  { %2684 = vmatpush3.bf16.msra.mxu0 %v3727_v38  ;;  %2704 = vmatpush3.bf16.msra.mxu1 %v3850_v3 }
 0x598   :  { %2685 = vmatprep.subr.bf16.mxu0 %v3048_v0  ;;  %2705 = vmatprep.subr.bf16.mxu1 %v3048_v0 }
 0x59b   :  { %2686 = vmatpush3.bf16.msra.mxu0 %v3858_v48  ;;  %2706 = vmatpush3.bf16.msra.mxu1 %v3864_v49 }
 0x59c   :  { %2687 = vmatprep.subr.bf16.mxu0 %v3048_v0  ;;  %2707 = vmatprep.subr.bf16.mxu1 %v3048_v0 }
 0x59f   :  { %2688 = vmatpush3.bf16.msra.mxu0 %v3872_v50  ;;  %2708 = vmatpush3.bf16.msra.mxu1 %v3878_v51 }
 0x5a0   :  { %2689 = vmatprep.subr.bf16.mxu0 %v3048_v0  ;;  %2709 = vmatprep.subr.bf16.mxu1 %v3048_v0 }
 0x5a3   :  { %2690 = vmatpush3.bf16.msra.mxu0 %v3886_v52  ;;  %2710 = vmatpush3.bf16.msra.mxu1 %v3892_v53 }
 0x5a4   :  { %2715 = vmatprep.subr.bf16.mxu0 %v3048_v0  ;;  %2735 = vmatprep.subr.bf16.mxu1 %v3048_v0 }
 0x5a6   :  { %2692 = vmatmul.mubr.bf16.vlgmr.msra.gmra.mrb[44].mxu0 %v1279_v47  ;;  %2712 = vmatmul.mubr.bf16.vlgmr.msra.gmra.mrb[44].mxu1 %v1279_v47 }
 0x5a7   :  { %2716 = vmatpush3.bf16.msra.mxu0 %v3576_v19  ;;  %2736 = vmatpush3.bf16.msra.mxu1 %v3582_v20 }
 0x5a8   :  { %2717 = vmatprep.subr.bf16.mxu0 %v3048_v0  ;;  %2737 = vmatprep.subr.bf16.mxu1 %v3048_v0 }
 0x5a9   :  { %2731 = vmatprep.mubr.msk.bf16.mxu0 %vm3049_vm0, %v3048_v0  ;;  %2751 = vmatprep.mubr.msk.bf16.mxu1 %vm3049_vm0, %v3048_v0 }
 0x5ab   :  { %2718 = vmatpush3.bf16.msra.mxu0 %v3594_v21  ;;  %2738 = vmatpush3.bf16.msra.mxu1 %v3600_v22 }
 0x5ac   :  { %2719 = vmatprep.subr.bf16.mxu0 %v3048_v0  ;;  %2739 = vmatprep.subr.bf16.mxu1 %v3048_v0 }
 0x5af   :  { %2720 = vmatpush3.bf16.msra.mxu0 %v3608_v23  ;;  %2740 = vmatpush3.bf16.msra.mxu1 %v3614_v24 }
 0x5b0   :  { %2721 = vmatprep.subr.bf16.mxu0 %v3048_v0  ;;  %2741 = vmatprep.subr.bf16.mxu1 %v3048_v0 }
 0x5b3   :  { %2722 = vmatpush3.bf16.msra.mxu0 %v3622_v25  ;;  %2742 = vmatpush3.bf16.msra.mxu1 %v3628_v26 }
 0x5b4   :  { %2723 = vmatprep.subr.bf16.mxu0 %v3048_v0  ;;  %2743 = vmatprep.subr.bf16.mxu1 %v3048_v0 }
 0x5b7   :  { %2724 = vmatpush3.bf16.msra.mxu0 %v3636_v27  ;;  %2744 = vmatpush3.bf16.msra.mxu1 %v3769_v28 }
 0x5b8   :  { %2725 = vmatprep.subr.bf16.mxu0 %v3048_v0  ;;  %2745 = vmatprep.subr.bf16.mxu1 %v3048_v0 }
 0x5bb   :  { %2726 = vmatpush3.bf16.msra.mxu0 %v3777_v29  ;;  %2746 = vmatpush3.bf16.msra.mxu1 %v3783_v30 }
 0x5bc   :  { %2727 = vmatprep.subr.bf16.mxu0 %v3048_v0  ;;  %2747 = vmatprep.subr.bf16.mxu1 %v3048_v0 }
 0x5bf   :  { %2728 = vmatpush3.bf16.msra.mxu0 %v3791_v31  ;;  %2748 = vmatpush3.bf16.msra.mxu1 %v3797_v32 }
 0x5c0   :  { %2729 = vmatprep.subr.bf16.mxu0 %v3048_v0  ;;  %2749 = vmatprep.subr.bf16.mxu1 %v3048_v0 }
 0x5c3   :  { %2730 = vmatpush3.bf16.msra.mxu0 %v3805_v33  ;;  %2750 = vmatpush3.bf16.msra.mxu1 %v3811_v34 }
 0x5c4   :  { %2755 = vmatprep.subr.bf16.mxu0 %v3048_v0  ;;  %2775 = vmatprep.subr.bf16.mxu1 %v3048_v0 }
 0x659   :  { %v1315_v54 = vpop.f32.mrb[40].mxu0  ;;  %v1360_v55 = vpop.f32.mrb[40].mxu1 }
 0x65a   :  { %v2653_v56 = vpop.f32.mrb[41].mxu0  ;;  %v2673_v57 = vpop.f32.mrb[41].mxu1  ;;  %v1366_v36 = vadd.f32 %v1360_v55, %v1325_v18  ;;  %v1321_v37 = vadd.f32 %v1315_v54, %v1280_v35 }
 0x65b   :  { %v1318_v58 = vpop.f32.mrb[42].mxu0  ;;  %v1363_v59 = vpop.f32.mrb[42].mxu1 }
 0x65c   :  { %v2654_v60 = vpop.f32.mrb[43].mxu0  ;;  %v2674_v61 = vpop.f32.mrb[43].mxu1  ;;  %v1458_v1 = vmul.f32 0.5, %v1366_v36  ;;  %v1454_v4 = vmul.f32 0.5, %v1321_v37 }
 0x65e   :  { %2962 = vtanh.f32 %v1458_v1 }
 0x65f   :  { %2964 = vtanh.f32 %v1454_v4 }
 0x668   :  { %v2963_v46 = vpop.eup %2962 }
 0x669   :  { %v2965_v55 = vpop.eup %2964  ;;  %v1460_v56 = vmul.f32 0.5, %v2963_v46 }
 0x66a   :  { %v1456_v58 = vmul.f32 0.5, %v2965_v55 }
 0x66b   :  { %v1461_v59 = vadd.f32 0.5, %v1460_v56 }
 0x66c   :  { %v1457_v60 = vadd.f32 0.5, %v1456_v58 }
 0x66d   :  { %v1467_v63 = vmul.f32 %v1461_v59, %v3823_v17  ;;  %v1944_v17 = vld [vmem:[%s4084_s0 + $0x68] sm:$0xff] }
 0x66e   :  { %v1608_v6 = vrot.slane %v1944_v17, 4 }
 0x679   :  { %v1402_v10 = vpop.f32.mrb[44].mxu0  ;;  %v1447_v39 = vpop.f32.mrb[44].mxu1 }
 0x67a   :  { %v1408_v15 = vadd.f32 %v1402_v10, %v1367_v7  ;;  %v2693_v40 = vpop.f32.mrb[45].mxu0  ;;  %v2713_v41 = vpop.f32.mrb[45].mxu1  ;;  %v1453_v42 = vadd.f32 %v1447_v39, %v1412_v8  ;;  %v1565_v7 = vunpack.c.l.bf16 %v1944_v17  ;;  %v1610_v8 = vunpack.c.l.bf16 %v1608_v6 }
 0x67b   :  { %v1405_v43 = vpop.f32.mrb[46].mxu0  ;;  %v1450_v44 = vpop.f32.mrb[46].mxu1 }
 0x67c   :  { %2966 = vtanh.f32 %v1408_v15  ;;  %v2694_v47 = vpop.f32.mrb[47].mxu0  ;;  %v2714_v54 = vpop.f32.mrb[47].mxu1  ;;  %v1463_v57 = vmul.f32 0.5, %v1453_v42 }
 0x67e   :  { %2968 = vtanh.f32 %v1463_v57 }
 0x686   :  { %v2967_v61 = vpop.eup %2966 }
 0x687   :  { %v1468_v16 = vmul.f32 %v2967_v61, %v1457_v60 }
 0x688   :  { %v2969_v35 = vpop.eup %2968 }
 0x689   :  { %v3940_v18 = vadd.f32 %v1468_v16, %v1467_v63  ;;  %v1465_v36 = vmul.f32 0.5, %v2969_v35 }
 0x68b   :  { %2970 = vtanh.f32 %v3940_v18  ;;  %v1466_v37 = vadd.f32 0.5, %v1465_v36 }
 0x695   :  { %v2971_v1 = vpop.eup %2970 }
 0x696   :  { %v1471_v4 = vmul.f32 %v2971_v1, %v1466_v37 }
 0x698   :  { %1473 = vst [vmem:[#allocation4 + $0x28] sm:$0xff] %v1471_v4  ;;  %v1477_v5 = vpack.c.bf16 %v1471_v4, %v1471_v4 }
 0x69a   :  { %2732 = vmatmul.mubr.bf16.vlgmr.msra.gmra.mrb[48].mxu0 %v1477_v5  ;;  %2752 = vmatmul.mubr.bf16.vlgmr.msra.gmra.mrb[48].mxu1 %v1477_v5 }
 0x69b   :  { %2756 = vmatpush3.bf16.msra.mxu0 %v3667_v11  ;;  %2776 = vmatpush3.bf16.msra.mxu1 %v3673_v2 }
 0x69c   :  { %2757 = vmatprep.subr.bf16.mxu0 %v3048_v0  ;;  %2777 = vmatprep.subr.bf16.mxu1 %v3048_v0 }
 0x69d   :  { %2771 = vmatprep.mubr.msk.bf16.mxu0 %vm3049_vm0, %v3048_v0  ;;  %2791 = vmatprep.mubr.msk.bf16.mxu1 %vm3049_vm0, %v3048_v0 }
 0x69f   :  { %2758 = vmatpush3.bf16.msra.mxu0 %v3685_v12  ;;  %2778 = vmatpush3.bf16.msra.mxu1 %v3691_v62 }
 0x6a0   :  { %2759 = vmatprep.subr.bf16.mxu0 %v3048_v0  ;;  %2779 = vmatprep.subr.bf16.mxu1 %v3048_v0 }
 0x6a3   :  { %2760 = vmatpush3.bf16.msra.mxu0 %v3699_v9  ;;  %2780 = vmatpush3.bf16.msra.mxu1 %v3705_v13 }
 0x6a4   :  { %2761 = vmatprep.subr.bf16.mxu0 %v3048_v0  ;;  %2781 = vmatprep.subr.bf16.mxu1 %v3048_v0 }
 0x6a7   :  { %2762 = vmatpush3.bf16.msra.mxu0 %v3713_v45  ;;  %2782 = vmatpush3.bf16.msra.mxu1 %v3719_v14 }
 0x6a8   :  { %2763 = vmatprep.subr.bf16.mxu0 %v3048_v0  ;;  %2783 = vmatprep.subr.bf16.mxu1 %v3048_v0 }
 0x6ab   :  { %2764 = vmatpush3.bf16.msra.mxu0 %v3727_v38  ;;  %2784 = vmatpush3.bf16.msra.mxu1 %v3850_v3 }
 0x6ac   :  { %2765 = vmatprep.subr.bf16.mxu0 %v3048_v0  ;;  %2785 = vmatprep.subr.bf16.mxu1 %v3048_v0 }
 0x6af   :  { %2766 = vmatpush3.bf16.msra.mxu0 %v3858_v48  ;;  %2786 = vmatpush3.bf16.msra.mxu1 %v3864_v49 }
 0x6b0   :  { %2767 = vmatprep.subr.bf16.mxu0 %v3048_v0  ;;  %2787 = vmatprep.subr.bf16.mxu1 %v3048_v0 }
 0x6b3   :  { %2768 = vmatpush3.bf16.msra.mxu0 %v3872_v50  ;;  %2788 = vmatpush3.bf16.msra.mxu1 %v3878_v51 }
 0x6b4   :  { %2769 = vmatprep.subr.bf16.mxu0 %v3048_v0  ;;  %2789 = vmatprep.subr.bf16.mxu1 %v3048_v0 }
 0x6b7   :  { %2770 = vmatpush3.bf16.msra.mxu0 %v3886_v52  ;;  %2790 = vmatpush3.bf16.msra.mxu1 %v3892_v53 }
 0x6b8   :  { %2795 = vmatprep.subr.bf16.mxu0 %v3048_v0  ;;  %2815 = vmatprep.subr.bf16.mxu1 %v3048_v0 }
 0x6ba   :  { %2772 = vmatmul.mubr.bf16.vlgmr.msra.gmra.mrb[52].mxu0 %v1477_v5  ;;  %2792 = vmatmul.mubr.bf16.vlgmr.msra.gmra.mrb[52].mxu1 %v1477_v5 }
 0x6bb   :  { %2796 = vmatpush3.bf16.msra.mxu0 %v3576_v19  ;;  %2816 = vmatpush3.bf16.msra.mxu1 %v3582_v20 }
 0x6bc   :  { %2797 = vmatprep.subr.bf16.mxu0 %v3048_v0  ;;  %2817 = vmatprep.subr.bf16.mxu1 %v3048_v0 }
 0x6bd   :  { %2811 = vmatprep.mubr.msk.bf16.mxu0 %vm3049_vm0, %v3048_v0  ;;  %2831 = vmatprep.mubr.msk.bf16.mxu1 %vm3049_vm0, %v3048_v0 }
 0x6bf   :  { %2798 = vmatpush3.bf16.msra.mxu0 %v3594_v21  ;;  %2818 = vmatpush3.bf16.msra.mxu1 %v3600_v22 }
 0x6c0   :  { %2799 = vmatprep.subr.bf16.mxu0 %v3048_v0  ;;  %2819 = vmatprep.subr.bf16.mxu1 %v3048_v0 }
 0x6c3   :  { %2800 = vmatpush3.bf16.msra.mxu0 %v3608_v23  ;;  %2820 = vmatpush3.bf16.msra.mxu1 %v3614_v24 }
 0x6c4   :  { %2801 = vmatprep.subr.bf16.mxu0 %v3048_v0  ;;  %2821 = vmatprep.subr.bf16.mxu1 %v3048_v0 }
 0x6c7   :  { %2802 = vmatpush3.bf16.msra.mxu0 %v3622_v25  ;;  %2822 = vmatpush3.bf16.msra.mxu1 %v3628_v26 }
 0x6c8   :  { %2803 = vmatprep.subr.bf16.mxu0 %v3048_v0  ;;  %2823 = vmatprep.subr.bf16.mxu1 %v3048_v0 }
 0x6cb   :  { %2804 = vmatpush3.bf16.msra.mxu0 %v3636_v27  ;;  %2824 = vmatpush3.bf16.msra.mxu1 %v3769_v28  ;;  %v1943_v27 = vld [vmem:[%s4084_s0 + $0x60] sm:$0xff] }
 0x6cc   :  { %2805 = vmatprep.subr.bf16.mxu0 %v3048_v0  ;;  %2825 = vmatprep.subr.bf16.mxu1 %v3048_v0  ;;  %v1521_v28 = vrot.slane %v1943_v27, 4 }
 0x6cf   :  { %2806 = vmatpush3.bf16.msra.mxu0 %v3777_v29  ;;  %2826 = vmatpush3.bf16.msra.mxu1 %v3783_v30  ;;  %v1523_v29 = vunpack.c.l.bf16 %v1521_v28  ;;  %v1478_v30 = vunpack.c.l.bf16 %v1943_v27 }
 0x6d0   :  { %2807 = vmatprep.subr.bf16.mxu0 %v3048_v0  ;;  %2827 = vmatprep.subr.bf16.mxu1 %v3048_v0 }
 0x6d3   :  { %2808 = vmatpush3.bf16.msra.mxu0 %v3791_v31  ;;  %2828 = vmatpush3.bf16.msra.mxu1 %v3797_v32 }
 0x6d4   :  { %2809 = vmatprep.subr.bf16.mxu0 %v3048_v0  ;;  %2829 = vmatprep.subr.bf16.mxu1 %v3048_v0 }
 0x6d7   :  { %2810 = vmatpush3.bf16.msra.mxu0 %v3805_v33  ;;  %2830 = vmatpush3.bf16.msra.mxu1 %v3811_v34 }
 0x6d8   :  { %2835 = vmatprep.subr.bf16.mxu0 %v3048_v0  ;;  %2855 = vmatprep.subr.bf16.mxu1 %v3048_v0 }
 0x76d   :  { %v1513_v19 = vpop.f32.mrb[48].mxu0  ;;  %v1558_v20 = vpop.f32.mrb[48].mxu1 }
 0x76e   :  { %v2733_v21 = vpop.f32.mrb[49].mxu0  ;;  %v2753_v22 = vpop.f32.mrb[49].mxu1  ;;  %v1564_v31 = vadd.f32 %v1558_v20, %v1523_v29  ;;  %v1519_v32 = vadd.f32 %v1513_v19, %v1478_v30 }
 0x76f   :  { %v1516_v23 = vpop.f32.mrb[50].mxu0  ;;  %v1561_v24 = vpop.f32.mrb[50].mxu1 }
 0x770   :  { %v2734_v25 = vpop.f32.mrb[51].mxu0  ;;  %v2754_v26 = vpop.f32.mrb[51].mxu1  ;;  %v1656_v33 = vmul.f32 0.5, %v1564_v31  ;;  %v1652_v34 = vmul.f32 0.5, %v1519_v32 }
 0x772   :  { %2972 = vtanh.f32 %v1656_v33 }
 0x773   :  { %2974 = vtanh.f32 %v1652_v34 }
 0x77c   :  { %v2973_v46 = vpop.eup %2972 }
 0x77d   :  { %v2975_v55 = vpop.eup %2974  ;;  %v1658_v56 = vmul.f32 0.5, %v2973_v46 }
 0x77e   :  { %v1654_v58 = vmul.f32 0.5, %v2975_v55 }
 0x77f   :  { %v1659_v59 = vadd.f32 0.5, %v1658_v56 }
 0x780   :  { %v1655_v60 = vadd.f32 0.5, %v1654_v58 }
 0x781   :  { %v1665_v63 = vmul.f32 %v1659_v59, %v3940_v18 }
 0x78d   :  { %v1600_v10 = vpop.f32.mrb[52].mxu0  ;;  %v1645_v39 = vpop.f32.mrb[52].mxu1 }
 0x78e   :  { %v1606_v15 = vadd.f32 %v1600_v10, %v1565_v7  ;;  %v2773_v40 = vpop.f32.mrb[53].mxu0  ;;  %v2793_v41 = vpop.f32.mrb[53].mxu1  ;;  %v1651_v42 = vadd.f32 %v1645_v39, %v1610_v8 }
 0x78f   :  { %v1603_v43 = vpop.f32.mrb[54].mxu0  ;;  %v1648_v44 = vpop.f32.mrb[54].mxu1 }
 0x790   :  { %2976 = vtanh.f32 %v1606_v15  ;;  %v2774_v47 = vpop.f32.mrb[55].mxu0  ;;  %v2794_v54 = vpop.f32.mrb[55].mxu1  ;;  %v1661_v57 = vmul.f32 0.5, %v1651_v42 }
 0x792   :  { %2978 = vtanh.f32 %v1661_v57 }
 0x79a   :  { %v2977_v61 = vpop.eup %2976 }
 0x79b   :  { %v1666_v16 = vmul.f32 %v2977_v61, %v1655_v60 }
 0x79c   :  { %v2979_v36 = vpop.eup %2978 }
 0x79d   :  { %v4022_v35 = vadd.f32 %v1666_v16, %v1665_v63  ;;  %v1663_v37 = vmul.f32 0.5, %v2979_v36 }
 0x79f   :  { %2980 = vtanh.f32 %v4022_v35  ;;  %v1664_v1 = vadd.f32 0.5, %v1663_v37 }
 0x7a9   :  { %v2981_v4 = vpop.eup %2980 }
 0x7aa   :  { %v1669_v5 = vmul.f32 %v2981_v4, %v1664_v1 }
 0x7ac   :  { %1671 = vst [vmem:[#allocation4 + $0x30] sm:$0xff] %v1669_v5  ;;  %v1675_v19 = vpack.c.bf16 %v1669_v5, %v1669_v5 }
 0x7ae   :  { %2812 = vmatmul.mubr.bf16.vlgmr.msra.gmra.mrb[56].mxu0 %v1675_v19  ;;  %2832 = vmatmul.mubr.bf16.vlgmr.msra.gmra.mrb[56].mxu1 %v1675_v19 }
 0x7af   :  { %2836 = vmatpush3.bf16.msra.mxu0 %v3667_v11  ;;  %2856 = vmatpush3.bf16.msra.mxu1 %v3673_v2 }
 0x7b0   :  { %2837 = vmatprep.subr.bf16.mxu0 %v3048_v0  ;;  %2857 = vmatprep.subr.bf16.mxu1 %v3048_v0 }
 0x7b1   :  { %2851 = vmatprep.mubr.msk.bf16.mxu0 %vm3049_vm0, %v3048_v0  ;;  %2871 = vmatprep.mubr.msk.bf16.mxu1 %vm3049_vm0, %v3048_v0 }
 0x7b3   :  { %2838 = vmatpush3.bf16.msra.mxu0 %v3685_v12  ;;  %2858 = vmatpush3.bf16.msra.mxu1 %v3691_v62 }
 0x7b4   :  { %2839 = vmatprep.subr.bf16.mxu0 %v3048_v0  ;;  %2859 = vmatprep.subr.bf16.mxu1 %v3048_v0 }
 0x7b7   :  { %2840 = vmatpush3.bf16.msra.mxu0 %v3699_v9  ;;  %2860 = vmatpush3.bf16.msra.mxu1 %v3705_v13 }
 0x7b8   :  { %2841 = vmatprep.subr.bf16.mxu0 %v3048_v0  ;;  %2861 = vmatprep.subr.bf16.mxu1 %v3048_v0 }
 0x7bb   :  { %2842 = vmatpush3.bf16.msra.mxu0 %v3713_v45  ;;  %2862 = vmatpush3.bf16.msra.mxu1 %v3719_v14 }
 0x7bc   :  { %2843 = vmatprep.subr.bf16.mxu0 %v3048_v0  ;;  %2863 = vmatprep.subr.bf16.mxu1 %v3048_v0 }
 0x7bf   :  { %2844 = vmatpush3.bf16.msra.mxu0 %v3727_v38  ;;  %2864 = vmatpush3.bf16.msra.mxu1 %v3850_v3  ;;  %v1945_v38 = vld [vmem:[%s4084_s0 + $0x70] sm:$0xff] }
 0x7c0   :  { %2845 = vmatprep.subr.bf16.mxu0 %v3048_v0  ;;  %2865 = vmatprep.subr.bf16.mxu1 %v3048_v0  ;;  %v1719_v3 = vrot.slane %v1945_v38, 4 }
 0x7c3   :  { %2846 = vmatpush3.bf16.msra.mxu0 %v3858_v48  ;;  %2866 = vmatpush3.bf16.msra.mxu1 %v3864_v49  ;;  %v1676_v48 = vunpack.c.l.bf16 %v1945_v38 }
 0x7c4   :  { %2847 = vmatprep.subr.bf16.mxu0 %v3048_v0  ;;  %2867 = vmatprep.subr.bf16.mxu1 %v3048_v0 }
 0x7c7   :  { %2848 = vmatpush3.bf16.msra.mxu0 %v3872_v50  ;;  %2868 = vmatpush3.bf16.msra.mxu1 %v3878_v51 }
 0x7c8   :  { %2849 = vmatprep.subr.bf16.mxu0 %v3048_v0  ;;  %2869 = vmatprep.subr.bf16.mxu1 %v3048_v0  ;;  %v1721_v0 = vunpack.c.l.bf16 %v1719_v3 }
 0x7cb   :  { %2850 = vmatpush3.bf16.msra.mxu0 %v3886_v52  ;;  %2870 = vmatpush3.bf16.msra.mxu1 %v3892_v53  ;;  %v1946_v53 = vld [vmem:[%s4084_s0 + $0x78] sm:$0xff] }
 0x7cc   :  { %v1806_v18 = vrot.slane %v1946_v53, 4  ;;  %v1763_v20 = vunpack.c.l.bf16 %v1946_v53 }
 0x7ce   :  { %2852 = vmatmul.mubr.bf16.vlgmr.msra.gmra.mrb[60].mxu0 %v1675_v19  ;;  %2872 = vmatmul.mubr.bf16.vlgmr.msra.gmra.mrb[60].mxu1 %v1675_v19  ;;  %v1808_v21 = vunpack.c.l.bf16 %v1806_v18 }
 0x881   :  { %v1711_v11 = vpop.f32.mrb[56].mxu0  ;;  %v1756_v2 = vpop.f32.mrb[56].mxu1 }
 0x882   :  { %v2813_v12 = vpop.f32.mrb[57].mxu0  ;;  %v2833_v62 = vpop.f32.mrb[57].mxu1  ;;  %v1762_v49 = vadd.f32 %v1756_v2, %v1721_v0  ;;  %v1717_v50 = vadd.f32 %v1711_v11, %v1676_v48 }
 0x883   :  { %v1714_v9 = vpop.f32.mrb[58].mxu0  ;;  %v1759_v13 = vpop.f32.mrb[58].mxu1 }
 0x884   :  { %v2814_v45 = vpop.f32.mrb[59].mxu0  ;;  %v2834_v14 = vpop.f32.mrb[59].mxu1  ;;  %v1854_v51 = vmul.f32 0.5, %v1762_v49  ;;  %v1850_v52 = vmul.f32 0.5, %v1717_v50 }
 0x886   :  { %2982 = vtanh.f32 %v1854_v51 }
 0x887   :  { %2984 = vtanh.f32 %v1850_v52 }
 0x890   :  { %v2983_v30 = vpop.eup %2982 }
 0x891   :  { %v2985_v33 = vpop.eup %2984  ;;  %v1856_v34 = vmul.f32 0.5, %v2983_v30 }
 0x892   :  { %v1852_v6 = vmul.f32 0.5, %v2985_v33 }
 0x893   :  { %v1857_v7 = vadd.f32 0.5, %v1856_v34 }
 0x894   :  { %v1853_v8 = vadd.f32 0.5, %v1852_v6 }
 0x895   :  { %v1863_v39 = vmul.f32 %v1857_v7, %v4022_v35 }
 0x8a1   :  { %v1798_v22 = vpop.f32.mrb[60].mxu0  ;;  %v1843_v23 = vpop.f32.mrb[60].mxu1 }
 0x8a2   :  { %v1804_v24 = vadd.f32 %v1798_v22, %v1763_v20  ;;  %v2853_v25 = vpop.f32.mrb[61].mxu0  ;;  %v2873_v26 = vpop.f32.mrb[61].mxu1  ;;  %v1849_v27 = vadd.f32 %v1843_v23, %v1808_v21 }
 0x8a3   :  { %v1801_v28 = vpop.f32.mrb[62].mxu0  ;;  %v1846_v29 = vpop.f32.mrb[62].mxu1 }
 0x8a4   :  { %2986 = vtanh.f32 %v1804_v24  ;;  %v2854_v31 = vpop.f32.mrb[63].mxu0  ;;  %v2874_v32 = vpop.f32.mrb[63].mxu1  ;;  %v1859_v17 = vmul.f32 0.5, %v1849_v27 }
 0x8a6   :  { %2988 = vtanh.f32 %v1859_v17 }
 0x8ae   :  { %v2987_v10 = vpop.eup %2986 }
 0x8af   :  { %v1864_v15 = vmul.f32 %v2987_v10, %v1853_v8 }
 0x8b0   :  { %v2989_v41 = vpop.eup %2988 }
 0x8b1   :  { %v1865_v40 = vadd.f32 %v1864_v15, %v1863_v39  ;;  %v1861_v42 = vmul.f32 0.5, %v2989_v41 }
 0x8b3   :  { %2990 = vtanh.f32 %v1865_v40  ;;  %1876 = vst [vmem:[%s4090_s6] sm:$0xff] %v1865_v40  ;;  %v1862_v43 = vadd.f32 0.5, %v1861_v42 }
 0x8bd   :  { %v2991_v44 = vpop.eup %2990 }
 0x8be   :  { %v1867_v46 = vmul.f32 %v2991_v44, %v1862_v43 }
 0x8c0   :  { %1869 = vst [vmem:[#allocation4 + $0x38] sm:$0xff] %v1867_v46  ;;  %1875 = vst [vmem:[%s4089_s5] sm:$0xff] %v1867_v46 }
 0x8c1   :  { %3035 = shalt.err (!%p3032_p4)
}
 0x8c2   :  { %s3036_s13 = scalar_lea.hbm %s4088_s4, 1024 }
 0x8c3   :  { %p3037_p5 = scmp.ne.s32.totalorder %s4088_s4, %s3036_s13  ;;  %p3040_p6 = scmp.lt.u32.totalorder %s3036_s13, %s4088_s4 }
 0x8c5   :  { %p3042_p7 = pnand %p3040_p6, %p3037_p5 }
 0x8c7   :  { %3045 = shalt.err (!%p3042_p7)
}
 0x8c8   :  { %s3051_s5 = smov 128   ;;  %s3052_s18 = smov 8  }
 0x8c9   :  { %1888 = dma.vmem_to_hbm [thread:$0]  %s1883_s1, 1024, %s4088_s4, [#allocation5], %s3051_s5, %s3051_s5, %s3052_s18  }
 0x8ca   :  { %3046 = dma.done.wait [#allocation5], 1024  }
 0x8cb   :  { %3047 = vsyncadd [#allocation5], 4294966272 }
 0x8cc   :  { %1900 = vsyncpa [#allocation5], 1 }

</bundles_post_ra>
